<compile_context>
chip_gen: v7x
topology: tpu7x:2x2x1
jax: 0.10.0
libtpu: 0.0.40
codegen_flags: <defaults>
</compile_context>

<pallas_src>
import functools

import jax
import jax.numpy as jnp
import numpy as np
from jax.experimental import pallas as pl
from jax.experimental.pallas import tpu as pltpu


_NEG_INF = -1e30  # large finite negative (f32-safe) for causal masking / running-max init


# --------------------------------------------------------------------------------------- #
# Kernel 1: input RMSNorm (weight folded into w_qkv) + fused QKV proj + per-head q/k
#           RMSNorm + RoPE + 1/sqrt(hd) + KV-cache write.   grid = (seq row tiles,)
# --------------------------------------------------------------------------------------- #
def qkv_rope_kernel(hs_ref, cos_ref, sin_ref, qk_ln_ref, w_qkv_ref,
                    q_ref, kc_ref, vc_ref, *, eps):
    NKV, G, _, HD = q_ref.shape
    NH = NKV * G
    half = HD // 2
    scale = 1.0 / float(HD) ** 0.5

    hs = hs_ref[...].astype(jnp.float32)
    # input_layernorm: the elementwise weight is folded into the rows of w_qkv.
    x = hs * jax.lax.rsqrt(jnp.mean(hs * hs, axis=-1, keepdims=True) + eps)
    qkv = jnp.dot(x.astype(jnp.bfloat16), w_qkv_ref[...],
                  preferred_element_type=jnp.float32)            # [TS, (NH+2*NKV)*HD]

    # v: plain lane-dense copy into the value-cache slab (no norm / no rope).
    vc_ref[...] = qkv[:, (NH + NKV) * HD:].astype(vc_ref.dtype)

    c = cos_ref[...]                                             # [TS, HD//2] f32
    s = sin_ref[...]
    for idx in range(NH + NKV):                                  # q heads, then k heads
        xh = qkv[:, idx * HD:(idx + 1) * HD]                     # [TS, HD], lane-aligned slice
        # per-head RMSNorm (q_norm for idx < NH, k_norm otherwise)
        w = qk_ln_ref[idx:idx + 1, :]                            # [1, HD]
        xh = (xh * jax.lax.rsqrt(jnp.mean(xh * xh, axis=-1, keepdims=True) + eps)) * w
        # RoPE in split-half form (cos/sin halves of the default rope are identical)
        x1, x2 = xh[:, :half], xh[:, half:]
        xh = jnp.concatenate([x1 * c - x2 * s, x2 * c + x1 * s], axis=-1)
        if idx < NH:
            # 1/sqrt(head_dim) folded into q once; layout [NKV, G, S, HD] so the flash
            # kernel can fold the G query heads of one KV group into its matmul rows.
            q_ref[idx // G, idx % G] = (xh * scale).astype(q_ref.dtype)
        else:
            n = idx - NH
            kc_ref[:, n * HD:(n + 1) * HD] = xh.astype(kc_ref.dtype)


# --------------------------------------------------------------------------------------- #
# Kernel 2: flash attention (online softmax over KV tiles, GQA folded) + o_proj + residual.
#           grid = (q row tiles "parallel", kv column tiles "arbitrary")
# --------------------------------------------------------------------------------------- #
def flash_attn_oproj_kernel(q_ref, k_ref, v_ref, hs_ref, w_o_ref, out_ref,
                            m_ref, l_ref, acc_ref):
    NKV, G, TQ, HD = q_ref.shape
    TK = k_ref.shape[0]
    qi = pl.program_id(0)
    ki = pl.program_id(1)
    nk = pl.num_programs(1)
    q_start = qi * TQ
    k_start = ki * TK

    @pl.when(ki == 0)
    def _init():
        m_ref[...] = jnp.full_like(m_ref, _NEG_INF)
        l_ref[...] = jnp.zeros_like(l_ref)
        acc_ref[...] = jnp.zeros_like(acc_ref)

    # Skip KV tiles that are entirely in the causal future of this query tile.
    @pl.when(k_start <= q_start + TQ - 1)
    def _compute():
        # Additive causal bias for the folded [G*TQ, TK] rows (row r <-> query position
        # q_start + r % TQ), built from one iota — no G-times replicated bias.
        rows = jax.lax.broadcasted_iota(jnp.int32, (G, TQ, TK), 1).reshape(G * TQ, TK)
        cols = jax.lax.broadcasted_iota(jnp.int32, (G, TQ, TK), 2).reshape(G * TQ, TK)
        bias = jnp.where(k_start + cols <= q_start + rows,
                         jnp.float32(0.0), jnp.float32(_NEG_INF))

        for n in range(NKV):                       # one score / p@v matmul pair per KV head
            q2 = q_ref[n].reshape(G * TQ, HD)      # free leading-dim merge (layout-preserving)
            k_n = k_ref[:, n * HD:(n + 1) * HD]    # [TK, HD]
            v_n = v_ref[:, n * HD:(n + 1) * HD]
            # q2 @ k_n^T without materializing a transpose
            s = jax.lax.dot_general(q2, k_n, (((1,), (1,)), ((), ())),
                                    preferred_element_type=jnp.float32) + bias
            m_prev = m_ref[n]
            m_new = jnp.maximum(m_prev, jnp.max(s, axis=-1, keepdims=True))
            alpha = jnp.exp(m_prev - m_new)
            p = jnp.exp(s - m_new)
            l_ref[n] = alpha * l_ref[n] + jnp.sum(p, axis=-1, keepdims=True)
            acc_ref[n] = alpha * acc_ref[n] + jnp.dot(
                p.astype(v_ref.dtype), v_n, preferred_element_type=jnp.float32)
            m_ref[n] = m_new

    @pl.when(ki == nk - 1)
    def _finalize():
        TQ_, H = out_ref.shape
        o = jnp.zeros((TQ_, H), dtype=jnp.float32)
        for n in range(NKV):
            inv_l = pl.reciprocal(l_ref[n], approx=True)          # EUP slot (≈ free)
            ctx = (acc_ref[n] * inv_l).astype(jnp.bfloat16)       # [G*TQ, HD]
            for g in range(G):
                h = n * G + g
                o = o + jnp.dot(ctx[g * TQ:(g + 1) * TQ, :],
                                w_o_ref[h * HD:(h + 1) * HD, :],
                                preferred_element_type=jnp.float32)
        out_ref[...] = (hs_ref[...].astype(jnp.float32) + o).astype(out_ref.dtype)


# --------------------------------------------------------------------------------------- #
# Kernel 3: post-attn RMSNorm (weight folded into w_gate/w_up) + SwiGLU MLP with the
#           intermediate dim streamed in tiles into an f32 accumulator + residual.
#           grid = (seq row tiles "parallel", intermediate tiles "arbitrary")
# --------------------------------------------------------------------------------------- #
def mlp_kernel(h1_ref, w_gate_ref, w_up_ref, w_down_ref, out_ref, acc_ref, y_ref, *, eps):
    j = pl.program_id(1)
    nj = pl.num_programs(1)

    @pl.when(j == 0)
    def _init():
        h1 = h1_ref[...].astype(jnp.float32)
        # post_attention_layernorm: weight folded into the rows of w_gate / w_up.
        y_ref[...] = (h1 * jax.lax.rsqrt(jnp.mean(h1 * h1, axis=-1, keepdims=True) + eps)
                      ).astype(y_ref.dtype)
        acc_ref[...] = jnp.zeros_like(acc_ref)

    y = y_ref[...]                                               # bf16, computed once per row tile
    gate = jnp.dot(y, w_gate_ref[...], preferred_element_type=jnp.float32)
    up = jnp.dot(y, w_up_ref[...], preferred_element_type=jnp.float32)
    act = gate * jax.nn.sigmoid(gate)                            # SiLU in f32
    acc_ref[...] += jnp.dot((act * up).astype(jnp.bfloat16), w_down_ref[...],
                            preferred_element_type=jnp.float32)

    @pl.when(j == nj - 1)
    def _finalize():
        out_ref[...] = (h1_ref[...].astype(jnp.float32) + acc_ref[...]).astype(out_ref.dtype)


# --------------------------------------------------------------------------------------- #
# Wrappers
# --------------------------------------------------------------------------------------- #
def _nb(x):
    return int(x.size) * jnp.dtype(x.dtype).itemsize


def _vmem_limit_bytes():
    # Generation-aware budget: ~48 MiB on v7x (64 MiB physical), ~96 MiB on v5e/v6e
    # (128 MiB physical). Falls back to a safe 64 MiB if the query is unavailable.
    try:
        cap = pltpu.get_tpu_info().vmem_capacity_bytes
        return int(min(cap * 3 // 4, 96 * 1024 * 1024))
    except Exception:
        return 64 * 1024 * 1024


def prepare_qwen3_layer_params(params, *, num_heads, num_kv_heads, head_dim):
    """One-time weight prep (outside the per-token path): fuse projections, fold the
    input/post-attention RMSNorm weights into the projection rows, cast to bf16."""
    NH, NKV, HD = num_heads, num_kv_heads, head_dim
    in_ln = params["in_ln_w"].astype(jnp.float32)
    post_ln = params["post_ln_w"].astype(jnp.float32)

    w_qkv = jnp.concatenate([params["w_q"], params["w_k"], params["w_v"]], axis=1)
    w_qkv = (in_ln[:, None] * w_qkv).astype(jnp.bfloat16)        # [H, (NH+2*NKV)*HD]
    w_o = params["w_o"].astype(jnp.bfloat16)                     # [NH*HD, H]
    w_gate = (post_ln[:, None] * params["w_gate"]).astype(jnp.bfloat16)
    w_up = (post_ln[:, None] * params["w_up"]).astype(jnp.bfloat16)
    w_down = params["w_down"].astype(jnp.bfloat16)
    qk_ln = jnp.concatenate(
        [jnp.broadcast_to(params["q_ln_w"].reshape(1, HD), (NH, HD)),
         jnp.broadcast_to(params["k_ln_w"].reshape(1, HD), (NKV, HD))],
        axis=0).astype(jnp.float32)                              # [NH+NKV, HD]
    return {"w_qkv": w_qkv, "w_o": w_o, "w_gate": w_gate, "w_up": w_up,
            "w_down": w_down, "qk_ln": qk_ln}


def qwen3_decoder_layer(hidden_states, cos, sin, prep, *, num_heads, num_kv_heads,
                        head_dim, eps=1e-6, row_tile=128, q_tile=128, kv_tile=128,
                        inter_tile=256):
    B, S, H = hidden_states.shape
    assert B == 1, "kernel implements the bsz==1 path (as the PyTorch module assumes)"
    NH, NKV, HD = num_heads, num_kv_heads, head_dim
    assert NH % NKV == 0
    G = NH // NKV
    inter = prep["w_gate"].shape[1]
    assert S % row_tile == 0 and S % q_tile == 0 and S % kv_tile == 0
    assert inter % inter_tile == 0

    hs2d = hidden_states[0].astype(jnp.bfloat16)                 # [S, H]
    cos_h = cos[:, : HD // 2].astype(jnp.float32)                # halves are identical
    sin_h = sin[:, : HD // 2].astype(jnp.float32)
    vmem = _vmem_limit_bytes()

    # ------------------------- stage 1: QKV + RoPE + KV cache ------------------------- #
    q_r, kc, vc = pl.pallas_call(
        functools.partial(qkv_rope_kernel, eps=eps),
        grid=(S // row_tile,),
        in_specs=[
            pl.BlockSpec((row_tile, H), lambda i: (i, 0)),
            pl.BlockSpec((row_tile, HD // 2), lambda i: (i, 0)),
            pl.BlockSpec((row_tile, HD // 2), lambda i: (i, 0)),
            pl.BlockSpec((NH + NKV, HD), lambda i: (0, 0)),
            # TODO(synk): at production H tile this weight over head groups instead of
            # keeping it whole per grid step.
            pl.BlockSpec((H, (NH + 2 * NKV) * HD), lambda i: (0, 0)),
        ],
        out_specs=(
            pl.BlockSpec((NKV, G, row_tile, HD), lambda i: (0, 0, i, 0)),
            pl.BlockSpec((row_tile, NKV * HD), lambda i: (i, 0)),
            pl.BlockSpec((row_tile, NKV * HD), lambda i: (i, 0)),
        ),
        out_shape=(
            jax.ShapeDtypeStruct((NKV, G, S, HD), jnp.bfloat16),
            jax.ShapeDtypeStruct((S, NKV * HD), jnp.bfloat16),   # TODO(synk): alias into the
            jax.ShapeDtypeStruct((S, NKV * HD), jnp.bfloat16),   # caller's KV cache (i/o alias)
        ),
        compiler_params=pltpu.CompilerParams(
            dimension_semantics=("parallel",), vmem_limit_bytes=vmem),
        cost_estimate=pl.CostEstimate(
            flops=int(2 * S * H * (NH + 2 * NKV) * HD),
            transcendentals=int(S * (NH + NKV + 1)),
            bytes_accessed=int(_nb(hs2d) + _nb(cos_h) + _nb(sin_h) + _nb(prep["qk_ln"])
                               + _nb(prep["w_qkv"]) + 2 * (S * NH * HD + 2 * S * NKV * HD))),
    )(hs2d, cos_h, sin_h, prep["qk_ln"], prep["w_qkv"])

    # --------------------- stage 2: flash attention + o_proj + residual ---------------- #
    h1 = pl.pallas_call(
        flash_attn_oproj_kernel,
        grid=(S // q_tile, S // kv_tile),
        in_specs=[
            pl.BlockSpec((NKV, G, q_tile, HD), lambda qi, ki: (0, 0, qi, 0)),
            pl.BlockSpec((kv_tile, NKV * HD), lambda qi, ki: (ki, 0)),
            pl.BlockSpec((kv_tile, NKV * HD), lambda qi, ki: (ki, 0)),
            pl.BlockSpec((q_tile, H), lambda qi, ki: (qi, 0)),
            # TODO(synk): tile w_o over H at production sizes.
            pl.BlockSpec((NH * HD, H), lambda qi, ki: (0, 0)),
        ],
        out_specs=pl.BlockSpec((q_tile, H), lambda qi, ki: (qi, 0)),
        out_shape=jax.ShapeDtypeStruct((S, H), jnp.bfloat16),
        scratch_shapes=[
            pltpu.VMEM((NKV, G * q_tile, 1), jnp.float32),       # running max
            pltpu.VMEM((NKV, G * q_tile, 1), jnp.float32),       # running denom
            pltpu.VMEM((NKV, G * q_tile, HD), jnp.float32),      # context accumulator
        ],
        compiler_params=pltpu.CompilerParams(
            dimension_semantics=("parallel", "arbitrary"), vmem_limit_bytes=vmem),
        cost_estimate=pl.CostEstimate(
            flops=int(4 * S * S * NH * HD + 2 * S * NH * HD * H),
            transcendentals=int(NH * S * S),
            bytes_accessed=int(_nb(q_r) + _nb(kc) + _nb(vc) + _nb(hs2d)
                               + _nb(prep["w_o"]) + 2 * S * H)),
    )(q_r, kc, vc, hs2d, prep["w_o"])

    # ----------------------- stage 3: MLP (intermediate-dim streamed) ------------------ #
    out = pl.pallas_call(
        functools.partial(mlp_kernel, eps=eps),
        grid=(S // row_tile, inter // inter_tile),
        in_specs=[
            pl.BlockSpec((row_tile, H), lambda i, j: (i, 0)),
            pl.BlockSpec((H, inter_tile), lambda i, j: (0, j)),
            pl.BlockSpec((H, inter_tile), lambda i, j: (0, j)),
            pl.BlockSpec((inter_tile, H), lambda i, j: (j, 0)),
        ],
        out_specs=pl.BlockSpec((row_tile, H), lambda i, j: (i, 0)),
        out_shape=jax.ShapeDtypeStruct((S, H), jnp.bfloat16),
        scratch_shapes=[pltpu.VMEM((row_tile, H), jnp.float32),
                        pltpu.VMEM((row_tile, H), jnp.bfloat16)],
        compiler_params=pltpu.CompilerParams(
            dimension_semantics=("parallel", "arbitrary"), vmem_limit_bytes=vmem),
        cost_estimate=pl.CostEstimate(
            flops=int(6 * S * H * inter),
            transcendentals=int(S * inter),
            bytes_accessed=int(_nb(h1) + _nb(prep["w_gate"]) + _nb(prep["w_up"])
                               + _nb(prep["w_down"]) + 2 * S * H)),
    )(h1, prep["w_gate"], prep["w_up"], prep["w_down"])

    return out[None], kc.reshape(S, NKV, HD), vc.reshape(S, NKV, HD)


# --------------------------- pure-JAX reference (same mixed precision) ------------------ #
def _rmsnorm_ref(x, w, eps):
    var = jnp.mean(x * x, axis=-1, keepdims=True)
    return (x * jax.lax.rsqrt(var + eps)) * w


def _rotate_half(x):
    d = x.shape[-1]
    return jnp.concatenate([-x[..., d // 2:], x[..., : d // 2]], axis=-1)


def _mm_bf16(a, b):
    return jnp.dot(a.astype(jnp.bfloat16), b.astype(jnp.bfloat16),
                   preferred_element_type=jnp.float32)


def reference_decoder_layer(hidden_states, cos, sin, params, *, num_heads,
                            num_kv_heads, head_dim, eps=1e-6):
    hs = hidden_states[0].astype(jnp.float32)
    S, H = hs.shape
    NH, NKV, HD = num_heads, num_kv_heads, head_dim
    G = NH // NKV
    scale = 1.0 / float(HD) ** 0.5

    x = _rmsnorm_ref(hs, params["in_ln_w"].astype(jnp.float32), eps)
    q = _mm_bf16(x, params["w_q"]).reshape(S, NH, HD)
    k = _mm_bf16(x, params["w_k"]).reshape(S, NKV, HD)
    v = _mm_bf16(x, params["w_v"]).reshape(S, NKV, HD)
    q = _rmsnorm_ref(q, params["q_ln_w"].astype(jnp.float32), eps)
    k = _rmsnorm_ref(k, params["k_ln_w"].astype(jnp.float32), eps)

    c = cos[:, None, :].astype(jnp.float32)
    s = sin[:, None, :].astype(jnp.float32)
    q = q * c + _rotate_half(q) * s
    k = k * c + _rotate_half(k) * s

    q = (q * scale).astype(jnp.bfloat16)
    k = k.astype(jnp.bfloat16)
    v = v.astype(jnp.bfloat16)

    k_full = jnp.repeat(k, G, axis=1)                            # GQA expansion
    v_full = jnp.repeat(v, G, axis=1)
    scores = jnp.einsum("qhd,khd->hqk", q, k_full, preferred_element_type=jnp.float32)
    mask = jnp.tril(jnp.ones((S, S), dtype=bool))
    scores = jnp.where(mask[None], scores, _NEG_INF)
    p = jax.nn.softmax(scores, axis=-1)
    attn = jnp.einsum("hqk,khd->qhd", p.astype(jnp.bfloat16), v_full,
                      preferred_element_type=jnp.float32)
    attn = attn.reshape(S, NH * HD).astype(jnp.bfloat16)
    o = jnp.dot(attn, params["w_o"].astype(jnp.bfloat16), preferred_element_type=jnp.float32)
    h1 = (hs + o).astype(jnp.bfloat16).astype(jnp.float32)       # bf16 residual handoff

    y = _rmsnorm_ref(h1, params["post_ln_w"].astype(jnp.float32), eps)
    gate = _mm_bf16(y, params["w_gate"])
    up = _mm_bf16(y, params["w_up"])
    down = jnp.dot((gate * jax.nn.sigmoid(gate) * up).astype(jnp.bfloat16),
                   params["w_down"].astype(jnp.bfloat16), preferred_element_type=jnp.float32)
    out = (h1 + down).astype(jnp.bfloat16)
    return out[None], k, v


# ------------------------------------------- main --------------------------------------- #
if __name__ == "__main__":
    # small Qwen3-like config (head_dim=128 matches real Qwen3 and keeps stores lane-dense)
    S = 256                # q_len (prefill)
    H = 256                # hidden_size
    NH = 4                 # num_attention_heads
    NKV = 2                # num_key_value_heads
    HD = 128               # head_dim
    INTER = 512            # intermediate_size
    ROPE_THETA = 10000.0
    EPS = 1e-6

    key = jax.random.PRNGKey(0)
    ks = jax.random.split(key, 12)
    init = lambda k, shape: 0.05 * jax.random.normal(k, shape, dtype=jnp.float32)

    params = {
        "w_q": init(ks[0], (H, NH * HD)),
        "w_k": init(ks[1], (H, NKV * HD)),
        "w_v": init(ks[2], (H, NKV * HD)),
        "w_o": init(ks[3], (NH * HD, H)),
        "w_gate": init(ks[4], (H, INTER)),
        "w_up": init(ks[5], (H, INTER)),
        "w_down": init(ks[6], (INTER, H)),
        # RMSNorm weights (torch init is ones; perturbed so they are exercised)
        "in_ln_w": 1.0 + 0.1 * jax.random.normal(ks[8], (H,), dtype=jnp.float32),
        "post_ln_w": 1.0 + 0.1 * jax.random.normal(ks[9], (H,), dtype=jnp.float32),
        "q_ln_w": 1.0 + 0.1 * jax.random.normal(ks[10], (HD,), dtype=jnp.float32),
        "k_ln_w": 1.0 + 0.1 * jax.random.normal(ks[11], (HD,), dtype=jnp.float32),
    }
    hidden_states = jax.random.normal(ks[7], (1, S, H), dtype=jnp.float32).astype(jnp.bfloat16)

    # rotary embeddings (default rope, attention_scaling = 1.0)
    positions = jnp.arange(S, dtype=jnp.float32)
    inv_freq = 1.0 / (ROPE_THETA ** (jnp.arange(0, HD, 2, dtype=jnp.float32) / HD))
    freqs = positions[:, None] * inv_freq[None, :]               # [S, HD//2]
    emb = jnp.concatenate([freqs, freqs], axis=-1)               # [S, HD]
    cos, sin = jnp.cos(emb), jnp.sin(emb)

    prep = prepare_qwen3_layer_params(params, num_heads=NH, num_kv_heads=NKV, head_dim=HD)
    out, k_cache, v_cache = qwen3_decoder_layer(
        hidden_states, cos, sin, prep,
        num_heads=NH, num_kv_heads=NKV, head_dim=HD, eps=EPS,
        row_tile=128, q_tile=128, kv_tile=128, inter_tile=256)
    jax.block_until_ready((out, k_cache, v_cache))

    ref_out, ref_k, ref_v = reference_decoder_layer(
        hidden_states, cos, sin, params,
        num_heads=NH, num_kv_heads=NKV, head_dim=HD, eps=EPS)

    to_np = lambda x: np.asarray(x.astype(jnp.float32))
    np.testing.assert_allclose(to_np(out), to_np(ref_out), rtol=2e-2, atol=3e-2)
    np.testing.assert_allclose(to_np(k_cache), to_np(ref_k), rtol=2e-2, atol=3e-2)
    np.testing.assert_allclose(to_np(v_cache), to_np(ref_v), rtol=2e-2, atol=3e-2)

    print("KERNEL_OK")
</pallas_src>

<mosaic_0001>
module attributes {stable_mosaic.version = 11 : i64} {
  func.func @qkv_rope_kernel(%arg0: i32, %arg1: memref<128x256xbf16, #tpu.memory_space<vmem>>, %arg2: memref<128x64xf32, #tpu.memory_space<vmem>>, %arg3: memref<128x64xf32, #tpu.memory_space<vmem>>, %arg4: memref<6x128xf32, #tpu.memory_space<vmem>>, %arg5: memref<256x1024xbf16, #tpu.memory_space<vmem>>, %arg6: memref<2x2x128x128xbf16, #tpu.memory_space<vmem>>, %arg7: memref<128x256xbf16, #tpu.memory_space<vmem>>, %arg8: memref<128x256xbf16, #tpu.memory_space<vmem>>) attributes {dimension_semantics = [#tpu.dimension_semantics<parallel>], iteration_bounds = array<i64: 2>, scalar_prefetch = 0 : i64, scratch_operands = 0 : i64, tpu.core_type = #tpu.core_type<tc>, window_params = [{transform_indices = @transform_0, window_bounds = array<i64: 128, 256>}, {transform_indices = @transform_1, window_bounds = array<i64: 128, 64>}, {transform_indices = @transform_2, window_bounds = array<i64: 128, 64>}, {pipeline_mode = #tpu.pipeline_mode<synchronous>, transform_indices = @transform_3, window_bounds = array<i64: 6, 128>}, {pipeline_mode = #tpu.pipeline_mode<synchronous>, transform_indices = @transform_4, window_bounds = array<i64: 256, 1024>}, {transform_indices = @transform_5, window_bounds = array<i64: 2, 2, 128, 128>}, {transform_indices = @transform_6, window_bounds = array<i64: 128, 256>}, {transform_indices = @transform_7, window_bounds = array<i64: 128, 256>}]} {
    %c0 = arith.constant 0 : index
    %c0_0 = arith.constant 0 : index
    %0 = vector.load %arg1[%c0, %c0_0] : memref<128x256xbf16, #tpu.memory_space<vmem>>, vector<128x256xbf16>
    %1 = arith.extf %0 : vector<128x256xbf16> to vector<128x256xf32>
    %2 = arith.mulf %1, %1 : vector<128x256xf32>
    %cst = arith.constant dense<0.000000e+00> : vector<128xf32>
    %3 = vector.multi_reduction <add>, %2, %cst [1] : vector<128x256xf32> to vector<128xf32>
    %4 = vector.shape_cast %3 : vector<128xf32> to vector<128x1xf32>
    %cst_1 = arith.constant 2.560000e+02 : f32
    %5 = vector.broadcast %cst_1 : f32 to vector<128x1xf32>
    %6 = arith.divf %4, %5 : vector<128x1xf32>
    %cst_2 = arith.constant 9.99999997E-7 : f32
    %7 = vector.broadcast %cst_2 : f32 to vector<128x1xf32>
    %8 = arith.addf %6, %7 : vector<128x1xf32>
    %9 = math.rsqrt %8 : vector<128x1xf32>
    %10 = vector.broadcast %9 : vector<128x1xf32> to vector<128x256xf32>
    %11 = arith.mulf %1, %10 : vector<128x256xf32>
    %12 = arith.truncf %11 : vector<128x256xf32> to vector<128x256xbf16>
    %c0_3 = arith.constant 0 : index
    %c0_4 = arith.constant 0 : index
    %13 = vector.load %arg5[%c0_3, %c0_4] : memref<256x1024xbf16, #tpu.memory_space<vmem>>, vector<256x1024xbf16>
    %cst_5 = arith.constant dense<0.000000e+00> : vector<128x1024xf32>
    %14 = tpu.matmul %12, %13, %cst_5 {dimension_numbers = #tpu.dot_dimension_numbers<[1], [0], [0], [1], [0, 0, 1, 1], [], []>} : vector<128x256xbf16>, vector<256x1024xbf16>, vector<128x1024xf32> -> vector<128x1024xf32>
    %15 = vector.extract_strided_slice %14 {offsets = [0, 768], sizes = [128, 256], strides = [1, 1]} : vector<128x1024xf32> to vector<128x256xf32>
    %16 = arith.truncf %15 : vector<128x256xf32> to vector<128x256xbf16>
    %c0_6 = arith.constant 0 : index
    %c0_7 = arith.constant 0 : index
    %17 = vector.load %arg8[%c0_6, %c0_7] : memref<128x256xbf16, #tpu.memory_space<vmem>>, vector<128x256xbf16>
    tpu.vector_store %arg8[%c0_6, %c0_7], %16 {strides = array<i32>} : memref<128x256xbf16, #tpu.memory_space<vmem>>, vector<128x256xbf16>,
    %c0_8 = arith.constant 0 : index
    %c0_9 = arith.constant 0 : index
    %18 = vector.load %arg2[%c0_8, %c0_9] : memref<128x64xf32, #tpu.memory_space<vmem>>, vector<128x64xf32>
    %c0_10 = arith.constant 0 : index
    %c0_11 = arith.constant 0 : index
    %19 = vector.load %arg3[%c0_10, %c0_11] : memref<128x64xf32, #tpu.memory_space<vmem>>, vector<128x64xf32>
    %20 = vector.extract_strided_slice %14 {offsets = [0, 0], sizes = [128, 128], strides = [1, 1]} : vector<128x1024xf32> to vector<128x128xf32>
    %c0_12 = arith.constant 0 : index
    %c0_13 = arith.constant 0 : index
    %21 = vector.load %arg4[%c0_12, %c0_13] : memref<6x128xf32, #tpu.memory_space<vmem>>, vector<1x128xf32>
    %22 = arith.mulf %20, %20 : vector<128x128xf32>
    %cst_14 = arith.constant dense<0.000000e+00> : vector<128xf32>
    %23 = vector.multi_reduction <add>, %22, %cst_14 [1] : vector<128x128xf32> to vector<128xf32>
    %24 = vector.shape_cast %23 : vector<128xf32> to vector<128x1xf32>
    %cst_15 = arith.constant 1.280000e+02 : f32
    %25 = vector.broadcast %cst_15 : f32 to vector<128x1xf32>
    %26 = arith.divf %24, %25 : vector<128x1xf32>
    %cst_16 = arith.constant 9.99999997E-7 : f32
    %27 = vector.broadcast %cst_16 : f32 to vector<128x1xf32>
    %28 = arith.addf %26, %27 : vector<128x1xf32>
    %29 = math.rsqrt %28 : vector<128x1xf32>
    %30 = vector.broadcast %29 : vector<128x1xf32> to vector<128x128xf32>
    %31 = arith.mulf %20, %30 : vector<128x128xf32>
    %32 = vector.broadcast %21 : vector<1x128xf32> to vector<128x128xf32>
    %33 = arith.mulf %31, %32 : vector<128x128xf32>
    %34 = vector.extract_strided_slice %33 {offsets = [0, 0], sizes = [128, 64], strides = [1, 1]} : vector<128x128xf32> to vector<128x64xf32>
    %35 = vector.extract_strided_slice %33 {offsets = [0, 64], sizes = [128, 64], strides = [1, 1]} : vector<128x128xf32> to vector<128x64xf32>
    %36 = arith.mulf %34, %18 : vector<128x64xf32>
    %37 = arith.mulf %35, %19 : vector<128x64xf32>
    %38 = arith.subf %36, %37 : vector<128x64xf32>
    %39 = arith.mulf %35, %18 : vector<128x64xf32>
    %40 = arith.mulf %34, %19 : vector<128x64xf32>
    %41 = arith.addf %39, %40 : vector<128x64xf32>
    %42 = tpu.concatenate %38, %41 in 1 : vector<128x64xf32>, vector<128x64xf32> -> vector<128x128xf32>
    %cst_17 = arith.constant 0.0883883461 : f32
    %43 = vector.broadcast %cst_17 : f32 to vector<128x128xf32>
    %44 = arith.mulf %42, %43 : vector<128x128xf32>
    %45 = arith.truncf %44 : vector<128x128xf32> to vector<128x128xbf16>
    %c0_18 = arith.constant 0 : index
    %c0_19 = arith.constant 0 : index
    %c0_20 = arith.constant 0 : index
    %c0_21 = arith.constant 0 : index
    %46 = vector.load %arg6[%c0_18, %c0_19, %c0_20, %c0_21] : memref<2x2x128x128xbf16, #tpu.memory_space<vmem>>, vector<1x1x128x128xbf16>
    %47 = vector.shape_cast %46 : vector<1x1x128x128xbf16> to vector<128x128xbf16>
    %48 = vector.shape_cast %45 : vector<128x128xbf16> to vector<1x1x128x128xbf16>
    tpu.vector_store %arg6[%c0_18, %c0_19, %c0_20, %c0_21], %48 {strides = array<i32>} : memref<2x2x128x128xbf16, #tpu.memory_space<vmem>>, vector<1x1x128x128xbf16>,
    %49 = vector.extract_strided_slice %14 {offsets = [0, 128], sizes = [128, 128], strides = [1, 1]} : vector<128x1024xf32> to vector<128x128xf32>
    %c1 = arith.constant 1 : index
    %c0_22 = arith.constant 0 : index
    %50 = vector.load %arg4[%c1, %c0_22] : memref<6x128xf32, #tpu.memory_space<vmem>>, vector<1x128xf32>
    %51 = arith.mulf %49, %49 : vector<128x128xf32>
    %cst_23 = arith.constant dense<0.000000e+00> : vector<128xf32>
    %52 = vector.multi_reduction <add>, %51, %cst_23 [1] : vector<128x128xf32> to vector<128xf32>
    %53 = vector.shape_cast %52 : vector<128xf32> to vector<128x1xf32>
    %cst_24 = arith.constant 1.280000e+02 : f32
    %54 = vector.broadcast %cst_24 : f32 to vector<128x1xf32>
    %55 = arith.divf %53, %54 : vector<128x1xf32>
    %cst_25 = arith.constant 9.99999997E-7 : f32
    %56 = vector.broadcast %cst_25 : f32 to vector<128x1xf32>
    %57 = arith.addf %55, %56 : vector<128x1xf32>
    %58 = math.rsqrt %57 : vector<128x1xf32>
    %59 = vector.broadcast %58 : vector<128x1xf32> to vector<128x128xf32>
    %60 = arith.mulf %49, %59 : vector<128x128xf32>
    %61 = vector.broadcast %50 : vector<1x128xf32> to vector<128x128xf32>
    %62 = arith.mulf %60, %61 : vector<128x128xf32>
    %63 = vector.extract_strided_slice %62 {offsets = [0, 0], sizes = [128, 64], strides = [1, 1]} : vector<128x128xf32> to vector<128x64xf32>
    %64 = vector.extract_strided_slice %62 {offsets = [0, 64], sizes = [128, 64], strides = [1, 1]} : vector<128x128xf32> to vector<128x64xf32>
    %65 = arith.mulf %63, %18 : vector<128x64xf32>
    %66 = arith.mulf %64, %19 : vector<128x64xf32>
    %67 = arith.subf %65, %66 : vector<128x64xf32>
    %68 = arith.mulf %64, %18 : vector<128x64xf32>
    %69 = arith.mulf %63, %19 : vector<128x64xf32>
    %70 = arith.addf %68, %69 : vector<128x64xf32>
    %71 = tpu.concatenate %67, %70 in 1 : vector<128x64xf32>, vector<128x64xf32> -> vector<128x128xf32>
    %cst_26 = arith.constant 0.0883883461 : f32
    %72 = vector.broadcast %cst_26 : f32 to vector<128x128xf32>
    %73 = arith.mulf %71, %72 : vector<128x128xf32>
    %74 = arith.truncf %73 : vector<128x128xf32> to vector<128x128xbf16>
    %c0_27 = arith.constant 0 : index
    %c1_28 = arith.constant 1 : index
    %c0_29 = arith.constant 0 : index
    %c0_30 = arith.constant 0 : index
    %75 = vector.load %arg6[%c0_27, %c1_28, %c0_29, %c0_30] : memref<2x2x128x128xbf16, #tpu.memory_space<vmem>>, vector<1x1x128x128xbf16>
    %76 = vector.shape_cast %75 : vector<1x1x128x128xbf16> to vector<128x128xbf16>
    %77 = vector.shape_cast %74 : vector<128x128xbf16> to vector<1x1x128x128xbf16>
    tpu.vector_store %arg6[%c0_27, %c1_28, %c0_29, %c0_30], %77 {strides = array<i32>} : memref<2x2x128x128xbf16, #tpu.memory_space<vmem>>, vector<1x1x128x128xbf16>,
    %78 = vector.extract_strided_slice %14 {offsets = [0, 256], sizes = [128, 128], strides = [1, 1]} : vector<128x1024xf32> to vector<128x128xf32>
    %c2 = arith.constant 2 : index
    %c0_31 = arith.constant 0 : index
    %79 = vector.load %arg4[%c2, %c0_31] : memref<6x128xf32, #tpu.memory_space<vmem>>, vector<1x128xf32>
    %80 = arith.mulf %78, %78 : vector<128x128xf32>
    %cst_32 = arith.constant dense<0.000000e+00> : vector<128xf32>
    %81 = vector.multi_reduction <add>, %80, %cst_32 [1] : vector<128x128xf32> to vector<128xf32>
    %82 = vector.shape_cast %81 : vector<128xf32> to vector<128x1xf32>
    %cst_33 = arith.constant 1.280000e+02 : f32
    %83 = vector.broadcast %cst_33 : f32 to vector<128x1xf32>
    %84 = arith.divf %82, %83 : vector<128x1xf32>
    %cst_34 = arith.constant 9.99999997E-7 : f32
    %85 = vector.broadcast %cst_34 : f32 to vector<128x1xf32>
    %86 = arith.addf %84, %85 : vector<128x1xf32>
    %87 = math.rsqrt %86 : vector<128x1xf32>
    %88 = vector.broadcast %87 : vector<128x1xf32> to vector<128x128xf32>
    %89 = arith.mulf %78, %88 : vector<128x128xf32>
    %90 = vector.broadcast %79 : vector<1x128xf32> to vector<128x128xf32>
    %91 = arith.mulf %89, %90 : vector<128x128xf32>
    %92 = vector.extract_strided_slice %91 {offsets = [0, 0], sizes = [128, 64], strides = [1, 1]} : vector<128x128xf32> to vector<128x64xf32>
    %93 = vector.extract_strided_slice %91 {offsets = [0, 64], sizes = [128, 64], strides = [1, 1]} : vector<128x128xf32> to vector<128x64xf32>
    %94 = arith.mulf %92, %18 : vector<128x64xf32>
    %95 = arith.mulf %93, %19 : vector<128x64xf32>
    %96 = arith.subf %94, %95 : vector<128x64xf32>
    %97 = arith.mulf %93, %18 : vector<128x64xf32>
    %98 = arith.mulf %92, %19 : vector<128x64xf32>
    %99 = arith.addf %97, %98 : vector<128x64xf32>
    %100 = tpu.concatenate %96, %99 in 1 : vector<128x64xf32>, vector<128x64xf32> -> vector<128x128xf32>
    %cst_35 = arith.constant 0.0883883461 : f32
    %101 = vector.broadcast %cst_35 : f32 to vector<128x128xf32>
    %102 = arith.mulf %100, %101 : vector<128x128xf32>
    %103 = arith.truncf %102 : vector<128x128xf32> to vector<128x128xbf16>
    %c1_36 = arith.constant 1 : index
    %c0_37 = arith.constant 0 : index
    %c0_38 = arith.constant 0 : index
    %c0_39 = arith.constant 0 : index
    %104 = vector.load %arg6[%c1_36, %c0_37, %c0_38, %c0_39] : memref<2x2x128x128xbf16, #tpu.memory_space<vmem>>, vector<1x1x128x128xbf16>
    %105 = vector.shape_cast %104 : vector<1x1x128x128xbf16> to vector<128x128xbf16>
    %106 = vector.shape_cast %103 : vector<128x128xbf16> to vector<1x1x128x128xbf16>
    tpu.vector_store %arg6[%c1_36, %c0_37, %c0_38, %c0_39], %106 {strides = array<i32>} : memref<2x2x128x128xbf16, #tpu.memory_space<vmem>>, vector<1x1x128x128xbf16>,
    %107 = vector.extract_strided_slice %14 {offsets = [0, 384], sizes = [128, 128], strides = [1, 1]} : vector<128x1024xf32> to vector<128x128xf32>
    %c3 = arith.constant 3 : index
    %c0_40 = arith.constant 0 : index
    %108 = vector.load %arg4[%c3, %c0_40] : memref<6x128xf32, #tpu.memory_space<vmem>>, vector<1x128xf32>
    %109 = arith.mulf %107, %107 : vector<128x128xf32>
    %cst_41 = arith.constant dense<0.000000e+00> : vector<128xf32>
    %110 = vector.multi_reduction <add>, %109, %cst_41 [1] : vector<128x128xf32> to vector<128xf32>
    %111 = vector.shape_cast %110 : vector<128xf32> to vector<128x1xf32>
    %cst_42 = arith.constant 1.280000e+02 : f32
    %112 = vector.broadcast %cst_42 : f32 to vector<128x1xf32>
    %113 = arith.divf %111, %112 : vector<128x1xf32>
    %cst_43 = arith.constant 9.99999997E-7 : f32
    %114 = vector.broadcast %cst_43 : f32 to vector<128x1xf32>
    %115 = arith.addf %113, %114 : vector<128x1xf32>
    %116 = math.rsqrt %115 : vector<128x1xf32>
    %117 = vector.broadcast %116 : vector<128x1xf32> to vector<128x128xf32>
    %118 = arith.mulf %107, %117 : vector<128x128xf32>
    %119 = vector.broadcast %108 : vector<1x128xf32> to vector<128x128xf32>
    %120 = arith.mulf %118, %119 : vector<128x128xf32>
    %121 = vector.extract_strided_slice %120 {offsets = [0, 0], sizes = [128, 64], strides = [1, 1]} : vector<128x128xf32> to vector<128x64xf32>
    %122 = vector.extract_strided_slice %120 {offsets = [0, 64], sizes = [128, 64], strides = [1, 1]} : vector<128x128xf32> to vector<128x64xf32>
    %123 = arith.mulf %121, %18 : vector<128x64xf32>
    %124 = arith.mulf %122, %19 : vector<128x64xf32>
    %125 = arith.subf %123, %124 : vector<128x64xf32>
    %126 = arith.mulf %122, %18 : vector<128x64xf32>
    %127 = arith.mulf %121, %19 : vector<128x64xf32>
    %128 = arith.addf %126, %127 : vector<128x64xf32>
    %129 = tpu.concatenate %125, %128 in 1 : vector<128x64xf32>, vector<128x64xf32> -> vector<128x128xf32>
    %cst_44 = arith.constant 0.0883883461 : f32
    %130 = vector.broadcast %cst_44 : f32 to vector<128x128xf32>
    %131 = arith.mulf %129, %130 : vector<128x128xf32>
    %132 = arith.truncf %131 : vector<128x128xf32> to vector<128x128xbf16>
    %c1_45 = arith.constant 1 : index
    %c1_46 = arith.constant 1 : index
    %c0_47 = arith.constant 0 : index
    %c0_48 = arith.constant 0 : index
    %133 = vector.load %arg6[%c1_45, %c1_46, %c0_47, %c0_48] : memref<2x2x128x128xbf16, #tpu.memory_space<vmem>>, vector<1x1x128x128xbf16>
    %134 = vector.shape_cast %133 : vector<1x1x128x128xbf16> to vector<128x128xbf16>
    %135 = vector.shape_cast %132 : vector<128x128xbf16> to vector<1x1x128x128xbf16>
    tpu.vector_store %arg6[%c1_45, %c1_46, %c0_47, %c0_48], %135 {strides = array<i32>} : memref<2x2x128x128xbf16, #tpu.memory_space<vmem>>, vector<1x1x128x128xbf16>,
    %136 = vector.extract_strided_slice %14 {offsets = [0, 512], sizes = [128, 128], strides = [1, 1]} : vector<128x1024xf32> to vector<128x128xf32>
    %c4 = arith.constant 4 : index
    %c0_49 = arith.constant 0 : index
    %137 = vector.load %arg4[%c4, %c0_49] : memref<6x128xf32, #tpu.memory_space<vmem>>, vector<1x128xf32>
    %138 = arith.mulf %136, %136 : vector<128x128xf32>
    %cst_50 = arith.constant dense<0.000000e+00> : vector<128xf32>
    %139 = vector.multi_reduction <add>, %138, %cst_50 [1] : vector<128x128xf32> to vector<128xf32>
    %140 = vector.shape_cast %139 : vector<128xf32> to vector<128x1xf32>
    %cst_51 = arith.constant 1.280000e+02 : f32
    %141 = vector.broadcast %cst_51 : f32 to vector<128x1xf32>
    %142 = arith.divf %140, %141 : vector<128x1xf32>
    %cst_52 = arith.constant 9.99999997E-7 : f32
    %143 = vector.broadcast %cst_52 : f32 to vector<128x1xf32>
    %144 = arith.addf %142, %143 : vector<128x1xf32>
    %145 = math.rsqrt %144 : vector<128x1xf32>
    %146 = vector.broadcast %145 : vector<128x1xf32> to vector<128x128xf32>
    %147 = arith.mulf %136, %146 : vector<128x128xf32>
    %148 = vector.broadcast %137 : vector<1x128xf32> to vector<128x128xf32>
    %149 = arith.mulf %147, %148 : vector<128x128xf32>
    %150 = vector.extract_strided_slice %149 {offsets = [0, 0], sizes = [128, 64], strides = [1, 1]} : vector<128x128xf32> to vector<128x64xf32>
    %151 = vector.extract_strided_slice %149 {offsets = [0, 64], sizes = [128, 64], strides = [1, 1]} : vector<128x128xf32> to vector<128x64xf32>
    %152 = arith.mulf %150, %18 : vector<128x64xf32>
    %153 = arith.mulf %151, %19 : vector<128x64xf32>
    %154 = arith.subf %152, %153 : vector<128x64xf32>
    %155 = arith.mulf %151, %18 : vector<128x64xf32>
    %156 = arith.mulf %150, %19 : vector<128x64xf32>
    %157 = arith.addf %155, %156 : vector<128x64xf32>
    %158 = tpu.concatenate %154, %157 in 1 : vector<128x64xf32>, vector<128x64xf32> -> vector<128x128xf32>
    %159 = arith.truncf %158 : vector<128x128xf32> to vector<128x128xbf16>
    %c0_53 = arith.constant 0 : index
    %c0_54 = arith.constant 0 : index
    %160 = vector.load %arg7[%c0_53, %c0_54] : memref<128x256xbf16, #tpu.memory_space<vmem>>, vector<128x128xbf16>
    tpu.vector_store %arg7[%c0_53, %c0_54], %159 {strides = array<i32>} : memref<128x256xbf16, #tpu.memory_space<vmem>>, vector<128x128xbf16>,
    %161 = vector.extract_strided_slice %14 {offsets = [0, 640], sizes = [128, 128], strides = [1, 1]} : vector<128x1024xf32> to vector<128x128xf32>
    %c5 = arith.constant 5 : index
    %c0_55 = arith.constant 0 : index
    %162 = vector.load %arg4[%c5, %c0_55] : memref<6x128xf32, #tpu.memory_space<vmem>>, vector<1x128xf32>
    %163 = arith.mulf %161, %161 : vector<128x128xf32>
    %cst_56 = arith.constant dense<0.000000e+00> : vector<128xf32>
    %164 = vector.multi_reduction <add>, %163, %cst_56 [1] : vector<128x128xf32> to vector<128xf32>
    %165 = vector.shape_cast %164 : vector<128xf32> to vector<128x1xf32>
    %cst_57 = arith.constant 1.280000e+02 : f32
    %166 = vector.broadcast %cst_57 : f32 to vector<128x1xf32>
    %167 = arith.divf %165, %166 : vector<128x1xf32>
    %cst_58 = arith.constant 9.99999997E-7 : f32
    %168 = vector.broadcast %cst_58 : f32 to vector<128x1xf32>
    %169 = arith.addf %167, %168 : vector<128x1xf32>
    %170 = math.rsqrt %169 : vector<128x1xf32>
    %171 = vector.broadcast %170 : vector<128x1xf32> to vector<128x128xf32>
    %172 = arith.mulf %161, %171 : vector<128x128xf32>
    %173 = vector.broadcast %162 : vector<1x128xf32> to vector<128x128xf32>
    %174 = arith.mulf %172, %173 : vector<128x128xf32>
    %175 = vector.extract_strided_slice %174 {offsets = [0, 0], sizes = [128, 64], strides = [1, 1]} : vector<128x128xf32> to vector<128x64xf32>
    %176 = vector.extract_strided_slice %174 {offsets = [0, 64], sizes = [128, 64], strides = [1, 1]} : vector<128x128xf32> to vector<128x64xf32>
    %177 = arith.mulf %175, %18 : vector<128x64xf32>
    %178 = arith.mulf %176, %19 : vector<128x64xf32>
    %179 = arith.subf %177, %178 : vector<128x64xf32>
    %180 = arith.mulf %176, %18 : vector<128x64xf32>
    %181 = arith.mulf %175, %19 : vector<128x64xf32>
    %182 = arith.addf %180, %181 : vector<128x64xf32>
    %183 = tpu.concatenate %179, %182 in 1 : vector<128x64xf32>, vector<128x64xf32> -> vector<128x128xf32>
    %184 = arith.truncf %183 : vector<128x128xf32> to vector<128x128xbf16>
    %c0_59 = arith.constant 0 : index
    %c128 = arith.constant 128 : index
    %185 = vector.load %arg7[%c0_59, %c128] : memref<128x256xbf16, #tpu.memory_space<vmem>>, vector<128x128xbf16>
    tpu.vector_store %arg7[%c0_59, %c128], %184 {strides = array<i32>} : memref<128x256xbf16, #tpu.memory_space<vmem>>, vector<128x128xbf16>,
    return
  }
  func.func @transform_0(%arg0: i32) -> (i32, i32) {
    %c0_i32 = arith.constant 0 : i32
    %c0_i32_0 = arith.constant 0 : i32
    return %arg0, %c0_i32 : i32, i32
  }
  func.func @transform_1(%arg0: i32) -> (i32, i32) {
    %c0_i32 = arith.constant 0 : i32
    %c0_i32_0 = arith.constant 0 : i32
    return %arg0, %c0_i32 : i32, i32
  }
  func.func @transform_2(%arg0: i32) -> (i32, i32) {
    %c0_i32 = arith.constant 0 : i32
    %c0_i32_0 = arith.constant 0 : i32
    return %arg0, %c0_i32 : i32, i32
  }
  func.func @transform_3(%arg0: i32) -> (i32, i32) {
    %c0_i32 = arith.constant 0 : i32
    %c0_i32_0 = arith.constant 0 : i32
    %c0_i32_1 = arith.constant 0 : i32
    return %c0_i32, %c0_i32_0 : i32, i32
  }
  func.func @transform_4(%arg0: i32) -> (i32, i32) {
    %c0_i32 = arith.constant 0 : i32
    %c0_i32_0 = arith.constant 0 : i32
    %c0_i32_1 = arith.constant 0 : i32
    return %c0_i32, %c0_i32_0 : i32, i32
  }
  func.func @transform_5(%arg0: i32) -> (i32, i32, i32, i32) {
    %c0_i32 = arith.constant 0 : i32
    %c0_i32_0 = arith.constant 0 : i32
    %c0_i32_1 = arith.constant 0 : i32
    %c0_i32_2 = arith.constant 0 : i32
    return %c0_i32, %c0_i32_0, %arg0, %c0_i32_1 : i32, i32, i32, i32
  }
  func.func @transform_6(%arg0: i32) -> (i32, i32) {
    %c0_i32 = arith.constant 0 : i32
    %c0_i32_0 = arith.constant 0 : i32
    return %arg0, %c0_i32 : i32, i32
  }
  func.func @transform_7(%arg0: i32) -> (i32, i32) {
    %c0_i32 = arith.constant 0 : i32
    %c0_i32_0 = arith.constant 0 : i32
    return %arg0, %c0_i32 : i32, i32
  }
}

</mosaic_0001>

<bundles_post_ra>
// kernel: tpu_custom_call.1
= control target key start
LH: loop header
LB: loop body
LE: loop exit
PB: predicated region body
PF: predicated region fallthrough
CT: control target
= control target key end

     0   :  { %s9906_s0 = inlined_call_operand.hbm [shape: bf16[256,256], index: 0, kind: input, shape index: {}]   ;;  %s9907_s1 = inlined_call_operand.hbm [shape: f32[256,64], index: 1, kind: input, shape index: {}]   ;;  %s9908_s2 = inlined_call_operand.hbm [shape: f32[256,64], index: 2, kind: input, shape index: {}]   ;;  %s9909_s3 = inlined_call_operand.hbm [shape: f32[6,128], index: 3, kind: input, shape index: {}]   ;;  %s9910_s4 = inlined_call_operand.hbm [shape: bf16[256,1024], index: 4, kind: input, shape index: {}]   ;;  %s9911_s5 = inlined_call_operand.hbm [shape: bf16[2,2,256,128], index: 5, kind: output, shape index: {0}]   ;;  %s9912_s6 = inlined_call_operand.hbm [shape: bf16[256,256], index: 6, kind: output, shape index: {1}]   ;;  %s9913_s7 = inlined_call_operand.hbm [shape: bf16[256,256], index: 7, kind: output, shape index: {2}]  }
   0x1   :  { %10170 = sst [smem:[#allocation151_spill]] %s9907_s1 }
   0x2   :  { %10171 = sst [smem:[#allocation152_spill]] %s9909_s3 }
   0x3   :  { %13 = vsyncpa [#allocation3], 0 }
   0x4   :  { %15 = vsyncpa [#allocation3 + $0x1], 0 }
   0x5   :  { %16 = vsyncpa [#allocation6], 0 }
   0x6   :  { %18 = vsyncpa [#allocation6 + $0x1], 0 }
   0x7   :  { %19 = vsyncpa [#allocation9], 0 }
   0x8   :  { %20 = vsyncpa [#allocation4], 0 }
   0x9   :  { %22 = vsyncpa [#allocation4 + $0x1], 0 }
   0xa   :  { %23 = vsyncpa [#allocation13], 0 }
   0xb   :  { %25 = vsyncpa [#allocation13 + $0x1], 0  ;;  %s6570_s24 = smov 0   ;;  %s6572_s25 = smov 0  }
   0xc   :  { %s6574_s26 = smov 0   ;;  %s6576_s27 = smov 0  }
   0xd LB: > { %10172 = sst [smem:[#allocation22_spill]] %s6495_s24  ;;  %s6591_s28 = sadd.s32 4294967295, %s6507_s27   ;;  %s6507_s27 = sphi %s6576_s27, %s10639_s27   ;;  %s6503_s26 = sphi %s6574_s26, %s10643_s26   ;;  %s6499_s25 = sphi %s6572_s25, %s10642_s25   ;;  %s6495_s24 = sphi %s6570_s24, %s10641_s24  }
   0xe   : > { %10173 = sst [smem:[#allocation23_spill]] %s6507_s27  ;;  %s9915_s29 = sadd.s32 4294967294, %s6507_s27  }
   0xf   : > { %s6595_s30 = sadd.s32 1, %s6507_s27   ;;  %s38_s8 = sadd.s32 1, %s6503_s26 }
  0x10   : > { %10174 = sst [smem:[#allocation24_spill]] %s6595_s30  ;;  %s35_s9 = ssub.s32 %s6507_s27, %s6595_s30 }
  0x11   : > { %p45_p0 = scmp.ne.s32.totalorder %s6503_s26, %s6499_s25  ;;  %p36_p1 = scmp.eq.s32.totalorder %s35_s9, 0 }
  0x12   : > { %p46_p2 = scmp.eq.s32.totalorder %s6507_s27, 0  ;;  %p51_p3 = scmp.ne.s32.totalorder %s6499_s25, %s6495_s24 }
  0x13   : > { %p9914_p4 = scmp.eq.s32.totalorder %s6591_s28, 0  ;;  %p169_p7 = scmp.eq.s32.totalorder %s6591_s28, 1 }
  0x14   : > { %s6607_s10 = scalar_select %p36_p1, %s6503_s26, %s38_s8  }
  0x15   : > { %p6609_p5 = por %p46_p2, %p45_p0  ;;  %p6615_p6 = por %p9914_p4, %p51_p3 }
  0x16   : > { %10175 = sst [smem:[#allocation25_spill]] %s6607_s10  ;;  %p175_p8 = scmp.eq.s32.totalorder %s9915_s29, 1 }
  0x17   : > { %s10177_s12 = scalar_select %p6615_p6, 1, 0 }
  0x18   : > { %p5214_p9 = scmp.ge.s32.totalorder %s6507_s27, 1  ;;  %p234_p10 = scmp.lt.s32.totalorder %s6507_s27, 3 }
  0x19   : > { %p6624_p11 = por %p169_p7, %p45_p0  ;;  %p6628_p12 = por %p175_p8, %p51_p3 }
  0x1a   : > { %p6632_p13 = pnand %p5214_p9, %p234_p10  ;;  %s6509_s16 = smov [#allocation8]  }
  0x1b   : > { %s10178_s13 = scalar_select %p6624_p11, 1, 0 }
  0x1c   : > { %s10179_s14 = scalar_select %p6628_p12, 1, 0 }
  0x1d   : > { %s10181_s15 = scalar_select %p6632_p13, 1, 0 }
  0x1e   : > { %10180 = sst [smem:[#allocation26_spill]] %s10179_s14  ;;  %p5882_p2 = pneg %p6632_p13 }
  0x1f   : > { %s247_s17 = sshll.u32 %s6509_s16, 4  ;;  %p5911_p4 = scmp.lt.s32.totalorder %s6507_s27, 2  ;;  %s248_s17 = int_to_ptr.vmem [resolvable:$true] %s247_s17 }
  0x20   : > { %p10182_p0 = scmp.eq.s32.totalorder %s6591_s28, 0  ;;  %s9916_s19 = sand.u32 1, %s6503_s26  }
  0x21   : > { %p6649_p3 = pnand %p5911_p4, %p6609_p5  ;;  %s6655_s21 = sshll.u32 %s9916_s19, 7 }
  0x22   : > { %p6642_p7 = pnand %p5882_p2, %p10182_p0  ;;  %s6658_s22 = sshll.u32 %s6507_s27, 11 }
  0x23   : > { %s10184_s20 = scalar_select %p6649_p3, 1, 0 }
  0x24   : > { %s10183_s18 = scalar_select %p6642_p7, 1, 0 }
  0x25   : > { %s10185_s3 = sld [smem:[#allocation152_spill]]  ;;  %p9923_p9 = pneg %p6642_p7 }
  0x2b   : > { %s6255_s9 = scalar_lea.hbm %s10185_s3, 128 }
  0x2c   : > { %p6256_p8 = scmp.ne.s32.totalorder %s10185_s3, %s6255_s9  ;;  %p6262_p10 = scmp.lt.u32.totalorder %s6255_s9, %s10185_s3 }
  0x2e   : > { %p6258_p4 = pnand %p9923_p9, %p6256_p8 }
  0x30   : > { %p6259_p5 = pneg %p6258_p4 }
  0x32   : > { %p6264_p2 = pnand %p6262_p10, %p6259_p5 }
  0x34   : > { %6267 = shalt.err (!%p6264_p2)
}
  0x35   : > { %s6268_s19 = scalar_lea.vmem %s248_s17, 128  ;;  %p6276_p11 = scmp.lt.s32.totalorder %s248_s17, %s248_s17 }
  0x36   : > { %p6269_p0 = scmp.ne.s32.totalorder %s248_s17, %s6268_s19  ;;  %p6277_p6 = scmp.lt.s32.totalorder %s6268_s19, %s6268_s19 }
  0x38   : > { %p6271_p1 = pnand %p6269_p0, %p9923_p9  ;;  %p6278_p13 = por %p6277_p6, %p6276_p11 }
  0x3a   : > { %p6272_p12 = pneg %p6271_p1 }
  0x3c   : > { %p6279_p3 = pnand %p6278_p13, %p6272_p12 }
  0x3e   : > { %6282 = shalt.err (!%p6279_p3)
}
  0x3f   : > { %5885 = dma.hbm_to_vmem [thread:$0]  (!%p6642_p7), %s10185_s3, 128, %s248_s17, [#allocation9]  }
  0x40   : > { %s293_s10 = sand.u32 1, %s6507_s27   ;;  %s10186_s1 = sld [smem:[#allocation151_spill]] }
  0x41   : > { %s297_s19 = scalar_lea.vmem [#allocation5], %s6655_s21  ;;  %s6692_s29 = scalar_lea.sflag [#allocation6], %s293_s10 }
  0x42   : > { %s304_s11 = sshll.u32 %s297_s19, 4  ;;  %p10187_p11 = scmp.ne.s32.totalorder %s10184_s20, 0  ;;  %s6690_s11 = int_to_ptr.vmem [resolvable:$true] %s304_s11 }
  0x44   : > { %p6698_p12 = pneg %p10187_p11 }
  0x46   : > { %s6687_s16 = scalar_lea.hbm %s10186_s1, %s6658_s22  ;;  %s6288_s3 = scalar_lea.hbm %s10186_s1, 4096 }
  0x47   : > { %s6283_s23 = scalar_lea.hbm %s6687_s16, 2048  ;;  %p6289_p3 = scmp.lt.u32.totalorder %s6687_s16, %s10186_s1 }
  0x48   : > { %p6284_p6 = scmp.ne.s32.totalorder %s6687_s16, %s6283_s23  ;;  %p6290_p8 = scmp.lt.u32.totalorder %s6288_s3, %s6283_s23 }
  0x49   : > { %s10188_s17 = scalar_select %p6698_p12, 1, 0 }
  0x4a   : > { %p6286_p13 = pnand %p6698_p12, %p6284_p6  ;;  %p6291_p4 = por %p6290_p8, %p6289_p3 }
  0x4b   : > { %p6292_p5 = scmp.lt.u32.totalorder %s6283_s23, %s6687_s16 }
  0x4c   : > { %p6287_p1 = pneg %p6286_p13 }
  0x4d   : > { %p6293_p10 = por %p6292_p5, %p6291_p4 }
  0x4f   : > { %p6294_p2 = pnand %p6293_p10, %p6287_p1 }
  0x51   : > { %6297 = shalt.err (!%p6294_p2)
}
  0x52   : > { %s6298_s10 = scalar_lea.vmem %s6690_s11, 2048  ;;  %s6510_s8 = smov [#allocation5]  }
  0x53   : > { %p6299_p0 = scmp.ne.s32.totalorder %s6690_s11, %s6298_s10  ;;  %s6303_s9 = sshll.u32 %s6510_s8, 4  ;;  %s6304_s9 = int_to_ptr.vmem [resolvable:$false] %s6303_s9 }
  0x54   : > { %s6305_s30 = scalar_lea.vmem %s6304_s9, 4096  ;;  %p6306_p9 = scmp.lt.s32.totalorder %s6690_s11, %s6304_s9 }
  0x55   : > { %p6301_p6 = pnand %p6299_p0, %p6698_p12  ;;  %p6307_p7 = scmp.lt.s32.totalorder %s6305_s30, %s6298_s10 }
  0x57   : > { %p6302_p13 = pneg %p6301_p6  ;;  %p6308_p3 = por %p6307_p7, %p6306_p9 }
  0x59   : > { %p6309_p8 = pnand %p6308_p3, %p6302_p13 }
  0x5b   : > { %6312 = shalt.err (!%p6309_p8)
}
  0x5c   : > { %s9933_s3 = smov 128   ;;  %s6512_s23 = smov 8  }
  0x5d   : > { %5895 = dma.hbm_to_vmem [thread:$0]  (!%p10187_p11), %s6687_s16, 2048, %s6690_s11, %s6692_s29, %s9933_s3, %s9933_s3, %s6512_s23  }
  0x5e   : > { %s6513_s19 = smov [#allocation10]   ;;  %s6313_s30 = scalar_lea.hbm %s9910_s4, 16384 }
  0x5f   : > { %s257_s8 = sshll.u32 %s6513_s19, 4  ;;  %p6314_p7 = scmp.ne.s32.totalorder %s9910_s4, %s6313_s30  ;;  %s258_s8 = int_to_ptr.vmem [resolvable:$true] %s257_s8 }
  0x60   : > { %p10189_p9 = scmp.ne.s32.totalorder %s10183_s18, 0  ;;  %p6320_p10 = scmp.lt.u32.totalorder %s6313_s30, %s9910_s4 }
  0x62   : > { %p10190_p1 = pneg %p10189_p9 }
  0x64   : > { %p6316_p4 = pnand %p6314_p7, %p10190_p1 }
  0x66   : > { %p6317_p5 = pneg %p6316_p4 }
  0x68   : > { %p6322_p2 = pnand %p6320_p10, %p6317_p5 }
  0x6a   : > { %6325 = shalt.err (!%p6322_p2)
}
  0x6b   : > { %s6326_s16 = scalar_lea.vmem %s258_s8, 16384  ;;  %p10191_p6 = pmov %p10190_p1 }
  0x6c   : > { %p6327_p0 = scmp.ne.s32.totalorder %s258_s8, %s6326_s16  ;;  %p6334_p8 = scmp.lt.s32.totalorder %s258_s8, %s258_s8 }
  0x6d   : > { %p6335_p11 = scmp.lt.s32.totalorder %s6326_s16, %s6326_s16 }
  0x6e   : > { %p6329_p13 = pnand %p6327_p0, %p10191_p6 }
  0x6f   : > { %p6336_p12 = por %p6335_p11, %p6334_p8 }
  0x70   : > { %p6330_p3 = pneg %p6329_p13 }
  0x72   : > { %p6337_p1 = pnand %p6336_p12, %p6330_p3 }
  0x74   : > { %6340 = shalt.err (!%p6337_p1)
}
  0x75   : > { %s6514_s1 = smov 512   ;;  %s6515_s24 = smov 32  }
  0x76   : > { %5888 = dma.hbm_to_vmem [thread:$0]  (!%p10189_p9), %s9910_s4, 16384, %s258_s8, [#allocation9], %s6514_s1, %s6514_s1, %s6515_s24  }
  0x77   : > { %s6749_s9 = scalar_lea.hbm %s9906_s0, %s6658_s22  ;;  %s275_s10 = scalar_lea.vmem [#allocation2], %s6655_s21 }
  0x78   : > { %s283_s30 = sshll.u32 %s275_s10, 4  ;;  %s10192_s16 = sand.u32 1, %s6503_s26   ;;  %s6752_s30 = int_to_ptr.vmem [resolvable:$true] %s283_s30 }
  0x79   : > { %s6756_s3 = scalar_lea.sflag [#allocation3], %s10192_s16  ;;  %s6341_s18 = scalar_lea.hbm %s6749_s9, 2048 }
  0x7a   : > { %p6342_p11 = scmp.ne.s32.totalorder %s6749_s9, %s6341_s18  ;;  %p10193_p12 = scmp.ne.s32.totalorder %s10188_s17, 0 }
  0x7b   : > { %s6346_s24 = scalar_lea.hbm %s9906_s0, 4096  ;;  %p6347_p4 = scmp.lt.u32.totalorder %s6749_s9, %s9906_s0 }
  0x7c   : > { %p6344_p7 = pnand %p6342_p11, %p10193_p12  ;;  %p6348_p5 = scmp.lt.u32.totalorder %s6346_s24, %s6341_s18 }
  0x7d   : > { %p6350_p2 = scmp.lt.u32.totalorder %s6341_s18, %s6749_s9 }
  0x7e   : > { %p6345_p9 = pneg %p6344_p7  ;;  %p6349_p10 = por %p6348_p5, %p6347_p4 }
  0x80   : > { %p6351_p0 = por %p6350_p2, %p6349_p10 }
  0x82   : > { %p6352_p6 = pnand %p6351_p0, %p6345_p9 }
  0x84   : > { %6355 = shalt.err (!%p6352_p6)
}
  0x85   : > { %s6356_s11 = scalar_lea.vmem %s6752_s30, 2048  ;;  %s6516_s19 = smov [#allocation2]  }
  0x86   : > { %p6357_p13 = scmp.ne.s32.totalorder %s6752_s30, %s6356_s11  ;;  %s6361_s10 = sshll.u32 %s6516_s19, 4  ;;  %s6362_s10 = int_to_ptr.vmem [resolvable:$false] %s6361_s10 }
  0x87   : > { %s6363_s16 = scalar_lea.vmem %s6362_s10, 4096  ;;  %p6364_p1 = scmp.lt.s32.totalorder %s6752_s30, %s6362_s10 }
  0x88   : > { %p6359_p3 = pnand %p6357_p13, %p10193_p12  ;;  %p6365_p11 = scmp.lt.s32.totalorder %s6363_s16, %s6356_s11 }
  0x8a   : > { %p6360_p8 = pneg %p6359_p3  ;;  %p6366_p7 = por %p6365_p11, %p6364_p1 }
  0x8c   : > { %p6367_p4 = pnand %p6366_p7, %p6360_p8 }
  0x8e   : > { %6370 = shalt.err (!%p6367_p4)
}
  0x8f   : > { %p10194_p9 = scmp.ne.s32.totalorder %s10184_s20, 0  ;;  %s10195_s18 = smov 128  }
  0x90   : > { %s6787_s24 = scalar_lea.hbm %s9908_s2, %s6658_s22  ;;  %s318_s27 = scalar_lea.vmem [#allocation7], %s6655_s21 }
  0x91   : > { %5892 = dma.hbm_to_vmem [thread:$0]  (!%p10194_p9), %s6749_s9, 2048, %s6752_s30, %s6756_s3, %s10195_s18, %s10195_s18, %s6512_s23  }
  0x92   : > { %s325_s14 = sshll.u32 %s318_s27, 4  ;;  %s6371_s11 = scalar_lea.hbm %s6787_s24, 2048  ;;  %s6790_s14 = int_to_ptr.vmem [resolvable:$true] %s325_s14 }
  0x93   : > { %p6372_p5 = scmp.ne.s32.totalorder %s6787_s24, %s6371_s11  ;;  %s6376_s9 = scalar_lea.hbm %s9908_s2, 4096 }
  0x94   : > { %p6377_p0 = scmp.lt.u32.totalorder %s6787_s24, %s9908_s2  ;;  %p6378_p6 = scmp.lt.u32.totalorder %s6376_s9, %s6371_s11 }
  0x95   : > { %p6374_p10 = pnand %p6372_p5, %p10193_p12  ;;  %p6380_p3 = scmp.lt.u32.totalorder %s6371_s11, %s6787_s24 }
  0x96   : > { %p6379_p13 = por %p6378_p6, %p6377_p0 }
  0x97   : > { %p6375_p2 = pneg %p6374_p10 }
  0x98   : > { %p6381_p8 = por %p6380_p3, %p6379_p13 }
  0x9a   : > { %p6382_p1 = pnand %p6381_p8, %p6375_p2 }
  0x9c   : > { %6385 = shalt.err (!%p6382_p1)
}
  0x9d   : > { %s6386_s21 = scalar_lea.vmem %s6790_s14, 2048  ;;  %s6517_s10 = smov [#allocation7]  }
  0x9e   : > { %p6387_p11 = scmp.ne.s32.totalorder %s6790_s14, %s6386_s21  ;;  %s6391_s16 = sshll.u32 %s6517_s10, 4  ;;  %s6392_s16 = int_to_ptr.vmem [resolvable:$false] %s6391_s16 }
  0x9f   : > { %s6393_s8 = scalar_lea.vmem %s6392_s16, 4096  ;;  %p6394_p5 = scmp.lt.s32.totalorder %s6790_s14, %s6392_s16 }
  0xa0   : > { %p6389_p7 = pnand %p6387_p11, %p10193_p12  ;;  %p6395_p10 = scmp.lt.s32.totalorder %s6393_s8, %s6386_s21 }
  0xa2   : > { %p6390_p4 = pneg %p6389_p7  ;;  %p6396_p0 = por %p6395_p10, %p6394_p5 }
  0xa4   : > { %p6397_p6 = pnand %p6396_p0, %p6390_p4 }
  0xa6   : > { %6400 = shalt.err (!%p6397_p6)
}
  0xa7   : > { %5898 = dma.hbm_to_vmem [thread:$0]  (!%p10194_p9), %s6787_s24, 2048, %s6790_s14, %s6692_s29, %s10195_s18, %s10195_s18, %s6512_s23  }
  0xa8   : > { %p10196_p12 = scmp.ne.s32.totalorder %s10181_s15, 0 }
  0xaa   : > { %337 = sbr.rel (%p10196_p12) target bundleno = 1667 (0x683), region = 40 }
  0xb1   : > { %s6820_s17 = sand.u32 1, %s6499_s25   ;;  %p10197_p2 = scmp.ne.s32.totalorder %s10177_s12, 0 }
  0xb2   : > { %s6823_s1 = sshll.u32 %s6820_s17, 7  ;;  %s340_s20 = scalar_lea.sflag [#allocation3], %s6820_s17 }
  0xb3   : > { %s6827_s27 = scalar_lea.vmem [#allocation2], %s6823_s1 }
  0xb4   : > { %6474 = dma.done.wait (%p10197_p2), %s340_s20, 2048  }
  0xb5   : > { %6476 = vsyncadd (%p10197_p2), %s340_s20, 4294965248  ;;  %s348_s15 = sand.u32 1, %s6591_s28   ;;  %s6837_s23 = scalar_lea.vmem [#allocation5], %s6823_s1 }
  0xb6   : > { %s349_s29 = scalar_lea.sflag [#allocation6], %s348_s15 }
  0xb7   : > { %6478 = dma.done.wait (%p10197_p2), %s349_s29, 4096  }
  0xb8   : > { %6480 = vsyncadd (%p10197_p2), %s349_s29, 4294963200  ;;  %s6844_s18 = scalar_lea.vmem [#allocation7], %s6823_s1  ;;  %p10198_p9 = scmp.eq.s32.totalorder %s6591_s28, 0 }
  0xba   : > { %6482 = dma.done.wait (%p10198_p9), [#allocation9], 16512   ;;  %p10199_p13 = pmov %p10198_p9 }
  0xbb   : > { %v426_v0 = vld [vmem:[%s6827_s27] sm:$0xff]  ;;  %v427_v1 = vld [vmem:[%s6827_s27 + $0x8] sm:$0xff]  ;;  %v428_v2 = vld [vmem:[%s6827_s27 + $0x10] sm:$0xff]  ;;  %s6518_s12 = smov 64   ;;  %s7453_s24 = scalar_lea.vmem [#allocation14], %s6823_s1  ;;  %vm2501_vm0 = vcmask 523264  }
  0xbc   : > { %6484 = vsyncadd (%p10199_p13), [#allocation9], 4294950784  ;;  %v6853_v3 = vunpack.c.l.bf16 %v426_v0  ;;  %v6855_v4 = vunpack.c.h.bf16 %v426_v0  ;;  %v6857_v5 = vunpack.c.l.bf16 %v427_v1  ;;  %v6859_v6 = vunpack.c.h.bf16 %v427_v1  ;;  %v429_v7 = vld [vmem:[%s6827_s27 + $0x18] sm:$0xff]  ;;  %v431_v12 = vld [vmem:[%s6827_s27 + $0x28] sm:$0xff]  ;;  %s5234_s14 = sshll.u32 %s6820_s17, 8  ;;  %s9436_s19 = scalar_lea.vmem [#allocation12], %s6823_s1 }
  0xbd   : > { %v6862_v8 = vunpack.c.l.bf16 %v428_v2  ;;  %v6864_v9 = vunpack.c.h.bf16 %v428_v2  ;;  %v6866_v10 = vunpack.c.l.bf16 %v429_v7  ;;  %v6868_v11 = vunpack.c.h.bf16 %v429_v7  ;;  %v430_v17 = vld [vmem:[%s6827_s27 + $0x20] sm:$0xff]  ;;  %v433_v22 = vld [vmem:[%s6827_s27 + $0x38] sm:$0xff]  ;;  %v432_v27 = vld [vmem:[%s6827_s27 + $0x30] sm:$0xff]  ;;  %s8126_s11 = scalar_lea.vmem [#allocation11], %s5234_s14  ;;  %s4931_s3 = scalar_lea.sflag [#allocation4], %s6820_s17 }
  0xbe   : > { %v474_v13 = vmul.f32 %v6853_v3, %v6853_v3  ;;  %v475_v14 = vmul.f32 %v6855_v4, %v6855_v4  ;;  %v476_v15 = vmul.f32 %v6857_v5, %v6857_v5  ;;  %v477_v16 = vmul.f32 %v6859_v6, %v6859_v6  ;;  %v434_v40 = vld [vmem:[%s6827_s27 + $0x40] sm:$0xff]  ;;  %v435_v41 = vld [vmem:[%s6827_s27 + $0x48] sm:$0xff]  ;;  %v436_v52 = vld [vmem:[%s6827_s27 + $0x50] sm:$0xff]  ;;  %s9794_s9 = scalar_lea.sflag [#allocation13], %s348_s15 }
  0xbf   : > { %v478_v18 = vmul.f32 %v6862_v8, %v6862_v8  ;;  %v479_v19 = vmul.f32 %v6864_v9, %v6864_v9  ;;  %v480_v20 = vmul.f32 %v6866_v10, %v6866_v10  ;;  %v481_v21 = vmul.f32 %v6868_v11, %v6868_v11  ;;  %v437_v53 = vld [vmem:[%s6827_s27 + $0x58] sm:$0xff]  ;;  %v439_v56 = vld [vmem:[%s6827_s27 + $0x68] sm:$0xff]  ;;  %v438_v61 = vld [vmem:[%s6827_s27 + $0x60] sm:$0xff] }
  0xc0   : > { %v506_v23 = vadd.f32 %v475_v14, %v474_v13  ;;  %v509_v24 = vadd.f32 %v477_v16, %v476_v15  ;;  %v6889_v25 = vunpack.c.l.bf16 %v431_v12  ;;  %v6891_v26 = vunpack.c.h.bf16 %v431_v12  ;;  %v651_v2 = vld [vmem:[#allocation10] sm:$0xff]  ;;  %v652_v13 = vld [vmem:[#allocation10 + $0x8] sm:$0xff] }
  0xc1   : > { %v512_v28 = vadd.f32 %v479_v19, %v478_v18  ;;  %v515_v29 = vadd.f32 %v481_v21, %v480_v20  ;;  %v6894_v30 = vunpack.c.l.bf16 %v430_v17  ;;  %v6896_v31 = vunpack.c.h.bf16 %v430_v17  ;;  %v655_v7 = vld [vmem:[#allocation10 + $0x20] sm:$0xff]  ;;  %v656_v14 = vld [vmem:[#allocation10 + $0x28] sm:$0xff] }
  0xc2   : > { %507 = vadd.xlane.f32.xlu0 %v506_v23  ;;  %v484_v32 = vmul.f32 %v6889_v25, %v6889_v25  ;;  %v485_v33 = vmul.f32 %v6891_v26, %v6891_v26  ;;  %v6902_v34 = vunpack.c.l.bf16 %v433_v22  ;;  %v6904_v35 = vunpack.c.h.bf16 %v433_v22  ;;  %v659_v18 = vld [vmem:[#allocation10 + $0x40] sm:$0xff] }
  0xc3   : > { %513 = vadd.xlane.f32.xlu1 %v512_v28  ;;  %v482_v36 = vmul.f32 %v6894_v30, %v6894_v30  ;;  %v483_v37 = vmul.f32 %v6896_v31, %v6896_v31  ;;  %v6910_v38 = vunpack.c.l.bf16 %v432_v27  ;;  %v6912_v39 = vunpack.c.h.bf16 %v432_v27  ;;  %v663_v19 = vld [vmem:[#allocation10 + $0x60] sm:$0xff]  ;;  %v664_v27 = vld [vmem:[#allocation10 + $0x68] sm:$0xff] }
  0xc4   : > { %v488_v42 = vmul.f32 %v6902_v34, %v6902_v34  ;;  %v489_v43 = vmul.f32 %v6904_v35, %v6904_v35  ;;  %v6924_v47 = vunpack.c.l.bf16 %v434_v40  ;;  %v6926_v48 = vunpack.c.h.bf16 %v434_v40  ;;  %v441_v40 = vld [vmem:[%s6827_s27 + $0x78] sm:$0xff] }
  0xc5   : > { %v486_v44 = vmul.f32 %v6910_v38, %v6910_v38  ;;  %v487_v45 = vmul.f32 %v6912_v39, %v6912_v39  ;;  %v518_v46 = vadd.f32 %v483_v37, %v482_v36  ;;  %v521_v49 = vadd.f32 %v485_v33, %v484_v32  ;;  %v440_v33 = vld [vmem:[%s6827_s27 + $0x70] sm:$0xff] }
  0xc6   : > { %510 = vadd.xlane.f32.xlu0 %v509_v24  ;;  %v6928_v50 = vunpack.c.l.bf16 %v435_v41  ;;  %v6930_v51 = vunpack.c.h.bf16 %v435_v41  ;;  %v527_v54 = vadd.f32 %v489_v43, %v488_v42  ;;  %v490_v57 = vmul.f32 %v6924_v47, %v6924_v47  ;;  %v660_v24 = vld [vmem:[#allocation10 + $0x48] sm:$0xff] }
  0xc7   : > { %516 = vadd.xlane.f32.xlu1 %v515_v29  ;;  %v524_v55 = vadd.f32 %v487_v45, %v486_v44  ;;  %v491_v58 = vmul.f32 %v6926_v48, %v6926_v48  ;;  %v6939_v59 = vunpack.c.l.bf16 %v436_v52  ;;  %v6941_v60 = vunpack.c.h.bf16 %v436_v52  ;;  %v667_v44 = vld [vmem:[#allocation10 + $0x80] sm:$0xff] }
  0xc8   : > { %v492_v62 = vmul.f32 %v6928_v50, %v6928_v50  ;;  %v493_v63 = vmul.f32 %v6930_v51, %v6930_v51  ;;  %v6948_v0 = vunpack.c.l.bf16 %v437_v53  ;;  %v6950_v1 = vunpack.c.h.bf16 %v437_v53  ;;  %v671_v53 = vld [vmem:[#allocation10 + $0xa0] sm:$0xff] }
  0xc9   : > { %v6952_v12 = vunpack.c.l.bf16 %v439_v56  ;;  %v6954_v15 = vunpack.c.h.bf16 %v439_v56  ;;  %v6956_v16 = vunpack.c.l.bf16 %v438_v61  ;;  %v6958_v17 = vunpack.c.h.bf16 %v438_v61 }
  0xca   : > { %519 = vadd.xlane.f32.xlu0 %v518_v46  ;;  %v530_v20 = vadd.f32 %v491_v58, %v490_v57  ;;  %v494_v21 = vmul.f32 %v6939_v59, %v6939_v59  ;;  %v495_v22 = vmul.f32 %v6941_v60, %v6941_v60  ;;  %v5238_v23 = vcombine.high %v651_v2, %v655_v7 }
  0xcb   : > { %522 = vadd.xlane.f32.xlu1 %v521_v49  ;;  %v533_v28 = vadd.f32 %v493_v63, %v492_v62  ;;  %v496_v29 = vmul.f32 %v6948_v0, %v6948_v0  ;;  %v497_v32 = vmul.f32 %v6950_v1, %v6950_v1  ;;  %v5240_v36 = vcombine.high %v652_v13, %v656_v14 }
  0xcc   : > { %v500_v37 = vmul.f32 %v6952_v12, %v6952_v12  ;;  %1419 = vmatprep.subr.bf16.mxu0 %v5238_v23  ;;  %v5237_v41 = vcombine.low %v651_v2, %v655_v7  ;;  %v5239_v42 = vcombine.low %v652_v13, %v656_v14  ;;  %v5246_v43 = vcombine.high %v659_v18, %v663_v19  ;;  %v679_v23 = vld [vmem:[#allocation10 + $0xe0] sm:$0xff] }
  0xcd   : > { %v501_v45 = vmul.f32 %v6954_v15, %v6954_v15  ;;  %v498_v46 = vmul.f32 %v6956_v16, %v6956_v16  ;;  %v499_v49 = vmul.f32 %v6958_v17, %v6958_v17  ;;  %1532 = vmatprep.subr.bf16.mxu1 %v5240_v36  ;;  %v5248_v52 = vcombine.high %v660_v24, %v664_v27  ;;  %v680_v36 = vld [vmem:[#allocation10 + $0xe8] sm:$0xff] }
  0xce   : > { %525 = vadd.xlane.f32.xlu0 %v524_v55  ;;  %v672_v55 = vld [vmem:[#allocation10 + $0xa8] sm:$0xff]  ;;  %v536_v56 = vadd.f32 %v495_v22, %v494_v21  ;;  %v6978_v57 = vunpack.c.l.bf16 %v440_v33  ;;  %v6980_v58 = vunpack.c.h.bf16 %v440_v33  ;;  %1420 = vmatpush1.bf16.msra.mxu0 %v5237_v41  ;;  %v5245_v61 = vcombine.low %v659_v18, %v663_v19  ;;  %v687_v41 = vld [vmem:[#allocation10 + $0x120] sm:$0xff] }
  0xcf   : > { %528 = vadd.xlane.f32.xlu1 %v527_v54  ;;  %v668_v54 = vld [vmem:[#allocation10 + $0x88] sm:$0xff]  ;;  %v539_v62 = vadd.f32 %v497_v32, %v496_v29  ;;  %v6982_v63 = vunpack.c.l.bf16 %v441_v40  ;;  %v6984_v2 = vunpack.c.h.bf16 %v441_v40  ;;  %1533 = vmatpush1.bf16.msra.mxu1 %v5239_v42  ;;  %v5247_v7 = vcombine.low %v660_v24, %v664_v27  ;;  %v683_v40 = vld [vmem:[#allocation10 + $0x100] sm:$0xff] }
  0xd0   : > { %1421 = vmatprep.subr.bf16.mxu0 %v5246_v43  ;;  %1534 = vmatprep.subr.bf16.mxu1 %v5248_v52  ;;  %v5254_v13 = vcombine.high %v667_v44, %v671_v53  ;;  %v5256_v14 = vcombine.high %v668_v54, %v672_v55  ;;  %v545_v21 = vadd.f32 %v501_v45, %v500_v37  ;;  %v676_v33 = vld [vmem:[#allocation10 + $0xc8] sm:$0xff] }
  0xd1   : > { %v542_v22 = vadd.f32 %v499_v49, %v498_v46  ;;  %v502_v18 = vmul.f32 %v6978_v57, %v6978_v57  ;;  %v503_v19 = vmul.f32 %v6980_v58, %v6980_v58  ;;  %v504_v24 = vmul.f32 %v6982_v63, %v6982_v63  ;;  %v684_v42 = vld [vmem:[#allocation10 + $0x108] sm:$0xff] }
  0xd2   : > { %531 = vadd.xlane.f32.xlu0 %v530_v20  ;;  %v675_v20 = vld [vmem:[#allocation10 + $0xc0] sm:$0xff]  ;;  %1422 = vmatpush1.bf16.msra.mxu0 %v5245_v61  ;;  %v505_v27 = vmul.f32 %v6984_v2, %v6984_v2  ;;  %v5255_v29 = vcombine.low %v668_v54, %v672_v55  ;;  %v5264_v37 = vcombine.high %v676_v33, %v680_v36  ;;  %v688_v43 = vld [vmem:[#allocation10 + $0x128] sm:$0xff] }
  0xd3   : > { %534 = vadd.xlane.f32.xlu1 %v533_v28  ;;  %v5253_v28 = vcombine.low %v667_v44, %v671_v53  ;;  %1535 = vmatpush1.bf16.msra.mxu1 %v5247_v7  ;;  %v5262_v32 = vcombine.high %v675_v20, %v679_v23  ;;  %v548_v45 = vadd.f32 %v503_v19, %v502_v18  ;;  %v691_v54 = vld [vmem:[#allocation10 + $0x140] sm:$0xff]  ;;  %v696_v61 = vld [vmem:[#allocation10 + $0x168] sm:$0xff] }
  0xd4   : > { %1423 = vmatprep.subr.bf16.mxu0 %v5254_v13  ;;  %1536 = vmatprep.subr.bf16.mxu1 %v5256_v14  ;;  %v5261_v44 = vcombine.low %v675_v20, %v679_v23  ;;  %v551_v46 = vadd.f32 %v505_v27, %v504_v24  ;;  %v5263_v49 = vcombine.low %v676_v33, %v680_v36  ;;  %v695_v55 = vld [vmem:[#allocation10 + $0x160] sm:$0xff]  ;;  %v704_v23 = vld [vmem:[#allocation10 + $0x1a8] sm:$0xff] }
  0xd5   : > { %v5270_v52 = vcombine.high %v683_v40, %v687_v41  ;;  %v5272_v53 = vcombine.high %v684_v42, %v688_v43  ;;  %v5271_v7 = vcombine.low %v684_v42, %v688_v43  ;;  %v5278_v13 = vcombine.high %v691_v54, %v695_v55  ;;  %v699_v20 = vld [vmem:[#allocation10 + $0x180] sm:$0xff]  ;;  %v708_v27 = vld [vmem:[#allocation10 + $0x1c8] sm:$0xff]  ;;  %v7000_v43 = vld [vmem:[#allocation10 + $0x38] sm:$0xff] }
  0xd6   : > { %537 = vadd.xlane.f32.xlu0 %v536_v56  ;;  %1424 = vmatpush1.bf16.msra.mxu0 %v5253_v28  ;;  %v692_v56 = vld [vmem:[#allocation10 + $0x148] sm:$0xff]  ;;  %v5277_v33 = vcombine.low %v691_v54, %v695_v55  ;;  %v707_v19 = vld [vmem:[#allocation10 + $0x1c0] sm:$0xff] }
  0xd7   : > { %540 = vadd.xlane.f32.xlu1 %v539_v62  ;;  %1537 = vmatpush1.bf16.msra.mxu1 %v5255_v29  ;;  %v5269_v62 = vcombine.low %v683_v40, %v687_v41  ;;  %v5280_v14 = vcombine.high %v692_v56, %v696_v61  ;;  %v5279_v36 = vcombine.low %v692_v56, %v696_v61  ;;  %v711_v24 = vld [vmem:[#allocation10 + $0x1e0] sm:$0xff]  ;;  %v712_v29 = vld [vmem:[#allocation10 + $0x1e8] sm:$0xff]  ;;  %v6998_v40 = vld [vmem:[#allocation10 + $0x18] sm:$0xff] }
  0xd8   : > { %1425 = vmatprep.subr.bf16.mxu0 %v5262_v32  ;;  %1538 = vmatprep.subr.bf16.mxu1 %v5264_v37  ;;  %v6994_v32 = vld [vmem:[#allocation10 + $0x10] sm:$0xff]  ;;  %v716_v54 = vld [vmem:[#allocation10 + $0x208] sm:$0xff]  ;;  %v5293_v56 = vcombine.low %v707_v19, %v711_v24  ;;  %v5295_v61 = vcombine.low %v708_v27, %v712_v29 }
  0xd9   : > { %v6996_v37 = vld [vmem:[#allocation10 + $0x30] sm:$0xff]  ;;  %v720_v55 = vld [vmem:[#allocation10 + $0x228] sm:$0xff] }
  0xda   : > { %543 = vadd.xlane.f32.xlu0 %v542_v22  ;;  %1426 = vmatpush1.bf16.msra.mxu0 %v5261_v44  ;;  %v700_v22 = vld [vmem:[#allocation10 + $0x188] sm:$0xff]  ;;  %v5241_v44 = vcombine.low %v6994_v32, %v6996_v37 }
  0xdb   : > { %546 = vadd.xlane.f32.xlu1 %v545_v21  ;;  %1539 = vmatpush1.bf16.msra.mxu1 %v5263_v49  ;;  %v703_v21 = vld [vmem:[#allocation10 + $0x1a0] sm:$0xff]  ;;  %v5288_v28 = vcombine.high %v700_v22, %v704_v23  ;;  %v5287_v42 = vcombine.low %v700_v22, %v704_v23  ;;  %v5296_v49 = vcombine.high %v708_v27, %v712_v29 }
  0xdc   : > { %1427 = vmatprep.subr.bf16.mxu0 %v5270_v52  ;;  %1540 = vmatprep.subr.bf16.mxu1 %v5272_v53  ;;  %v5286_v18 = vcombine.high %v699_v20, %v703_v21  ;;  %v5285_v41 = vcombine.low %v699_v20, %v703_v21  ;;  %v715_v52 = vld [vmem:[#allocation10 + $0x200] sm:$0xff]  ;;  %v724_v20 = vld [vmem:[#allocation10 + $0x248] sm:$0xff]  ;;  %v5303_v23 = vcombine.low %v716_v54, %v720_v55 }
  0xdd   : > { %v719_v53 = vld [vmem:[#allocation10 + $0x220] sm:$0xff]  ;;  %v728_v21 = vld [vmem:[#allocation10 + $0x268] sm:$0xff] }
  0xde   : > { %549 = vadd.xlane.f32.xlu0 %v548_v45  ;;  %1428 = vmatpush1.bf16.msra.mxu0 %v5269_v62  ;;  %v5294_v45 = vcombine.high %v707_v19, %v711_v24  ;;  %v5302_v62 = vcombine.high %v715_v52, %v719_v53  ;;  %v5301_v22 = vcombine.low %v715_v52, %v719_v53  ;;  %v735_v19 = vld [vmem:[#allocation10 + $0x2a0] sm:$0xff]  ;;  %v736_v24 = vld [vmem:[#allocation10 + $0x2a8] sm:$0xff] }
  0xdf   : > { %552 = vadd.xlane.f32.xlu1 %v551_v46  ;;  %1541 = vmatpush1.bf16.msra.mxu1 %v5271_v7  ;;  %v5243_v46 = vcombine.low %v6998_v40, %v7000_v43  ;;  %v5304_v7 = vcombine.high %v716_v54, %v720_v55  ;;  %v5311_v29 = vcombine.low %v724_v20, %v728_v21  ;;  %v740_v52 = vld [vmem:[#allocation10 + $0x2c8] sm:$0xff] }
  0xe0   : > { %1429 = vmatprep.subr.bf16.mxu0 %v5278_v13  ;;  %1542 = vmatprep.subr.bf16.mxu1 %v5280_v14  ;;  %v723_v13 = vld [vmem:[#allocation10 + $0x240] sm:$0xff]  ;;  %v744_v53 = vld [vmem:[#allocation10 + $0x2e8] sm:$0xff] }
  0xe1   : > { %v727_v14 = vld [vmem:[#allocation10 + $0x260] sm:$0xff] }
  0xe2   : > { %1430 = vmatpush1.bf16.msra.mxu0 %v5277_v33  ;;  %v5310_v33 = vcombine.high %v723_v13, %v727_v14  ;;  %v5309_v27 = vcombine.low %v723_v13, %v727_v14  ;;  %v748_v13 = vld [vmem:[#allocation10 + $0x308] sm:$0xff] }
  0xe3   : > { %1543 = vmatpush1.bf16.msra.mxu1 %v5279_v36  ;;  %1431 = vmatprep.subr.bf16.mxu0 %v5286_v18  ;;  %v5312_v36 = vcombine.high %v724_v20, %v728_v21  ;;  %v731_v18 = vld [vmem:[#allocation10 + $0x280] sm:$0xff]  ;;  %v752_v14 = vld [vmem:[#allocation10 + $0x328] sm:$0xff]  ;;  %v5327_v21 = vcombine.low %v740_v52, %v744_v53 }
  0xe4   : > { %1544 = vmatprep.subr.bf16.mxu1 %v5288_v28  ;;  %v732_v28 = vld [vmem:[#allocation10 + $0x288] sm:$0xff]  ;;  %v5317_v54 = vcombine.low %v731_v18, %v735_v19 }
  0xe5   : > { %v5319_v55 = vcombine.low %v732_v28, %v736_v24 }
  0xe6   : > { %1432 = vmatpush1.bf16.msra.mxu0 %v5285_v41  ;;  %v5318_v41 = vcombine.high %v731_v18, %v735_v19  ;;  %v756_v18 = vld [vmem:[#allocation10 + $0x348] sm:$0xff] }
  0xe7   : > { %1545 = vmatpush1.bf16.msra.mxu1 %v5287_v42  ;;  %1433 = vmatprep.subr.bf16.mxu0 %v5294_v45  ;;  %v5320_v42 = vcombine.high %v732_v28, %v736_v24  ;;  %v739_v45 = vld [vmem:[#allocation10 + $0x2c0] sm:$0xff]  ;;  %v760_v19 = vld [vmem:[#allocation10 + $0x368] sm:$0xff]  ;;  %v5335_v24 = vcombine.low %v748_v13, %v752_v14 }
  0xe8   : > { %1546 = vmatprep.subr.bf16.mxu1 %v5296_v49  ;;  %v743_v49 = vld [vmem:[#allocation10 + $0x2e0] sm:$0xff] }
  0xe9   : > { %v5325_v20 = vcombine.low %v739_v45, %v743_v49 }
  0xea   : > { %1434 = vmatpush1.bf16.msra.mxu0 %v5293_v56  ;;  %v5326_v56 = vcombine.high %v739_v45, %v743_v49  ;;  %v764_v45 = vld [vmem:[#allocation10 + $0x388] sm:$0xff] }
  0xeb   : > { %1547 = vmatpush1.bf16.msra.mxu1 %v5295_v61  ;;  %1435 = vmatprep.subr.bf16.mxu0 %v5302_v62  ;;  %v5328_v61 = vcombine.high %v740_v52, %v744_v53  ;;  %v747_v62 = vld [vmem:[#allocation10 + $0x300] sm:$0xff]  ;;  %v768_v49 = vld [vmem:[#allocation10 + $0x3a8] sm:$0xff]  ;;  %v5343_v53 = vcombine.low %v756_v18, %v760_v19 }
  0xec   : > { %1548 = vmatprep.subr.bf16.mxu1 %v5304_v7  ;;  %v751_v7 = vld [vmem:[#allocation10 + $0x320] sm:$0xff] }
  0xed   : > { %v5333_v28 = vcombine.low %v747_v62, %v751_v7 }
  0xee   : > { %1436 = vmatpush1.bf16.msra.mxu0 %v5301_v22  ;;  %v5334_v22 = vcombine.high %v747_v62, %v751_v7  ;;  %v772_v62 = vld [vmem:[#allocation10 + $0x3c8] sm:$0xff] }
  0xef   : > { %1549 = vmatpush1.bf16.msra.mxu1 %v5303_v23  ;;  %1437 = vmatprep.subr.bf16.mxu0 %v5310_v33  ;;  %v5336_v23 = vcombine.high %v748_v13, %v752_v14  ;;  %v755_v33 = vld [vmem:[#allocation10 + $0x340] sm:$0xff]  ;;  %v776_v7 = vld [vmem:[#allocation10 + $0x3e8] sm:$0xff]  ;;  %v5351_v14 = vcombine.low %v764_v45, %v768_v49 }
  0xf0   : > { %1550 = vmatprep.subr.bf16.mxu1 %v5312_v36  ;;  %v759_v36 = vld [vmem:[#allocation10 + $0x360] sm:$0xff] }
  0xf1   : > { %v5341_v52 = vcombine.low %v755_v33, %v759_v36 }
  0xf2   : > { %1438 = vmatpush1.bf16.msra.mxu0 %v5309_v27  ;;  %v5342_v27 = vcombine.high %v755_v33, %v759_v36  ;;  %v5242_v33 = vcombine.high %v6994_v32, %v6996_v37  ;;  %v5244_v36 = vcombine.high %v6998_v40, %v7000_v43  ;;  %v677_v32 = vld [vmem:[#allocation10 + $0xd0] sm:$0xff]  ;;  %v678_v43 = vld [vmem:[#allocation10 + $0xd8] sm:$0xff] }
  0xf3   : > { %1551 = vmatpush1.bf16.msra.mxu1 %v5311_v29  ;;  %1439 = vmatprep.subr.bf16.mxu0 %v5318_v41  ;;  %v5344_v29 = vcombine.high %v756_v18, %v760_v19  ;;  %v763_v41 = vld [vmem:[#allocation10 + $0x380] sm:$0xff]  ;;  %v681_v40 = vld [vmem:[#allocation10 + $0xf0] sm:$0xff] }
  0xf4   : > { %1552 = vmatprep.subr.bf16.mxu1 %v5320_v42  ;;  %v767_v42 = vld [vmem:[#allocation10 + $0x3a0] sm:$0xff] }
  0xf5   : > { %v5349_v13 = vcombine.low %v763_v41, %v767_v42 }
  0xf6   : > { %1440 = vmatpush1.bf16.msra.mxu0 %v5317_v54  ;;  %v5350_v54 = vcombine.high %v763_v41, %v767_v42 }
  0xf7   : > { %1553 = vmatpush1.bf16.msra.mxu1 %v5319_v55  ;;  %1441 = vmatprep.subr.bf16.mxu0 %v5326_v56  ;;  %v5352_v55 = vcombine.high %v764_v45, %v768_v49  ;;  %v771_v56 = vld [vmem:[#allocation10 + $0x3c0] sm:$0xff] }
  0xf8   : > { %1554 = vmatprep.subr.bf16.mxu1 %v5328_v61  ;;  %v775_v61 = vld [vmem:[#allocation10 + $0x3e0] sm:$0xff] }
  0xfa   : > { %1442 = vmatpush1.bf16.msra.mxu0 %v5325_v20  ;;  %v5358_v20 = vcombine.high %v771_v56, %v775_v61 }
  0xfb   : > { %1555 = vmatpush1.bf16.msra.mxu1 %v5327_v21  ;;  %1443 = vmatprep.subr.bf16.mxu0 %v5334_v22  ;;  %v5360_v21 = vcombine.high %v772_v62, %v776_v7  ;;  %v5357_v22 = vcombine.low %v771_v56, %v775_v61 }
  0xfc   : > { %1556 = vmatprep.subr.bf16.mxu1 %v5336_v23  ;;  %v5359_v23 = vcombine.low %v772_v62, %v776_v7  ;;  %v2000_v62 = vld [vmem:[%s6844_s18 + $0x8] sm:$0xff] }
  0xfd   : > { %2183 = vrot.lane.b32.xlu1 %v2000_v62, %s6518_s12 }
  0xfe   : > { %1444 = vmatpush1.bf16.msra.mxu0 %v5333_v28 }
  0xff   : > { %1557 = vmatpush1.bf16.msra.mxu1 %v5335_v24  ;;  %1445 = vmatprep.subr.bf16.mxu0 %v5342_v27 }
 0x100   : > { %1558 = vmatprep.subr.bf16.mxu1 %v5344_v29 }
 0x102   : > { %1446 = vmatpush1.bf16.msra.mxu0 %v5341_v52 }
 0x103   : > { %1559 = vmatpush1.bf16.msra.mxu1 %v5343_v53  ;;  %1447 = vmatprep.subr.bf16.mxu0 %v5350_v54 }
 0x104   : > { %1560 = vmatprep.subr.bf16.mxu1 %v5352_v55 }
 0x106   : > { %1448 = vmatpush1.bf16.msra.mxu0 %v5349_v13  ;;  %v1999_v13 = vld [vmem:[%s6844_s18] sm:$0xff] }
 0x107   : > { %1561 = vmatpush1.bf16.msra.mxu1 %v5351_v14  ;;  %1449 = vmatprep.subr.bf16.mxu0 %v5358_v20 }
 0x108   : > { %1562 = vmatprep.subr.bf16.mxu1 %v5360_v21  ;;  %v2001_v21 = vld [vmem:[%s6844_s18 + $0x10] sm:$0xff]  ;;  %2181 = vrot.lane.b32.xlu0 %v1999_v13, %s6518_s12 }
 0x109   : > { %2185 = vrot.lane.b32.xlu1 %v2001_v21, %s6518_s12  ;;  %v2005_v13 = vld [vmem:[%s6844_s18 + $0x30] sm:$0xff] }
 0x10a   : > { %1450 = vmatpush1.bf16.msra.mxu0 %v5357_v22 }
 0x10b   : > { %1563 = vmatpush1.bf16.msra.mxu1 %v5359_v23  ;;  %1645 = vmatprep.subr.bf16.mxu0 %v5242_v33 }
 0x10c   : > { %1758 = vmatprep.subr.bf16.mxu1 %v5244_v36 }
 0x14f   : > { %v508_v18 = vpop.xlane.xlu0 %507 }
 0x150   : > { %v555_v19 = vmul.f32 0.00390625, %v508_v18  ;;  %v514_v28 = vpop.xlane.xlu1 %513  ;;  %v2002_v18 = vld [vmem:[%s6844_s18 + $0x18] sm:$0xff] }
 0x151   : > { %v557_v24 = vmul.f32 0.00390625, %v514_v28  ;;  %2187 = vrot.lane.b32.xlu1 %v2002_v18, %s6518_s12  ;;  %v674_v18 = vld [vmem:[#allocation10 + $0xb8] sm:$0xff] }
 0x152   : > { %v571_v27 = vadd.f32 1e-06, %v555_v19 }
 0x153   : > { %v511_v29 = vpop.xlane.xlu0 %510  ;;  %v573_v41 = vadd.f32 1e-06, %v557_v24  ;;  %v2003_v24 = vld [vmem:[%s6844_s18 + $0x20] sm:$0xff] }
 0x154   : > { %v556_v42 = vmul.f32 0.00390625, %v511_v29  ;;  %v517_v45 = vpop.xlane.xlu1 %516  ;;  %5963 = vrsqrt.f32 %v571_v27  ;;  %2189 = vrot.lane.b32.xlu0 %v2003_v24, %s6518_s12 }
 0x155   : > { %v558_v49 = vmul.f32 0.00390625, %v517_v45  ;;  %5965 = vrsqrt.f32 %v573_v41  ;;  %v7021_v45 = vld [vmem:[#allocation10 + $0x70] sm:$0xff] }
 0x156   : > { %v572_v52 = vadd.f32 1e-06, %v556_v42  ;;  %v7019_v42 = vld [vmem:[#allocation10 + $0x50] sm:$0xff] }
 0x157   : > { %v574_v53 = vadd.f32 1e-06, %v558_v49  ;;  %v520_v54 = vpop.xlane.xlu0 %519  ;;  %v7023_v49 = vld [vmem:[#allocation10 + $0x58] sm:$0xff] }
 0x158   : > { %5967 = vrsqrt.f32 %v572_v52  ;;  %v523_v55 = vpop.xlane.xlu1 %522  ;;  %v559_v56 = vmul.f32 0.00390625, %v520_v54  ;;  %2193 = vrot.lane.b32.xlu0 %v2005_v13, %s6518_s12 }
 0x159   : > { %5969 = vrsqrt.f32 %v574_v53  ;;  %v560_v61 = vmul.f32 0.00390625, %v523_v55 }
 0x15a   : > { %v575_v7 = vadd.f32 1e-06, %v559_v56  ;;  %v666_v56 = vld [vmem:[#allocation10 + $0x78] sm:$0xff] }
 0x15b   : > { %v576_v14 = vadd.f32 1e-06, %v560_v61  ;;  %v526_v20 = vpop.xlane.xlu0 %525 }
 0x15c   : > { %v529_v22 = vpop.xlane.xlu1 %528  ;;  %5971 = vrsqrt.f32 %v575_v7  ;;  %v561_v23 = vmul.f32 0.00390625, %v526_v20  ;;  %v2004_v7 = vld [vmem:[%s6844_s18 + $0x28] sm:$0xff] }
 0x15d   : > { %5973 = vrsqrt.f32 %v576_v14  ;;  %v562_v33 = vmul.f32 0.00390625, %v529_v22  ;;  %2191 = vrot.lane.b32.xlu1 %v2004_v7, %s6518_s12 }
 0x15e   : > { %v5964_v36 = vpop.eup %5963  ;;  %v577_v28 = vadd.f32 1e-06, %v561_v23 }
 0x15f   : > { %v5966_v19 = vpop.eup %5965  ;;  %v604_v29 = vmul.f32 %v5964_v36, %v6855_v4  ;;  %v578_v41 = vadd.f32 1e-06, %v562_v33  ;;  %v532_v52 = vpop.xlane.xlu0 %531  ;;  %v603_v55 = vmul.f32 %v5964_v36, %v6853_v3  ;;  %v5250_v3 = vcombine.high %v7019_v42, %v7021_v45  ;;  %v673_v33 = vld [vmem:[#allocation10 + $0xb0] sm:$0xff]  ;;  %v670_v36 = vld [vmem:[#allocation10 + $0x98] sm:$0xff] }
 0x160   : > { %v608_v61 = vmul.f32 %v5966_v19, %v6864_v9  ;;  %v535_v62 = vpop.xlane.xlu1 %534  ;;  %5975 = vrsqrt.f32 %v577_v28  ;;  %v563_v22 = vmul.f32 0.00390625, %v532_v52  ;;  %v607_v24 = vmul.f32 %v5966_v19, %v6862_v8 }
 0x161   : > { %5977 = vrsqrt.f32 %v578_v41  ;;  %v564_v9 = vmul.f32 0.00390625, %v535_v62  ;;  %v5251_v41 = vcombine.low %v7023_v49, %v666_v56 }
 0x162   : > { %v5968_v27 = vpop.eup %5967  ;;  %v579_v52 = vadd.f32 1e-06, %v563_v22  ;;  %v686_v22 = vld [vmem:[#allocation10 + $0x118] sm:$0xff] }
 0x163   : > { %v5970_v53 = vpop.eup %5969  ;;  %v606_v54 = vmul.f32 %v5968_v27, %v6859_v6  ;;  %v605_v4 = vmul.f32 %v5968_v27, %v6857_v5  ;;  %v5252_v5 = vcombine.high %v7023_v49, %v666_v56  ;;  %v7041_v6 = vld [vmem:[#allocation10 + $0x90] sm:$0xff]  ;;  %v580_v19 = vadd.f32 1e-06, %v564_v9  ;;  %v538_v37 = vpop.xlane.xlu0 %537 }
 0x164   : > { %v610_v14 = vmul.f32 %v5970_v53, %v6868_v11  ;;  %v609_v27 = vmul.f32 %v5970_v53, %v6866_v10  ;;  %v5258_v8 = vcombine.high %v7041_v6, %v673_v33  ;;  %v5260_v10 = vcombine.high %v670_v36, %v674_v18 }
 0x165   : > { %v7034_v20 = vpack.c.bf16 %v606_v54, %v604_v29  ;;  %v7036_v21 = vpack.c.bf16 %v605_v4, %v603_v55  ;;  %v5249_v29 = vcombine.low %v7019_v42, %v7021_v45  ;;  %v2006_v54 = vld [vmem:[%s6844_s18 + $0x38] sm:$0xff]  ;;  %v2007_v55 = vld [vmem:[%s6844_s18 + $0x40] sm:$0xff]  ;;  %v541_v45 = vpop.xlane.xlu1 %540  ;;  %v5257_v53 = vcombine.low %v7041_v6, %v673_v33 }
 0x166   : > { %v5972_v11 = vpop.eup %5971  ;;  %v7047_v23 = vpack.c.bf16 %v610_v14, %v608_v61  ;;  %v7069_v49 = vpack.c.bf16 %v609_v27, %v607_v24  ;;  %2195 = vrot.lane.b32.xlu1 %v2006_v54, %s6518_s12  ;;  %2197 = vrot.lane.b32.xlu0 %v2007_v55, %s6518_s12  ;;  %v5259_v4 = vcombine.low %v670_v36, %v674_v18  ;;  %5979 = vrsqrt.f32 %v579_v52  ;;  %v689_v14 = vld [vmem:[#allocation10 + $0x130] sm:$0xff]  ;;  %v2008_v24 = vld [vmem:[%s6844_s18 + $0x48] sm:$0xff]  ;;  %v2009_v27 = vld [vmem:[%s6844_s18 + $0x50] sm:$0xff] }
 0x167   : > { %1451 = vmatprep.mubr.bf16.mxu0 %v7034_v20  ;;  %1564 = vmatprep.mubr.bf16.mxu1 %v7034_v20  ;;  %v5974_v28 = vpop.eup %5973  ;;  %v565_v56 = vmul.f32 0.00390625, %v538_v37  ;;  %5981 = vrsqrt.f32 %v580_v19  ;;  %v566_v62 = vmul.f32 0.00390625, %v541_v45  ;;  %v611_v6 = vmul.f32 %v5972_v11, %v6894_v30  ;;  %v693_v54 = vld [vmem:[#allocation10 + $0x150] sm:$0xff]  ;;  %v544_v55 = vpop.xlane.xlu0 %543 }
 0x168   : > { %1452 = vmatmul.mubr.bf16.vlgmr.msra.gmra.mrb[0].mxu0 %v7036_v21  ;;  %1565 = vmatmul.mubr.bf16.vlgmr.msra.gmra.mrb[0].mxu1 %v7036_v21  ;;  %v614_v42 = vmul.f32 %v5974_v28, %v6891_v26  ;;  %v685_v26 = vld [vmem:[#allocation10 + $0x110] sm:$0xff]  ;;  %v613_v9 = vmul.f32 %v5974_v28, %v6889_v25  ;;  %v5265_v33 = vcombine.low %v677_v32, %v681_v40  ;;  %v694_v25 = vld [vmem:[#allocation10 + $0x158] sm:$0xff] }
 0x169   : > { %1646 = vmatpush1.bf16.msra.mxu0 %v5241_v44  ;;  %1759 = vmatpush1.bf16.msra.mxu1 %v5243_v46  ;;  %v682_v44 = vld [vmem:[#allocation10 + $0xf8] sm:$0xff]  ;;  %v612_v46 = vmul.f32 %v5972_v11, %v6896_v31  ;;  %v5266_v31 = vcombine.high %v677_v32, %v681_v40  ;;  %v581_v18 = vadd.f32 1e-06, %v565_v56  ;;  %v582_v52 = vadd.f32 1e-06, %v566_v62  ;;  %v697_v30 = vld [vmem:[#allocation10 + $0x170] sm:$0xff] }
 0x16a   : > { %1647 = vmatprep.subr.bf16.mxu0 %v5250_v3  ;;  %1760 = vmatprep.subr.bf16.mxu1 %v5252_v5  ;;  %v5268_v61 = vcombine.high %v678_v43, %v682_v44  ;;  %v5976_v7 = vpop.eup %5975  ;;  %v690_v3 = vld [vmem:[#allocation10 + $0x138] sm:$0xff]  ;;  %v5267_v36 = vcombine.low %v678_v43, %v682_v44  ;;  %v7086_v19 = vpack.c.bf16 %v613_v9, %v611_v6  ;;  %v567_v40 = vmul.f32 0.00390625, %v544_v55  ;;  %v701_v44 = vld [vmem:[#allocation10 + $0x190] sm:$0xff] }
 0x16b   : > { %1461 = vmatprep.mubr.bf16.mxu0 %v7047_v23  ;;  %1574 = vmatprep.mubr.bf16.mxu1 %v7047_v23  ;;  %v7074_v13 = vpack.c.bf16 %v614_v42, %v612_v46  ;;  %v5978_v5 = vpop.eup %5977  ;;  %v698_v11 = vld [vmem:[#allocation10 + $0x178] sm:$0xff]  ;;  %v616_v28 = vmul.f32 %v5976_v7, %v6912_v39  ;;  %v5273_v32 = vcombine.low %v685_v26, %v689_v14  ;;  %5983 = vrsqrt.f32 %v581_v18  ;;  %v705_v45 = vld [vmem:[#allocation10 + $0x1b0] sm:$0xff]  ;;  %v550_v18 = vpop.xlane.xlu0 %549 }
 0x16c   : > { %2199 = vrot.lane.b32.xlu1 %v2008_v24, %s6518_s12  ;;  %2201 = vrot.lane.b32.xlu0 %v2009_v27, %s6518_s12  ;;  %v5275_v37 = vcombine.low %v686_v22, %v690_v3  ;;  %5985 = vrsqrt.f32 %v582_v52  ;;  %v5282_v43 = vcombine.high %v693_v54, %v697_v30  ;;  %v5284_v39 = vcombine.high %v694_v25, %v698_v11 }
 0x16d   : > { %1648 = vmatpush1.bf16.msra.mxu0 %v5249_v29  ;;  %1761 = vmatpush1.bf16.msra.mxu1 %v5251_v41  ;;  %v5274_v29 = vcombine.high %v685_v26, %v689_v14  ;;  %v5276_v41 = vcombine.high %v686_v22, %v690_v3  ;;  %v5281_v26 = vcombine.low %v693_v54, %v697_v30  ;;  %v583_v14 = vadd.f32 1e-06, %v567_v40  ;;  %v2010_v22 = vld [vmem:[%s6844_s18 + $0x58] sm:$0xff]  ;;  %v2011_v3 = vld [vmem:[%s6844_s18 + $0x60] sm:$0xff] }
 0x16e   : > { %1649 = vmatprep.subr.bf16.mxu0 %v5258_v8  ;;  %1762 = vmatprep.subr.bf16.mxu1 %v5260_v10  ;;  %v618_v8 = vmul.f32 %v5978_v5, %v6904_v35  ;;  %v547_v10 = vpop.xlane.xlu1 %546  ;;  %v5283_v62 = vcombine.low %v694_v25, %v698_v11  ;;  %v5290_v6 = vcombine.high %v701_v44, %v705_v45  ;;  %v569_v54 = vmul.f32 0.00390625, %v550_v18  ;;  %v717_v30 = vld [vmem:[#allocation10 + $0x210] sm:$0xff]  ;;  %v738_v18 = vld [vmem:[#allocation10 + $0x2b8] sm:$0xff] }
 0x16f   : > { %v568_v35 = vmul.f32 0.00390625, %v547_v10  ;;  %5987 = vrsqrt.f32 %v583_v14  ;;  %v722_v10 = vld [vmem:[#allocation10 + $0x238] sm:$0xff] }
 0x170   : > { %1462 = vmatmul.mubr.bf16.gmra.mrb[4].mxu0 %v7069_v49  ;;  %1575 = vmatmul.mubr.bf16.gmra.mrb[4].mxu1 %v7069_v49  ;;  %v5980_v46 = vpop.eup %5979  ;;  %v7090_v42 = vpack.c.bf16 %v618_v8, %v616_v28  ;;  %v721_v28 = vld [vmem:[#allocation10 + $0x230] sm:$0xff]  ;;  %v718_v8 = vld [vmem:[#allocation10 + $0x218] sm:$0xff] }
 0x171   : > { %1650 = vmatpush1.bf16.msra.mxu0 %v5257_v53  ;;  %1763 = vmatpush1.bf16.msra.mxu1 %v5259_v4  ;;  %v702_v53 = vld [vmem:[#allocation10 + $0x198] sm:$0xff]  ;;  %v5982_v56 = vpop.eup %5981  ;;  %v5305_v14 = vcombine.low %v717_v30, %v721_v28 }
 0x172   : > { %1651 = vmatprep.subr.bf16.mxu0 %v5266_v31  ;;  %1764 = vmatprep.subr.bf16.mxu1 %v5268_v61  ;;  %v706_v4 = vld [vmem:[#allocation10 + $0x1b8] sm:$0xff]  ;;  %v615_v31 = vmul.f32 %v5976_v7, %v6910_v38  ;;  %v617_v61 = vmul.f32 %v5978_v5, %v6902_v34  ;;  %v713_v38 = vld [vmem:[#allocation10 + $0x1f0] sm:$0xff]  ;;  %v620_v5 = vmul.f32 %v5980_v46, %v6926_v48  ;;  %v553_v27 = vpop.xlane.xlu1 %552 }
 0x173   : > { %1471 = vmatprep.mubr.bf16.mxu0 %v7074_v13  ;;  %1584 = vmatprep.mubr.bf16.mxu1 %v7074_v13  ;;  %v5292_v9 = vcombine.high %v702_v53, %v706_v4  ;;  %v710_v34 = vld [vmem:[#allocation10 + $0x1d8] sm:$0xff]  ;;  %v622_v24 = vmul.f32 %v5982_v56, %v6930_v51  ;;  %v5291_v52 = vcombine.low %v702_v53, %v706_v4  ;;  %v570_v51 = vmul.f32 0.00390625, %v553_v27  ;;  %v2014_v27 = vld [vmem:[%s6844_s18 + $0x78] sm:$0xff] }
 0x174   : > { %v714_v7 = vld [vmem:[#allocation10 + $0x1f8] sm:$0xff]  ;;  %2203 = vrot.lane.b32.xlu1 %v2010_v22, %s6518_s12  ;;  %2205 = vrot.lane.b32.xlu0 %v2011_v3, %s6518_s12  ;;  %v621_v40 = vmul.f32 %v5982_v56, %v6928_v50  ;;  %v5306_v53 = vcombine.high %v717_v30, %v721_v28  ;;  %v5308_v4 = vcombine.high %v718_v8, %v722_v10 }
 0x175   : > { %1652 = vmatpush1.bf16.msra.mxu0 %v5265_v33  ;;  %1765 = vmatpush1.bf16.msra.mxu1 %v5267_v36  ;;  %v584_v33 = vadd.f32 1e-06, %v568_v35  ;;  %v709_v36 = vld [vmem:[#allocation10 + $0x1d0] sm:$0xff]  ;;  %v5300_v48 = vcombine.high %v710_v34, %v714_v7  ;;  %v5984_v25 = vpop.eup %5983  ;;  %v7106_v11 = vpack.c.bf16 %v622_v24, %v620_v5  ;;  %v2012_v35 = vld [vmem:[%s6844_s18 + $0x68] sm:$0xff]  ;;  %v730_v50 = vld [vmem:[#allocation10 + $0x278] sm:$0xff]  ;;  %v5307_v22 = vcombine.low %v718_v8, %v722_v10 }
 0x176   : > { %1653 = vmatprep.subr.bf16.mxu0 %v5274_v29  ;;  %1766 = vmatprep.subr.bf16.mxu1 %v5276_v41  ;;  %v7102_v29 = vpack.c.bf16 %v617_v61, %v615_v31  ;;  %v5289_v41 = vcombine.low %v701_v44, %v705_v45  ;;  %v5298_v55 = vcombine.high %v709_v36, %v713_v38  ;;  %v585_v44 = vadd.f32 1e-06, %v569_v54  ;;  %v2013_v45 = vld [vmem:[%s6844_s18 + $0x70] sm:$0xff]  ;;  %v725_v61 = vld [vmem:[#allocation10 + $0x250] sm:$0xff]  ;;  %v742_v30 = vld [vmem:[#allocation10 + $0x2d8] sm:$0xff] }
 0x177   : > { %5989 = vrsqrt.f32 %v584_v33  ;;  %v586_v31 = vadd.f32 1e-06, %v570_v51  ;;  %v624_v56 = vmul.f32 %v5984_v25, %v6941_v60  ;;  %v733_v60 = vld [vmem:[#allocation10 + $0x290] sm:$0xff] }
 0x178   : > { %1472 = vmatmul.mubr.bf16.gmra.mrb[8].mxu0 %v7086_v19  ;;  %1585 = vmatmul.mubr.bf16.gmra.mrb[8].mxu1 %v7086_v19  ;;  %5991 = vrsqrt.f32 %v585_v44  ;;  %v737_v33 = vld [vmem:[#allocation10 + $0x2b0] sm:$0xff] }
 0x179   : > { %1654 = vmatpush1.bf16.msra.mxu0 %v5273_v32  ;;  %1767 = vmatpush1.bf16.msra.mxu1 %v5275_v37  ;;  %v5986_v32 = vpop.eup %5985  ;;  %v619_v37 = vmul.f32 %v5980_v46, %v6924_v47  ;;  %v729_v47 = vld [vmem:[#allocation10 + $0x270] sm:$0xff]  ;;  %v726_v46 = vld [vmem:[#allocation10 + $0x258] sm:$0xff]  ;;  %5993 = vrsqrt.f32 %v586_v31  ;;  %v5321_v28 = vcombine.low %v733_v60, %v737_v33  ;;  %v1984_v31 = vld [vmem:[%s6837_s23 + $0x8] sm:$0xff] }
 0x17a   : > { %1655 = vmatprep.subr.bf16.mxu0 %v5282_v43  ;;  %1768 = vmatprep.subr.bf16.mxu1 %v5284_v39  ;;  %v5297_v43 = vcombine.low %v709_v36, %v713_v38  ;;  %v5299_v39 = vcombine.low %v710_v34, %v714_v7  ;;  %v5314_v3 = vcombine.high %v725_v61, %v729_v47  ;;  %v734_v36 = vld [vmem:[#allocation10 + $0x298] sm:$0xff] }
 0x17b   : > { %1481 = vmatprep.mubr.bf16.mxu0 %v7090_v42  ;;  %1594 = vmatprep.mubr.bf16.mxu1 %v7090_v42  ;;  %v623_v34 = vmul.f32 %v5984_v25, %v6939_v59  ;;  %v625_v7 = vmul.f32 %v5986_v32, %v6948_v0  ;;  %v5313_v5 = vcombine.low %v725_v61, %v729_v47  ;;  %v746_v59 = vld [vmem:[#allocation10 + $0x2f8] sm:$0xff]  ;;  %v1985_v61 = vld [vmem:[%s6837_s23 + $0x10] sm:$0xff] }
 0x17c   : > { %2207 = vrot.lane.b32.xlu1 %v2012_v35, %s6518_s12  ;;  %2209 = vrot.lane.b32.xlu0 %v2013_v45, %s6518_s12  ;;  %v5315_v24 = vcombine.low %v726_v46, %v730_v50  ;;  %v5324_v54 = vcombine.high %v734_v36, %v738_v18  ;;  %v5323_v8 = vcombine.low %v734_v36, %v738_v18  ;;  %v766_v36 = vld [vmem:[#allocation10 + $0x398] sm:$0xff] }
 0x17d   : > { %1656 = vmatpush1.bf16.msra.mxu0 %v5281_v26  ;;  %1769 = vmatpush1.bf16.msra.mxu1 %v5283_v62  ;;  %v626_v26 = vmul.f32 %v5986_v32, %v6950_v1  ;;  %v7118_v62 = vpack.c.bf16 %v621_v40, %v619_v37  ;;  %v5988_v1 = vpop.eup %5987  ;;  %v7134_v25 = vpack.c.bf16 %v625_v7, %v623_v34  ;;  %v749_v37 = vld [vmem:[#allocation10 + $0x310] sm:$0xff]  ;;  %v770_v18 = vld [vmem:[#allocation10 + $0x3b8] sm:$0xff] }
 0x17e   : > { %1657 = vmatprep.subr.bf16.mxu0 %v5290_v6  ;;  %1770 = vmatprep.subr.bf16.mxu1 %v5292_v9  ;;  %v5316_v6 = vcombine.high %v726_v46, %v730_v50  ;;  %v628_v0 = vmul.f32 %v5988_v1, %v6958_v17  ;;  %v5332_v32 = vcombine.high %v742_v30, %v746_v59  ;;  %v757_v50 = vld [vmem:[#allocation10 + $0x350] sm:$0xff] }
 0x17f   : > { %v7122_v9 = vpack.c.bf16 %v626_v26, %v624_v56  ;;  %v627_v35 = vmul.f32 %v5988_v1, %v6956_v16  ;;  %v761_v56 = vld [vmem:[#allocation10 + $0x370] sm:$0xff]  ;;  %v758_v26 = vld [vmem:[#allocation10 + $0x358] sm:$0xff] }
 0x180   : > { %1482 = vmatmul.mubr.bf16.gmra.mrb[12].mxu0 %v7102_v29  ;;  %1595 = vmatmul.mubr.bf16.gmra.mrb[12].mxu1 %v7102_v29  ;;  %v762_v16 = vld [vmem:[#allocation10 + $0x378] sm:$0xff]  ;;  %v5345_v7 = vcombine.low %v757_v50, %v761_v56 }
 0x181   : > { %1658 = vmatpush1.bf16.msra.mxu0 %v5289_v41  ;;  %1771 = vmatpush1.bf16.msra.mxu1 %v5291_v52  ;;  %v5990_v38 = vpop.eup %5989  ;;  %v1983_v41 = vld [vmem:[%s6837_s23] sm:$0xff]  ;;  %v5322_v52 = vcombine.high %v733_v60, %v737_v33  ;;  %v5346_v60 = vcombine.high %v757_v50, %v761_v56  ;;  %v5348_v1 = vcombine.high %v758_v26, %v762_v16  ;;  %v765_v33 = vld [vmem:[#allocation10 + $0x390] sm:$0xff] }
 0x182   : > { %1659 = vmatprep.subr.bf16.mxu0 %v5298_v55  ;;  %1772 = vmatprep.subr.bf16.mxu1 %v5300_v48  ;;  %v741_v55 = vld [vmem:[#allocation10 + $0x2d0] sm:$0xff]  ;;  %v630_v51 = vmul.f32 %v5990_v38, %v6954_v15  ;;  %v5992_v17 = vpop.eup %5991  ;;  %v629_v45 = vmul.f32 %v5990_v38, %v6952_v12 }
 0x183   : > { %1491 = vmatprep.mubr.bf16.mxu0 %v7106_v11  ;;  %1604 = vmatprep.mubr.bf16.mxu1 %v7106_v11  ;;  %v745_v48 = vld [vmem:[#allocation10 + $0x2f0] sm:$0xff]  ;;  %v5994_v44 = vpop.eup %5993  ;;  %v632_v12 = vmul.f32 %v5992_v17, %v6980_v58  ;;  %v631_v38 = vmul.f32 %v5992_v17, %v6978_v57  ;;  %v1991_v17 = vld [vmem:[%s6837_s23 + $0x40] sm:$0xff] }
 0x184   : > { %2211 = vrot.lane.b32.xlu1 %v2014_v27, %s6518_s12  ;;  %2341 = vrot.lane.b32.xlu0 %v1983_v41, %s6518_s12  ;;  %v5330_v10 = vcombine.high %v741_v55, %v745_v48  ;;  %v7138_v40 = vpack.c.bf16 %v630_v51, %v628_v0  ;;  %v753_v15 = vld [vmem:[#allocation10 + $0x330] sm:$0xff]  ;;  %v633_v34 = vmul.f32 %v5994_v44, %v6982_v63  ;;  %v1987_v27 = vld [vmem:[%s6837_s23 + $0x20] sm:$0xff] }
 0x185   : > { %1660 = vmatpush1.bf16.msra.mxu0 %v5297_v43  ;;  %1773 = vmatpush1.bf16.msra.mxu1 %v5299_v39  ;;  %v750_v43 = vld [vmem:[#allocation10 + $0x318] sm:$0xff]  ;;  %v5338_v47 = vcombine.high %v749_v37, %v753_v15  ;;  %v777_v57 = vld [vmem:[#allocation10 + $0x3f0] sm:$0xff] }
 0x186   : > { %1661 = vmatprep.subr.bf16.mxu0 %v5306_v53  ;;  %1774 = vmatprep.subr.bf16.mxu1 %v5308_v4  ;;  %v754_v39 = vld [vmem:[#allocation10 + $0x338] sm:$0xff]  ;;  %v5329_v53 = vcombine.low %v741_v55, %v745_v48  ;;  %v5331_v4 = vcombine.low %v742_v30, %v746_v59  ;;  %v7164_v55 = vpack.c.bf16 %v633_v34, %v631_v38 }
 0x187   : > { %v5340_v46 = vcombine.high %v750_v43, %v754_v39  ;;  %v774_v48 = vld [vmem:[#allocation10 + $0x3d8] sm:$0xff]  ;;  %v5355_v59 = vcombine.low %v766_v36, %v770_v18 }
 0x188   : > { %1492 = vmatmul.mubr.bf16.gmra.mrb[16].mxu0 %v7118_v62  ;;  %1605 = vmatmul.mubr.bf16.gmra.mrb[16].mxu1 %v7118_v62  ;;  %v778_v63 = vld [vmem:[#allocation10 + $0x3f8] sm:$0xff] }
 0x189   : > { %1662 = vmatpush1.bf16.msra.mxu0 %v5305_v14  ;;  %1775 = vmatpush1.bf16.msra.mxu1 %v5307_v22  ;;  %v634_v14 = vmul.f32 %v5994_v44, %v6984_v2  ;;  %v7150_v22 = vpack.c.bf16 %v629_v45, %v627_v35  ;;  %v769_v2 = vld [vmem:[#allocation10 + $0x3b0] sm:$0xff]  ;;  %v5364_v51 = vcombine.high %v774_v48, %v778_v63 }
 0x18a   : > { %1663 = vmatprep.subr.bf16.mxu0 %v5314_v3  ;;  %1776 = vmatprep.subr.bf16.mxu1 %v5316_v6  ;;  %v5337_v3 = vcombine.low %v749_v37, %v753_v15  ;;  %v5339_v6 = vcombine.low %v750_v43, %v754_v39  ;;  %v5354_v41 = vcombine.high %v765_v33, %v769_v2  ;;  %v1990_v37 = vld [vmem:[%s6837_s23 + $0x38] sm:$0xff]  ;;  %v1993_v15 = vld [vmem:[%s6837_s23 + $0x50] sm:$0xff]  ;;  %v1995_v39 = vld [vmem:[%s6837_s23 + $0x60] sm:$0xff] }
 0x18b   : > { %1501 = vmatprep.mubr.bf16.mxu0 %v7122_v9  ;;  %1614 = vmatprep.mubr.bf16.mxu1 %v7122_v9  ;;  %v7154_v58 = vpack.c.bf16 %v634_v14, %v632_v12  ;;  %v5353_v30 = vcombine.low %v765_v33, %v769_v2  ;;  %v1994_v43 = vld [vmem:[%s6837_s23 + $0x58] sm:$0xff] }
 0x18c   : > { %2343 = vrot.lane.b32.xlu1 %v1984_v31, %s6518_s12  ;;  %2345 = vrot.lane.b32.xlu0 %v1985_v61, %s6518_s12  ;;  %v1998_v44 = vld [vmem:[%s6837_s23 + $0x78] sm:$0xff] }
 0x18d   : > { %1664 = vmatpush1.bf16.msra.mxu0 %v5313_v5  ;;  %1777 = vmatpush1.bf16.msra.mxu1 %v5315_v24  ;;  %v5347_v5 = vcombine.low %v758_v26, %v762_v16  ;;  %v1986_v24 = vld [vmem:[%s6837_s23 + $0x18] sm:$0xff] }
 0x18e   : > { %1665 = vmatprep.subr.bf16.mxu0 %v5322_v52  ;;  %1778 = vmatprep.subr.bf16.mxu1 %v5324_v54  ;;  %v5356_v52 = vcombine.high %v766_v36, %v770_v18  ;;  %v773_v54 = vld [vmem:[#allocation10 + $0x3d0] sm:$0xff] }
 0x18f   : > { %v5362_v0 = vcombine.high %v773_v54, %v777_v57 }
 0x190   : > { %1502 = vmatmul.mubr.bf16.gmra.mrb[20].mxu0 %v7134_v25  ;;  %1615 = vmatmul.mubr.bf16.gmra.mrb[20].mxu1 %v7134_v25 }
 0x191   : > { %1666 = vmatpush1.bf16.msra.mxu0 %v5321_v28  ;;  %1779 = vmatpush1.bf16.msra.mxu1 %v5323_v8  ;;  %v5361_v28 = vcombine.low %v773_v54, %v777_v57  ;;  %v1988_v8 = vld [vmem:[%s6837_s23 + $0x28] sm:$0xff] }
 0x192   : > { %1667 = vmatprep.subr.bf16.mxu0 %v5330_v10  ;;  %1780 = vmatprep.subr.bf16.mxu1 %v5332_v32  ;;  %v1989_v10 = vld [vmem:[%s6837_s23 + $0x30] sm:$0xff]  ;;  %v5363_v32 = vcombine.low %v774_v48, %v778_v63 }
 0x193   : > { %1511 = vmatprep.mubr.bf16.mxu0 %v7138_v40  ;;  %1624 = vmatprep.mubr.bf16.mxu1 %v7138_v40 }
 0x194   : > { %2347 = vrot.lane.b32.xlu1 %v1986_v24, %s6518_s12  ;;  %2349 = vrot.lane.b32.xlu0 %v1987_v27, %s6518_s12 }
 0x195   : > { %1668 = vmatpush1.bf16.msra.mxu0 %v5329_v53  ;;  %1781 = vmatpush1.bf16.msra.mxu1 %v5331_v4 }
 0x196   : > { %1669 = vmatprep.subr.bf16.mxu0 %v5338_v47  ;;  %1782 = vmatprep.subr.bf16.mxu1 %v5340_v46 }
 0x198   : > { %1512 = vmatmul.mubr.bf16.gmra.mrb[24].mxu0 %v7150_v22  ;;  %1625 = vmatmul.mubr.bf16.gmra.mrb[24].mxu1 %v7150_v22 }
 0x199   : > { %1670 = vmatpush1.bf16.msra.mxu0 %v5337_v3  ;;  %1783 = vmatpush1.bf16.msra.mxu1 %v5339_v6 }
 0x19a   : > { %1671 = vmatprep.subr.bf16.mxu0 %v5346_v60  ;;  %1784 = vmatprep.subr.bf16.mxu1 %v5348_v1 }
 0x19b   : > { %1521 = vmatprep.mubr.bf16.mxu0 %v7154_v58  ;;  %1634 = vmatprep.mubr.bf16.mxu1 %v7154_v58 }
 0x19c   : > { %2351 = vrot.lane.b32.xlu1 %v1988_v8, %s6518_s12  ;;  %2353 = vrot.lane.b32.xlu0 %v1989_v10, %s6518_s12 }
 0x19d   : > { %1672 = vmatpush1.bf16.msra.mxu0 %v5345_v7  ;;  %1785 = vmatpush1.bf16.msra.mxu1 %v5347_v5  ;;  %v7296_v7 = vpop.permute.xlu1 %2183 }
 0x19e   : > { %1673 = vmatprep.subr.bf16.mxu0 %v5354_v41  ;;  %1786 = vmatprep.subr.bf16.mxu1 %v5356_v52  ;;  %10208 = vst [vmem:[#allocation35_spill] sm:$0xff] %v7296_v7 }
 0x1a0   : > { %1522 = vmatmul.mubr.bf16.gmra.mrb[28].mxu0 %v7164_v55  ;;  %1635 = vmatmul.mubr.bf16.gmra.mrb[28].mxu1 %v7164_v55 }
 0x1a1   : > { %1674 = vmatpush1.bf16.msra.mxu0 %v5353_v30  ;;  %1677 = vmatprep.mubr.bf16.mxu0 %v7034_v20 }
 0x1a2   : > { %1787 = vmatpush1.bf16.msra.mxu1 %v5355_v59  ;;  %1790 = vmatprep.mubr.bf16.mxu1 %v7034_v20  ;;  %v1992_v20 = vld [vmem:[%s6837_s23 + $0x48] sm:$0xff] }
 0x1a3   : > { %1675 = vmatprep.subr.bf16.mxu0 %v5362_v0  ;;  %1788 = vmatprep.subr.bf16.mxu1 %v5364_v51  ;;  %v7322_v0 = vpop.permute.xlu1 %2185  ;;  %v7324_v51 = vpop.permute.xlu0 %2181 }
 0x1a4   : > { %2355 = vrot.lane.b32.xlu1 %v1990_v37, %s6518_s12  ;;  %2357 = vrot.lane.b32.xlu0 %v1991_v17, %s6518_s12  ;;  %10215 = vst [vmem:[#allocation42_spill] sm:$0xff] %v7322_v0  ;;  %10216 = vst [vmem:[#allocation43_spill] sm:$0xff] %v7324_v51 }
 0x1a5   : > { %1676 = vmatpush1.bf16.msra.mxu0 %v5361_v28 }
 0x1a6   : > { %1789 = vmatpush1.bf16.msra.mxu1 %v5363_v32 }
 0x1a8   : > { %1678 = vmatmul.mubr.bf16.vlgmr.msra.gmra.mrb[32].mxu0 %v7036_v21  ;;  %2359 = vrot.lane.b32.xlu1 %v1992_v20, %s6518_s12 }
 0x1a9   : > { %1791 = vmatmul.mubr.bf16.vlgmr.msra.gmra.mrb[32].mxu1 %v7036_v21  ;;  %1687 = vmatprep.mubr.bf16.mxu0 %v7047_v23  ;;  %v1996_v21 = vld [vmem:[%s6837_s23 + $0x68] sm:$0xff] }
 0x1aa   : > { %1800 = vmatprep.mubr.bf16.mxu1 %v7047_v23  ;;  %2361 = vrot.lane.b32.xlu0 %v1993_v15, %s6518_s12  ;;  %v1997_v23 = vld [vmem:[%s6837_s23 + $0x70] sm:$0xff] }
 0x1ac   : > { %2363 = vrot.lane.b32.xlu1 %v1994_v43, %s6518_s12 }
 0x1ae   : > { %2365 = vrot.lane.b32.xlu0 %v1995_v39, %s6518_s12 }
 0x1b0   : > { %1688 = vmatmul.mubr.bf16.gmra.mrb[36].mxu0 %v7069_v49  ;;  %2367 = vrot.lane.b32.xlu1 %v1996_v21, %s6518_s12 }
 0x1b1   : > { %1801 = vmatmul.mubr.bf16.gmra.mrb[36].mxu1 %v7069_v49  ;;  %1697 = vmatprep.mubr.bf16.mxu0 %v7074_v13 }
 0x1b2   : > { %1810 = vmatprep.mubr.bf16.mxu1 %v7074_v13  ;;  %2369 = vrot.lane.b32.xlu0 %v1997_v23, %s6518_s12 }
 0x1b4   : > { %2371 = vrot.lane.b32.xlu1 %v1998_v44, %s6518_s12 }
 0x1b8   : > { %1698 = vmatmul.mubr.bf16.gmra.mrb[40].mxu0 %v7086_v19 }
 0x1b9   : > { %1811 = vmatmul.mubr.bf16.gmra.mrb[40].mxu1 %v7086_v19  ;;  %1707 = vmatprep.mubr.bf16.mxu0 %v7090_v42 }
 0x1ba   : > { %1820 = vmatprep.mubr.bf16.mxu1 %v7090_v42 }
 0x1c0   : > { %1708 = vmatmul.mubr.bf16.gmra.mrb[44].mxu0 %v7102_v29 }
 0x1c1   : > { %1821 = vmatmul.mubr.bf16.gmra.mrb[44].mxu1 %v7102_v29  ;;  %1717 = vmatprep.mubr.bf16.mxu0 %v7106_v11 }
 0x1c2   : > { %1830 = vmatprep.mubr.bf16.mxu1 %v7106_v11 }
 0x1c3   : > { %v7350_v44 = vpop.permute.xlu1 %2187 }
 0x1c4   : > { %10220 = vst [vmem:[#allocation47_spill] sm:$0xff] %v7350_v44 }
 0x1c8   : > { %1718 = vmatmul.mubr.bf16.gmra.mrb[48].mxu0 %v7118_v62 }
 0x1c9   : > { %1831 = vmatmul.mubr.bf16.gmra.mrb[48].mxu1 %v7118_v62  ;;  %1727 = vmatprep.mubr.bf16.mxu0 %v7122_v9 }
 0x1ca   : > { %1840 = vmatprep.mubr.bf16.mxu1 %v7122_v9 }
 0x1d0   : > { %1728 = vmatmul.mubr.bf16.gmra.mrb[52].mxu0 %v7134_v25 }
 0x1d1   : > { %1841 = vmatmul.mubr.bf16.gmra.mrb[52].mxu1 %v7134_v25  ;;  %1737 = vmatprep.mubr.bf16.mxu0 %v7138_v40 }
 0x1d2   : > { %1850 = vmatprep.mubr.bf16.mxu1 %v7138_v40 }
 0x1d8   : > { %1738 = vmatmul.mubr.bf16.gmra.mrb[56].mxu0 %v7150_v22 }
 0x1d9   : > { %1851 = vmatmul.mubr.bf16.gmra.mrb[56].mxu1 %v7150_v22  ;;  %1747 = vmatprep.mubr.bf16.mxu0 %v7154_v58 }
 0x1da   : > { %1860 = vmatprep.mubr.bf16.mxu1 %v7154_v58 }
 0x1e0   : > { %1748 = vmatmul.mubr.bf16.gmra.mrb[60].mxu0 %v7164_v55 }
 0x1e1   : > { %1861 = vmatmul.mubr.bf16.gmra.mrb[60].mxu1 %v7164_v55 }
 0x23b   : > { %v7224_v49 = vpop.f32.mrb[0].mxu0  ;;  %v7226_v13 = vpop.f32.mrb[0].mxu1 }
 0x23c   : > { %v7228_v19 = vpop.f32.mrb[1].mxu0  ;;  %v7230_v42 = vpop.f32.mrb[1].mxu1  ;;  %v2016_v29 = vmul.f32 %v7224_v49, %v7224_v49  ;;  %v3085_v35 = vmul.f32 %v7226_v13, %v7226_v13 }
 0x23d   : > { %v7234_v11 = vpop.f32.mrb[2].mxu0  ;;  %v7236_v62 = vpop.f32.mrb[2].mxu1  ;;  %v2615_v31 = vmul.f32 %v7228_v19, %v7228_v19  ;;  %v3555_v12 = vmul.f32 %v7230_v42, %v7230_v42 }
 0x23e   : > { %v7238_v9 = vpop.f32.mrb[3].mxu1  ;;  %2032 = vadd.xlane.f32.xlu0 %v2016_v29  ;;  %v7240_v25 = vpop.f32.mrb[3].mxu0  ;;  %v2017_v40 = vmul.f32 %v7234_v11, %v7234_v11  ;;  %v3086_v45 = vmul.f32 %v7236_v62, %v7236_v62 }
 0x23f   : > { %v2616_v56 = vmul.f32 %v7240_v25, %v7240_v25  ;;  %v3556_v14 = vmul.f32 %v7238_v9, %v7238_v9  ;;  %v7352_v29 = vpop.permute.xlu0 %2189 }
 0x240   : > { %2034 = vadd.xlane.f32.xlu1 %v2017_v40  ;;  %10221 = vst [vmem:[#allocation48_spill] sm:$0xff] %v7352_v29 }
 0x242   : > { %3101 = vadd.xlane.f32.xlu0 %v3085_v35 }
 0x243   : > { %v7248_v53 = vpop.f32.mrb[4].mxu0  ;;  %v7250_v4 = vpop.f32.mrb[4].mxu1 }
 0x244   : > { %3103 = vadd.xlane.f32.xlu1 %v3086_v45  ;;  %v7254_v61 = vpop.f32.mrb[5].mxu0  ;;  %v7256_v47 = vpop.f32.mrb[5].mxu1  ;;  %v2018_v22 = vmul.f32 %v7248_v53, %v7248_v53  ;;  %v3087_v36 = vmul.f32 %v7250_v4, %v7250_v4 }
 0x245   : > { %v7258_v46 = vpop.f32.mrb[6].mxu0  ;;  %v7260_v50 = vpop.f32.mrb[6].mxu1  ;;  %v2617_v5 = vmul.f32 %v7254_v61, %v7254_v61  ;;  %v3557_v30 = vmul.f32 %v7256_v47, %v7256_v47 }
 0x246   : > { %2631 = vadd.xlane.f32.xlu0 %v2615_v31  ;;  %v7264_v26 = vpop.f32.mrb[7].mxu0  ;;  %v7266_v16 = vpop.f32.mrb[7].mxu1  ;;  %v2019_v60 = vmul.f32 %v7258_v46, %v7258_v46  ;;  %v3088_v10 = vmul.f32 %v7260_v50, %v7260_v50 }
 0x247   : > { %10200 = vst [vmem:[#allocation27_spill] sm:$0xff] %v7264_v26  ;;  %10201 = vst [vmem:[#allocation28_spill] sm:$0xff] %v7266_v16  ;;  %v2618_v21 = vmul.f32 %v7264_v26, %v7264_v26  ;;  %v3558_v45 = vmul.f32 %v7266_v16, %v7266_v16 }
 0x248   : > { %2633 = vadd.xlane.f32.xlu1 %v2616_v56 }
 0x24a   : > { %3571 = vadd.xlane.f32.xlu0 %v3555_v12 }
 0x24b   : > { %v7274_v3 = vpop.f32.mrb[8].mxu0  ;;  %v7276_v6 = vpop.f32.mrb[8].mxu1 }
 0x24c   : > { %3573 = vadd.xlane.f32.xlu1 %v3556_v14  ;;  %v7280_v1 = vpop.f32.mrb[9].mxu0  ;;  %v7282_v33 = vpop.f32.mrb[9].mxu1 }
 0x24d   : > { %10202 = vst [vmem:[#allocation29_spill] sm:$0xff] %v7280_v1  ;;  %10203 = vst [vmem:[#allocation30_spill] sm:$0xff] %v7282_v33  ;;  %v7284_v58 = vpop.f32.mrb[10].mxu0  ;;  %v7286_v2 = vpop.f32.mrb[10].mxu1 }
 0x24e   : > { %10204 = vst [vmem:[#allocation31_spill] sm:$0xff] %v7284_v58  ;;  %10205 = vst [vmem:[#allocation32_spill] sm:$0xff] %v7286_v2  ;;  %2036 = vadd.xlane.f32.xlu0 %v2018_v22  ;;  %v7290_v18 = vpop.f32.mrb[11].mxu0  ;;  %v7292_v38 = vpop.f32.mrb[11].mxu1  ;;  %v2021_v34 = vmul.f32 %v7284_v58, %v7284_v58  ;;  %v3090_v41 = vmul.f32 %v7286_v2, %v7286_v2 }
 0x24f   : > { %10206 = vst [vmem:[#allocation33_spill] sm:$0xff] %v7290_v18  ;;  %10207 = vst [vmem:[#allocation34_spill] sm:$0xff] %v7292_v38  ;;  %v2620_v59 = vmul.f32 %v7290_v18, %v7290_v18  ;;  %v3560_v32 = vmul.f32 %v7292_v38, %v7292_v38 }
 0x250   : > { %2038 = vadd.xlane.f32.xlu1 %v2019_v60  ;;  %v2020_v60 = vmul.f32 %v7274_v3, %v7274_v3 }
 0x252   : > { %3105 = vadd.xlane.f32.xlu0 %v3087_v36 }
 0x253   : > { %v7300_v24 = vpop.f32.mrb[12].mxu0  ;;  %v7302_v27 = vpop.f32.mrb[12].mxu1 }
 0x254   : > { %10209 = vst [vmem:[#allocation36_spill] sm:$0xff] %v7300_v24  ;;  %10210 = vst [vmem:[#allocation37_spill] sm:$0xff] %v7302_v27  ;;  %2042 = vadd.xlane.f32.xlu1 %v2021_v34  ;;  %v7306_v52 = vpop.f32.mrb[13].mxu0  ;;  %v7308_v54 = vpop.f32.mrb[13].mxu1 }
 0x255   : > { %v7310_v55 = vpop.f32.mrb[14].mxu0  ;;  %v7312_v57 = vpop.f32.mrb[14].mxu1 }
 0x256   : > { %10211 = vst [vmem:[#allocation38_spill] sm:$0xff] %v7310_v55  ;;  %10212 = vst [vmem:[#allocation39_spill] sm:$0xff] %v7312_v57  ;;  %2635 = vadd.xlane.f32.xlu0 %v2617_v5  ;;  %v7314_v48 = vpop.f32.mrb[15].mxu0  ;;  %v7316_v63 = vpop.f32.mrb[15].mxu1  ;;  %v2023_v23 = vmul.f32 %v7310_v55, %v7310_v55  ;;  %v3092_v31 = vmul.f32 %v7312_v57, %v7312_v57 }
 0x257   : > { %10213 = vst [vmem:[#allocation40_spill] sm:$0xff] %v7314_v48  ;;  %10214 = vst [vmem:[#allocation41_spill] sm:$0xff] %v7316_v63  ;;  %v2622_v5 = vmul.f32 %v7314_v48, %v7314_v48  ;;  %v2619_v48 = vmul.f32 %v7280_v1, %v7280_v1 }
 0x258   : > { %3111 = vadd.xlane.f32.xlu1 %v3090_v41  ;;  %v7378_v41 = vpop.permute.xlu1 %2191 }
 0x259   : > { %10226 = vst [vmem:[#allocation53_spill] sm:$0xff] %v7378_v41 }
 0x25a   : > { %3575 = vadd.xlane.f32.xlu0 %v3557_v30  ;;  %v3089_v30 = vmul.f32 %v7276_v6, %v7276_v6 }
 0x25b   : > { %v7326_v28 = vpop.f32.mrb[16].mxu0  ;;  %v7328_v8 = vpop.f32.mrb[16].mxu1 }
 0x25c   : > { %2641 = vadd.xlane.f32.xlu1 %v2620_v59  ;;  %v7334_v37 = vpop.f32.mrb[17].mxu0  ;;  %v7336_v17 = vpop.f32.mrb[17].mxu1 }
 0x25d   : > { %v7338_v20 = vpop.f32.mrb[18].mxu0  ;;  %v7340_v15 = vpop.f32.mrb[18].mxu1 }
 0x25e   : > { %10217 = vst [vmem:[#allocation44_spill] sm:$0xff] %v7338_v20  ;;  %10218 = vst [vmem:[#allocation45_spill] sm:$0xff] %v7340_v15  ;;  %3107 = vadd.xlane.f32.xlu0 %v3088_v10  ;;  %v7342_v43 = vpop.f32.mrb[19].mxu0  ;;  %v7344_v39 = vpop.f32.mrb[19].mxu1  ;;  %v3094_v41 = vmul.f32 %v7340_v15, %v7340_v15 }
 0x25f   : > { %10219 = vst [vmem:[#allocation46_spill] sm:$0xff] %v7342_v43  ;;  %v7382_v59 = vpop.permute.xlu0 %2193  ;;  %v2624_v15 = vmul.f32 %v7342_v43, %v7342_v43 }
 0x260   : > { %3581 = vadd.xlane.f32.xlu1 %v3560_v32  ;;  %10227 = vst [vmem:[#allocation54_spill] sm:$0xff] %v7382_v59 }
 0x262   : > { %2637 = vadd.xlane.f32.xlu0 %v2618_v21  ;;  %v3562_v21 = vmul.f32 %v7316_v63, %v7316_v63  ;;  %v7406_v63 = vpop.permute.xlu1 %2195 }
 0x263   : > { %v7354_v40 = vpop.f32.mrb[20].mxu0  ;;  %v7356_v35 = vpop.f32.mrb[20].mxu1  ;;  %10236 = vst [vmem:[#allocation63_spill] sm:$0xff] %v7406_v63 }
 0x264   : > { %2046 = vadd.xlane.f32.xlu1 %v2023_v23  ;;  %v7362_v56 = vpop.f32.mrb[21].mxu0  ;;  %v7364_v12 = vpop.f32.mrb[21].mxu1 }
 0x265   : > { %v7366_v14 = vpop.f32.mrb[22].mxu0  ;;  %v7368_v22 = vpop.f32.mrb[22].mxu1 }
 0x266   : > { %10222 = vst [vmem:[#allocation49_spill] sm:$0xff] %v7366_v14  ;;  %10223 = vst [vmem:[#allocation50_spill] sm:$0xff] %v7368_v22  ;;  %3577 = vadd.xlane.f32.xlu0 %v3558_v45  ;;  %v7372_v36 = vpop.f32.mrb[23].mxu0  ;;  %v7374_v34 = vpop.f32.mrb[23].mxu1 }
 0x267   : > { %10224 = vst [vmem:[#allocation51_spill] sm:$0xff] %v7372_v36  ;;  %10225 = vst [vmem:[#allocation52_spill] sm:$0xff] %v7374_v34  ;;  %v7408_v38 = vpop.permute.xlu0 %2197  ;;  %v7434_v58 = vpop.permute.xlu1 %2199 }
 0x268   : > { %3115 = vadd.xlane.f32.xlu1 %v3092_v31  ;;  %10237 = vst [vmem:[#allocation64_spill] sm:$0xff] %v7408_v38  ;;  %v2022_v38 = vmul.f32 %v7300_v24, %v7300_v24  ;;  %10246 = vst [vmem:[#allocation73_spill] sm:$0xff] %v7434_v58 }
 0x26a   : > { %2040 = vadd.xlane.f32.xlu0 %v2020_v60 }
 0x26b   : > { %v7384_v10 = vpop.f32.mrb[24].mxu0  ;;  %v7386_v32 = vpop.f32.mrb[24].mxu1 }
 0x26c   : > { %10228 = vst [vmem:[#allocation55_spill] sm:$0xff] %v7384_v10  ;;  %10229 = vst [vmem:[#allocation56_spill] sm:$0xff] %v7386_v32  ;;  %2645 = vadd.xlane.f32.xlu1 %v2622_v5  ;;  %v7390_v23 = vpop.f32.mrb[25].mxu0  ;;  %v7392_v45 = vpop.f32.mrb[25].mxu1  ;;  %v2025_v5 = vmul.f32 %v7338_v20, %v7338_v20 }
 0x26d   : > { %10230 = vst [vmem:[#allocation57_spill] sm:$0xff] %v7390_v23  ;;  %10231 = vst [vmem:[#allocation58_spill] sm:$0xff] %v7392_v45  ;;  %v7394_v31 = vpop.f32.mrb[26].mxu0  ;;  %v7396_v60 = vpop.f32.mrb[26].mxu1 }
 0x26e   : > { %10232 = vst [vmem:[#allocation59_spill] sm:$0xff] %v7394_v31  ;;  %10233 = vst [vmem:[#allocation60_spill] sm:$0xff] %v7396_v60  ;;  %3109 = vadd.xlane.f32.xlu0 %v3089_v30  ;;  %v7400_v57 = vpop.f32.mrb[27].mxu0  ;;  %v7402_v55 = vpop.f32.mrb[27].mxu1  ;;  %v3559_v30 = vmul.f32 %v7282_v33, %v7282_v33  ;;  %v3091_v33 = vmul.f32 %v7302_v27, %v7302_v27 }
 0x26f   : > { %10234 = vst [vmem:[#allocation61_spill] sm:$0xff] %v7400_v57  ;;  %10235 = vst [vmem:[#allocation62_spill] sm:$0xff] %v7402_v55  ;;  %v7438_v16 = vpop.permute.xlu0 %2201 }
 0x270   : > { %3585 = vadd.xlane.f32.xlu1 %v3562_v21  ;;  %10247 = vst [vmem:[#allocation74_spill] sm:$0xff] %v7438_v16  ;;  %v2621_v16 = vmul.f32 %v7306_v52, %v7306_v52 }
 0x272   : > { %2639 = vadd.xlane.f32.xlu0 %v2619_v48 }
 0x273   : > { %v7410_v18 = vpop.f32.mrb[28].mxu0  ;;  %v7412_v59 = vpop.f32.mrb[28].mxu1 }
 0x274   : > { %10238 = vst [vmem:[#allocation65_spill] sm:$0xff] %v7410_v18  ;;  %10239 = vst [vmem:[#allocation66_spill] sm:$0xff] %v7412_v59  ;;  %2050 = vadd.xlane.f32.xlu1 %v2025_v5  ;;  %v7418_v21 = vpop.f32.mrb[29].mxu0  ;;  %v7420_v2 = vpop.f32.mrb[29].mxu1 }
 0x275   : > { %10240 = vst [vmem:[#allocation67_spill] sm:$0xff] %v7418_v21  ;;  %10241 = vst [vmem:[#allocation68_spill] sm:$0xff] %v7420_v2  ;;  %v7422_v20 = vpop.f32.mrb[30].mxu0  ;;  %v7424_v48 = vpop.f32.mrb[30].mxu1 }
 0x276   : > { %10242 = vst [vmem:[#allocation69_spill] sm:$0xff] %v7422_v20  ;;  %10243 = vst [vmem:[#allocation70_spill] sm:$0xff] %v7424_v48  ;;  %3579 = vadd.xlane.f32.xlu0 %v3559_v30  ;;  %v7428_v63 = vpop.f32.mrb[31].mxu0  ;;  %v7430_v5 = vpop.f32.mrb[31].mxu1 }
 0x277   : > { %10244 = vst [vmem:[#allocation71_spill] sm:$0xff] %v7428_v63  ;;  %10245 = vst [vmem:[#allocation72_spill] sm:$0xff] %v7430_v5 }
 0x278   : > { %3119 = vadd.xlane.f32.xlu1 %v3094_v41  ;;  %v3564_v41 = vmul.f32 %v7344_v39, %v7344_v39 }
 0x27a   : > { %2044 = vadd.xlane.f32.xlu0 %v2022_v38 }
 0x27b   : > { %v7440_v30 = vpop.f32.mrb[32].mxu0 }
 0x27c   : > { %10248 = vst [vmem:[#allocation75_spill] sm:$0xff] %v7440_v30  ;;  %v1792_v24 = vpop.f32.mrb[32].mxu1  ;;  %2649 = vadd.xlane.f32.xlu1 %v2624_v15  ;;  %v7442_v1 = vpop.f32.mrb[33].mxu0 }
 0x27d   : > { %10249 = vst [vmem:[#allocation76_spill] sm:$0xff] %v7442_v1  ;;  %v1794_v26 = vpop.f32.mrb[33].mxu1  ;;  %v7446_v43 = vpop.f32.mrb[34].mxu0  ;;  %v2027_v1 = vmul.f32 %v7366_v14, %v7366_v14 }
 0x27e   : > { %10250 = vst [vmem:[#allocation77_spill] sm:$0xff] %v7446_v43  ;;  %v5548_v58 = vpack.c.bf16 %v1794_v26, %v1792_v24  ;;  %v1796_v38 = vpop.f32.mrb[34].mxu1  ;;  %3113 = vadd.xlane.f32.xlu0 %v3091_v33  ;;  %v7448_v29 = vpop.f32.mrb[35].mxu0 }
 0x27f   : > { %10251 = vst [vmem:[#allocation78_spill] sm:$0xff] %v7448_v29  ;;  %v1798_v27 = vpop.f32.mrb[35].mxu1  ;;  %v7458_v43 = vpop.permute.xlu1 %2203 }
 0x280   : > { %1967 = vst [vmem:[%s7453_s24] sm:$0xff] %v5548_v58  ;;  %v5549_v15 = vpack.c.bf16 %v1798_v27, %v1796_v38  ;;  %3589 = vadd.xlane.f32.xlu1 %v3564_v41  ;;  %10252 = vst [vmem:[#allocation79_spill] sm:$0xff] %v7458_v43  ;;  %v7461_v26 = vpop.permute.xlu0 %2205  ;;  %v3561_v58 = vmul.f32 %v7308_v54, %v7308_v54  ;;  %v3096_v27 = vmul.f32 %v7368_v22, %v7368_v22 }
 0x281   : > { %10253 = vst [vmem:[#allocation80_spill] sm:$0xff] %v7461_v26  ;;  %v2626_v26 = vmul.f32 %v7372_v36, %v7372_v36 }
 0x282   : > { %1968 = vst [vmem:[%s7453_s24 + $0x8] sm:$0xff] %v5549_v15  ;;  %2643 = vadd.xlane.f32.xlu0 %v2621_v16 }
 0x283   : > { %v7463_v33 = vpop.f32.mrb[36].mxu0  ;;  %v7480_v43 = vpop.permute.xlu1 %2207 }
 0x284   : > { %10254 = vst [vmem:[#allocation81_spill] sm:$0xff] %v7463_v33  ;;  %v1802_v24 = vpop.f32.mrb[36].mxu1  ;;  %2054 = vadd.xlane.f32.xlu1 %v2027_v1  ;;  %v7465_v29 = vpop.f32.mrb[37].mxu0  ;;  %v2024_v1 = vmul.f32 %v7326_v28, %v7326_v28  ;;  %10258 = vst [vmem:[#allocation85_spill] sm:$0xff] %v7480_v43 }
 0x285   : > { %10255 = vst [vmem:[#allocation82_spill] sm:$0xff] %v7465_v29  ;;  %v1804_v41 = vpop.f32.mrb[37].mxu1  ;;  %v7471_v38 = vpop.f32.mrb[38].mxu0 }
 0x286   : > { %10256 = vst [vmem:[#allocation83_spill] sm:$0xff] %v7471_v38  ;;  %v5550_v16 = vpack.c.bf16 %v1804_v41, %v1802_v24  ;;  %v1806_v15 = vpop.f32.mrb[38].mxu1  ;;  %3583 = vadd.xlane.f32.xlu0 %v3561_v58  ;;  %v7473_v30 = vpop.f32.mrb[39].mxu0  ;;  %v3093_v24 = vmul.f32 %v7328_v8, %v7328_v8 }
 0x287   : > { %10257 = vst [vmem:[#allocation84_spill] sm:$0xff] %v7473_v30  ;;  %v1808_v33 = vpop.f32.mrb[39].mxu1  ;;  %v7485_v58 = vpop.permute.xlu0 %2209 }
 0x288   : > { %1969 = vst [vmem:[%s7453_s24 + $0x10] sm:$0xff] %v5550_v16  ;;  %v5551_v29 = vpack.c.bf16 %v1808_v33, %v1806_v15  ;;  %3123 = vadd.xlane.f32.xlu1 %v3096_v27  ;;  %10259 = vst [vmem:[#allocation86_spill] sm:$0xff] %v7485_v58  ;;  %v3566_v27 = vmul.f32 %v7374_v34, %v7374_v34  ;;  %v2623_v58 = vmul.f32 %v7334_v37, %v7334_v37  ;;  %v7502_v43 = vpop.permute.xlu1 %2211 }
 0x289   : > { %10264 = vst [vmem:[#allocation91_spill] sm:$0xff] %v7502_v43  ;;  %v2628_v43 = vmul.f32 %v7400_v57, %v7400_v57  ;;  %v2625_v57 = vmul.f32 %v7362_v56, %v7362_v56 }
 0x28a   : > { %1970 = vst [vmem:[%s7453_s24 + $0x18] sm:$0xff] %v5551_v29  ;;  %2048 = vadd.xlane.f32.xlu0 %v2024_v1 }
 0x28b   : > { %v7487_v41 = vpop.f32.mrb[40].mxu0 }
 0x28c   : > { %10260 = vst [vmem:[#allocation87_spill] sm:$0xff] %v7487_v41  ;;  %v1812_v30 = vpop.f32.mrb[40].mxu1  ;;  %2653 = vadd.xlane.f32.xlu1 %v2626_v26  ;;  %v7489_v33 = vpop.f32.mrb[41].mxu0 }
 0x28d   : > { %10261 = vst [vmem:[#allocation88_spill] sm:$0xff] %v7489_v33  ;;  %v1814_v16 = vpop.f32.mrb[41].mxu1  ;;  %v7493_v15 = vpop.f32.mrb[42].mxu0  ;;  %v2029_v33 = vmul.f32 %v7394_v31, %v7394_v31 }
 0x28e   : > { %10262 = vst [vmem:[#allocation89_spill] sm:$0xff] %v7493_v15  ;;  %v5552_v29 = vpack.c.bf16 %v1814_v16, %v1812_v30  ;;  %v1816_v1 = vpop.f32.mrb[42].mxu1  ;;  %3117 = vadd.xlane.f32.xlu0 %v3093_v24  ;;  %v7495_v38 = vpop.f32.mrb[43].mxu0 }
 0x28f   : > { %10263 = vst [vmem:[#allocation90_spill] sm:$0xff] %v7495_v38  ;;  %v1818_v41 = vpop.f32.mrb[43].mxu1  ;;  %v7505_v30 = vpop.permute.xlu0 %2341 }
 0x290   : > { %1971 = vst [vmem:[%s7453_s24 + $0x20] sm:$0xff] %v5552_v29  ;;  %v5553_v26 = vpack.c.bf16 %v1818_v41, %v1816_v1  ;;  %3593 = vadd.xlane.f32.xlu1 %v3566_v27  ;;  %10265 = vst [vmem:[#allocation92_spill] sm:$0xff] %v7505_v30  ;;  %v3563_v41 = vmul.f32 %v7336_v17, %v7336_v17  ;;  %v3098_v27 = vmul.f32 %v7396_v60, %v7396_v60  ;;  %v7524_v31 = vpop.permute.xlu1 %2343 }
 0x291   : > { %10270 = vst [vmem:[#allocation97_spill] sm:$0xff] %v7524_v31 }
 0x292   : > { %1972 = vst [vmem:[%s7453_s24 + $0x28] sm:$0xff] %v5553_v26  ;;  %2647 = vadd.xlane.f32.xlu0 %v2623_v58 }
 0x293   : > { %v7507_v24 = vpop.f32.mrb[44].mxu0 }
 0x294   : > { %10266 = vst [vmem:[#allocation93_spill] sm:$0xff] %v7507_v24  ;;  %v1822_v16 = vpop.f32.mrb[44].mxu1  ;;  %2058 = vadd.xlane.f32.xlu1 %v2029_v33  ;;  %v7509_v38 = vpop.f32.mrb[45].mxu0  ;;  %v2026_v33 = vmul.f32 %v7354_v40, %v7354_v40 }
 0x295   : > { %10267 = vst [vmem:[#allocation94_spill] sm:$0xff] %v7509_v38  ;;  %v1824_v29 = vpop.f32.mrb[45].mxu1  ;;  %v7515_v1 = vpop.f32.mrb[46].mxu0 }
 0x296   : > { %10268 = vst [vmem:[#allocation95_spill] sm:$0xff] %v7515_v1  ;;  %v5554_v58 = vpack.c.bf16 %v1824_v29, %v1822_v16  ;;  %v1826_v26 = vpop.f32.mrb[46].mxu1  ;;  %3587 = vadd.xlane.f32.xlu0 %v3563_v41  ;;  %v7517_v15 = vpop.f32.mrb[47].mxu0  ;;  %v3095_v16 = vmul.f32 %v7356_v35, %v7356_v35 }
 0x297   : > { %10269 = vst [vmem:[#allocation96_spill] sm:$0xff] %v7517_v15  ;;  %v1828_v24 = vpop.f32.mrb[47].mxu1  ;;  %v7529_v41 = vpop.permute.xlu0 %2345 }
 0x298   : > { %1973 = vst [vmem:[%s7453_s24 + $0x30] sm:$0xff] %v5554_v58  ;;  %v5555_v38 = vpack.c.bf16 %v1828_v24, %v1826_v26  ;;  %3127 = vadd.xlane.f32.xlu1 %v3098_v27  ;;  %10271 = vst [vmem:[#allocation98_spill] sm:$0xff] %v7529_v41  ;;  %v3568_v58 = vmul.f32 %v7402_v55, %v7402_v55  ;;  %v2031_v55 = vmul.f32 %v7422_v20, %v7422_v20 }
 0x29a   : > { %1974 = vst [vmem:[%s7453_s24 + $0x38] sm:$0xff] %v5555_v38  ;;  %2052 = vadd.xlane.f32.xlu0 %v2026_v33 }
 0x29b   : > { %v7531_v29 = vpop.f32.mrb[48].mxu0 }
 0x29c   : > { %10272 = vst [vmem:[#allocation99_spill] sm:$0xff] %v7531_v29  ;;  %v1832_v24 = vpop.f32.mrb[48].mxu1  ;;  %2657 = vadd.xlane.f32.xlu1 %v2628_v43  ;;  %v7535_v27 = vpop.f32.mrb[49].mxu0 }
 0x29d   : > { %10273 = vst [vmem:[#allocation100_spill] sm:$0xff] %v7535_v27  ;;  %v1834_v26 = vpop.f32.mrb[49].mxu1  ;;  %v7537_v15 = vpop.f32.mrb[50].mxu0 }
 0x29e   : > { %10274 = vst [vmem:[#allocation101_spill] sm:$0xff] %v7537_v15  ;;  %v5556_v38 = vpack.c.bf16 %v1834_v26, %v1832_v24  ;;  %v1836_v33 = vpop.f32.mrb[50].mxu1  ;;  %3121 = vadd.xlane.f32.xlu0 %v3095_v16  ;;  %v7539_v1 = vpop.f32.mrb[51].mxu0  ;;  %v3565_v24 = vmul.f32 %v7364_v12, %v7364_v12  ;;  %v3100_v26 = vmul.f32 %v7424_v48, %v7424_v48 }
 0x29f   : > { %10275 = vst [vmem:[#allocation102_spill] sm:$0xff] %v7539_v1  ;;  %v1838_v29 = vpop.f32.mrb[51].mxu1  ;;  %v7546_v43 = vpop.permute.xlu1 %2347  ;;  %v2630_v48 = vmul.f32 %v7428_v63, %v7428_v63 }
 0x2a0   : > { %1975 = vst [vmem:[%s7453_s24 + $0x40] sm:$0xff] %v5556_v38  ;;  %v5557_v60 = vpack.c.bf16 %v1838_v29, %v1836_v33  ;;  %3597 = vadd.xlane.f32.xlu1 %v3568_v58  ;;  %10276 = vst [vmem:[#allocation103_spill] sm:$0xff] %v7546_v43  ;;  %v7549_v27 = vpop.permute.xlu0 %2349 }
 0x2a1   : > { %10277 = vst [vmem:[#allocation104_spill] sm:$0xff] %v7549_v27 }
 0x2a2   : > { %1976 = vst [vmem:[%s7453_s24 + $0x48] sm:$0xff] %v5557_v60  ;;  %2651 = vadd.xlane.f32.xlu0 %v2625_v57  ;;  %v2028_v57 = vmul.f32 %v7384_v10, %v7384_v10 }
 0x2a3   : > { %v7551_v16 = vpop.f32.mrb[52].mxu0  ;;  %v7570_v20 = vpop.permute.xlu1 %2351 }
 0x2a4   : > { %10278 = vst [vmem:[#allocation105_spill] sm:$0xff] %v7551_v16  ;;  %v1842_v1 = vpop.f32.mrb[52].mxu1  ;;  %2062 = vadd.xlane.f32.xlu1 %v2031_v55  ;;  %v7557_v29 = vpop.f32.mrb[53].mxu0  ;;  %10282 = vst [vmem:[#allocation109_spill] sm:$0xff] %v7570_v20 }
 0x2a5   : > { %10279 = vst [vmem:[#allocation106_spill] sm:$0xff] %v7557_v29  ;;  %v1844_v58 = vpop.f32.mrb[53].mxu1  ;;  %v7559_v38 = vpop.f32.mrb[54].mxu0  ;;  %v3097_v29 = vmul.f32 %v7386_v32, %v7386_v32 }
 0x2a6   : > { %10280 = vst [vmem:[#allocation107_spill] sm:$0xff] %v7559_v38  ;;  %v5558_v60 = vpack.c.bf16 %v1844_v58, %v1842_v1  ;;  %v1846_v33 = vpop.f32.mrb[54].mxu1  ;;  %3591 = vadd.xlane.f32.xlu0 %v3565_v24  ;;  %v7563_v15 = vpop.f32.mrb[55].mxu0  ;;  %v3570_v58 = vmul.f32 %v7430_v5, %v7430_v5 }
 0x2a7   : > { %10281 = vst [vmem:[#allocation108_spill] sm:$0xff] %v7563_v15  ;;  %v1848_v16 = vpop.f32.mrb[55].mxu1  ;;  %v7573_v1 = vpop.permute.xlu0 %2353 }
 0x2a8   : > { %1977 = vst [vmem:[%s7453_s24 + $0x50] sm:$0xff] %v5558_v60  ;;  %v5559_v55 = vpack.c.bf16 %v1848_v16, %v1846_v33  ;;  %3131 = vadd.xlane.f32.xlu1 %v3100_v26  ;;  %10283 = vst [vmem:[#allocation110_spill] sm:$0xff] %v7573_v1  ;;  %v7588_v5 = vpop.permute.xlu1 %2355 }
 0x2a9   : > { %10288 = vst [vmem:[#allocation115_spill] sm:$0xff] %v7588_v5 }
 0x2aa   : > { %1978 = vst [vmem:[%s7453_s24 + $0x58] sm:$0xff] %v5559_v55  ;;  %2056 = vadd.xlane.f32.xlu0 %v2028_v57  ;;  %v2627_v55 = vmul.f32 %v7390_v23, %v7390_v23  ;;  %v7698_v23 = vld [vmem:[#allocation8 + $0x3] ss:$0 sm:$0xff] }
 0x2ab   : > { %v7575_v24 = vpop.f32.mrb[56].mxu0 }
 0x2ac   : > { %10284 = vst [vmem:[#allocation111_spill] sm:$0xff] %v7575_v24  ;;  %2661 = vadd.xlane.f32.xlu1 %v2630_v48  ;;  %v1852_v60 = vpop.f32.mrb[56].mxu1  ;;  %v7579_v16 = vpop.f32.mrb[57].mxu0 }
 0x2ad   : > { %10285 = vst [vmem:[#allocation112_spill] sm:$0xff] %v7579_v16  ;;  %v1854_v26 = vpop.f32.mrb[57].mxu1  ;;  %v7581_v33 = vpop.f32.mrb[58].mxu0 }
 0x2ae   : > { %10286 = vst [vmem:[#allocation113_spill] sm:$0xff] %v7581_v33  ;;  %3125 = vadd.xlane.f32.xlu0 %v3097_v29  ;;  %v5560_v57 = vpack.c.bf16 %v1854_v26, %v1852_v60  ;;  %v1856_v15 = vpop.f32.mrb[58].mxu1  ;;  %v7585_v38 = vpop.f32.mrb[59].mxu0  ;;  %v3567_v29 = vmul.f32 %v7392_v45, %v7392_v45 }
 0x2af   : > { %10287 = vst [vmem:[#allocation114_spill] sm:$0xff] %v7585_v38  ;;  %v1858_v24 = vpop.f32.mrb[59].mxu1  ;;  %v7591_v48 = vpop.permute.xlu0 %2357 }
 0x2b0   : > { %1979 = vst [vmem:[%s7453_s24 + $0x60] sm:$0xff] %v5560_v57  ;;  %v5561_v63 = vpack.c.bf16 %v1858_v24, %v1856_v15  ;;  %3601 = vadd.xlane.f32.xlu1 %v3570_v58  ;;  %10289 = vst [vmem:[#allocation116_spill] sm:$0xff] %v7591_v48  ;;  %v2030_v15 = vmul.f32 %v7410_v18, %v7410_v18  ;;  %v3099_v48 = vmul.f32 %v7412_v59, %v7412_v59  ;;  %v7672_v18 = vld [vmem:[#allocation8 + $0x1] ss:$0 sm:$0xff] }
 0x2b2   : > { %1980 = vst [vmem:[%s7453_s24 + $0x68] sm:$0xff] %v5561_v63  ;;  %2655 = vadd.xlane.f32.xlu0 %v2627_v55  ;;  %v7605_v55 = vpop.permute.xlu1 %2359 }
 0x2b3   : > { %v7593_v16 = vpop.f32.mrb[60].mxu0  ;;  %10294 = vst [vmem:[#allocation121_spill] sm:$0xff] %v7605_v55 }
 0x2b4   : > { %10290 = vst [vmem:[#allocation117_spill] sm:$0xff] %v7593_v16  ;;  %v1862_v60 = vpop.f32.mrb[60].mxu1  ;;  %v7597_v26 = vpop.f32.mrb[61].mxu0 }
 0x2b5   : > { %10291 = vst [vmem:[#allocation118_spill] sm:$0xff] %v7597_v26  ;;  %v1864_v38 = vpop.f32.mrb[61].mxu1  ;;  %v7599_v57 = vpop.f32.mrb[62].mxu0 }
 0x2b6   : > { %10292 = vst [vmem:[#allocation119_spill] sm:$0xff] %v7599_v57  ;;  %3595 = vadd.xlane.f32.xlu0 %v3567_v29  ;;  %v5562_v63 = vpack.c.bf16 %v1864_v38, %v1862_v60  ;;  %v1866_v24 = vpop.f32.mrb[62].mxu1  ;;  %v7603_v58 = vpop.f32.mrb[63].mxu0  ;;  %v2629_v38 = vmul.f32 %v7418_v21, %v7418_v21 }
 0x2b7   : > { %10293 = vst [vmem:[#allocation120_spill] sm:$0xff] %v7603_v58  ;;  %v1868_v33 = vpop.f32.mrb[63].mxu1  ;;  %v7611_v26 = vpop.permute.xlu0 %2361 }
 0x2b8   : > { %1981 = vst [vmem:[%s7453_s24 + $0x70] sm:$0xff] %v5562_v63  ;;  %v5563_v16 = vpack.c.bf16 %v1868_v33, %v1866_v24  ;;  %10295 = vst [vmem:[#allocation122_spill] sm:$0xff] %v7611_v26  ;;  %v7613_v57 = vpop.permute.xlu1 %2363  ;;  %v3569_v33 = vmul.f32 %v7420_v2, %v7420_v2 }
 0x2b9   : > { %10296 = vst [vmem:[#allocation123_spill] sm:$0xff] %v7613_v57 }
 0x2ba   : > { %2060 = vadd.xlane.f32.xlu0 %v2030_v15  ;;  %1982 = vst [vmem:[%s7453_s24 + $0x78] sm:$0xff] %v5563_v16 }
 0x2bb   : > { %v7617_v29 = vpop.permute.xlu0 %2365 }
 0x2bc   : > { %10297 = vst [vmem:[#allocation124_spill] sm:$0xff] %v7617_v29  ;;  %v7619_v60 = vpop.permute.xlu1 %2367 }
 0x2bd   : > { %10298 = vst [vmem:[#allocation125_spill] sm:$0xff] %v7619_v60 }
 0x2be   : > { %3129 = vadd.xlane.f32.xlu0 %v3099_v48 }
 0x2bf   : > { %v7623_v63 = vpop.permute.xlu0 %2369 }
 0x2c0   : > { %10299 = vst [vmem:[#allocation126_spill] sm:$0xff] %v7623_v63  ;;  %v7625_v16 = vpop.permute.xlu1 %2371 }
 0x2c1   : > { %10300 = vst [vmem:[#allocation127_spill] sm:$0xff] %v7625_v16 }
 0x2c2   : > { %2659 = vadd.xlane.f32.xlu0 %v2629_v38 }
 0x2c6   : > { %3599 = vadd.xlane.f32.xlu0 %v3569_v33 }
 0x2cb   : > { %v2033_v15 = vpop.xlane.xlu0 %2032 }
 0x2cc   : > { %v2065_v24 = vmul.f32 0.0078125, %v2033_v15 }
 0x2cd   : > { %v2035_v58 = vpop.xlane.xlu1 %2034 }
 0x2ce   : > { %v2081_v57 = vadd.f32 1e-06, %v2065_v24  ;;  %v2066_v26 = vmul.f32 0.0078125, %v2035_v58 }
 0x2cf   : > { %v3102_v55 = vpop.xlane.xlu0 %3101 }
 0x2d0   : > { %5995 = vrsqrt.f32 %v2081_v57  ;;  %v2082_v48 = vadd.f32 1e-06, %v2066_v26  ;;  %v3133_v29 = vmul.f32 0.0078125, %v3102_v55  ;;  %v7627_v26 = vld [vmem:[#allocation8] ss:$0 sm:$0xff] }
 0x2d1   : > { %v3104_v38 = vpop.xlane.xlu1 %3103 }
 0x2d2   : > { %5997 = vrsqrt.f32 %v2082_v48  ;;  %v3149_v60 = vadd.f32 1e-06, %v3133_v29  ;;  %v3134_v5 = vmul.f32 0.0078125, %v3104_v38 }
 0x2d3   : > { %v2632_v1 = vpop.xlane.xlu0 %2631 }
 0x2d4   : > { %5999 = vrsqrt.f32 %v3149_v60  ;;  %v3150_v33 = vadd.f32 1e-06, %v3134_v5  ;;  %v2663_v2 = vmul.f32 0.0078125, %v2632_v1 }
 0x2d5   : > { %v2634_v63 = vpop.xlane.xlu1 %2633 }
 0x2d6   : > { %6001 = vrsqrt.f32 %v3150_v33  ;;  %v2679_v16 = vadd.f32 1e-06, %v2663_v2  ;;  %v2664_v21 = vmul.f32 0.0078125, %v2634_v63 }
 0x2d7   : > { %v3572_v15 = vpop.xlane.xlu0 %3571 }
 0x2d8   : > { %v2680_v59 = vadd.f32 1e-06, %v2664_v21  ;;  %6003 = vrsqrt.f32 %v2679_v16  ;;  %v3603_v57 = vmul.f32 0.0078125, %v3572_v15 }
 0x2d9   : > { %v3574_v24 = vpop.xlane.xlu1 %3573 }
 0x2da   : > { %v5996_v58 = vpop.eup %5995  ;;  %6005 = vrsqrt.f32 %v2680_v59  ;;  %v3604_v60 = vmul.f32 0.0078125, %v3574_v24  ;;  %v3619_v21 = vadd.f32 1e-06, %v3603_v57  ;;  %v7640_v24 = vld [vmem:[#allocation8 + $0x2] ss:$0 sm:$0xff] }
 0x2db   : > { %v2113_v55 = vmul.f32 %v5996_v58, %v7224_v49  ;;  %v2037_v29 = vpop.xlane.xlu0 %2036 }
 0x2dc   : > { %v5998_v48 = vpop.eup %5997  ;;  %v3620_v15 = vadd.f32 1e-06, %v3604_v60  ;;  %6007 = vrsqrt.f32 %v3619_v21  ;;  %v2067_v57 = vmul.f32 0.0078125, %v2037_v29  ;;  %v7661_v21 = vld [vmem:[%s6844_s18 + $0x8] sm:$0xff] }
 0x2dd   : > { %v2114_v5 = vmul.f32 %v5998_v48, %v7234_v11  ;;  %v2039_v1 = vpop.xlane.xlu1 %2038  ;;  %v7632_v2 = vmul.f32 %v7627_v26, %v2113_v55  ;;  %v7650_v48 = vld [vmem:[%s6844_s18] sm:$0xff] }
 0x2de   : > { %v6000_v63 = vpop.eup %5999  ;;  %6009 = vrsqrt.f32 %v3620_v15  ;;  %v2083_v20 = vadd.f32 1e-06, %v2067_v57 }
 0x2df   : > { %v3181_v16 = vmul.f32 %v6000_v63, %v7226_v13  ;;  %v3106_v38 = vpop.xlane.xlu0 %3105  ;;  %v2229_v33 = vmul.f32 %v7324_v51, %v7632_v2  ;;  %v7638_v49 = vmul.f32 %v7627_v26, %v2114_v5  ;;  %v2405_v60 = vmul.f32 %v7650_v48, %v7632_v2 }
 0x2e0   : > { %v6002_v59 = vpop.eup %6001  ;;  %v3135_v63 = vmul.f32 0.0078125, %v3106_v38  ;;  %6011 = vrsqrt.f32 %v2083_v20 }
 0x2e1   : > { %v3182_v11 = vmul.f32 %v6002_v59, %v7236_v62  ;;  %v7643_v58 = vpop.xlane.xlu1 %2042  ;;  %2261 = vrot.lane.b32.xlu0 %v2229_v33, %s6518_s12  ;;  %v2230_v13 = vmul.f32 %v7296_v7, %v7638_v49  ;;  %v7655_v62 = vmul.f32 %v7640_v24, %v3181_v16  ;;  %v2406_v29 = vmul.f32 %v7661_v21, %v7638_v49 }
 0x2e2   : > { %v6004_v5 = vpop.eup %6003  ;;  %v3151_v27 = vadd.f32 1e-06, %v3135_v63 }
 0x2e3   : > { %2263 = vrot.lane.b32.xlu1 %v2230_v13, %s6518_s12  ;;  %v2636_v55 = vpop.xlane.xlu0 %2635  ;;  %v7666_v59 = vmul.f32 %v7640_v24, %v3182_v11  ;;  %v2711_v16 = vmul.f32 %v6004_v5, %v7228_v19  ;;  %v3233_v38 = vmul.f32 %v7655_v62, %v7324_v51  ;;  %v3345_v57 = vmul.f32 %v7650_v48, %v7655_v62 }
 0x2e4   : > { %v6006_v13 = vpop.eup %6005  ;;  %6013 = vrsqrt.f32 %v3151_v27 }
 0x2e5   : > { %v7657_v33 = vpop.xlane.xlu1 %3111  ;;  %2437 = vrot.lane.b32.xlu0 %v2405_v60, %s6518_s12  ;;  %v2665_v60 = vmul.f32 0.0078125, %v2636_v55  ;;  %v2712_v45 = vmul.f32 %v6006_v13, %v7240_v25  ;;  %v3234_v11 = vmul.f32 %v7666_v59, %v7296_v7  ;;  %v7684_v55 = vmul.f32 %v7672_v18, %v2711_v16 }
 0x2e6   : > { %v6008_v5 = vpop.eup %6007  ;;  %v3346_v20 = vmul.f32 %v7661_v21, %v7666_v59 }
 0x2e7   : > { %2439 = vrot.lane.b32.xlu1 %v2406_v29, %s6518_s12  ;;  %v3576_v15 = vpop.xlane.xlu0 %3575  ;;  %v2681_v25 = vadd.f32 1e-06, %v2665_v60  ;;  %v7692_v13 = vmul.f32 %v7672_v18, %v2712_v45  ;;  %v2763_v27 = vmul.f32 %v7684_v55, %v7324_v51 }
 0x2e8   : > { %v3605_v63 = vmul.f32 0.0078125, %v3576_v15  ;;  %v2068_v15 = vmul.f32 0.0078125, %v2039_v1  ;;  %v2875_v1 = vmul.f32 %v7650_v48, %v7684_v55 }
 0x2e9   : > { %v7675_v34 = vpop.xlane.xlu1 %2641  ;;  %3265 = vrot.lane.b32.xlu0 %v3233_v38, %s6518_s12  ;;  %v6010_v38 = vpop.eup %6009  ;;  %6015 = vrsqrt.f32 %v2681_v25 }
 0x2ea   : > { %v3621_v60 = vadd.f32 1e-06, %v3605_v63  ;;  %v6012_v25 = vpop.eup %6011  ;;  %v2084_v63 = vadd.f32 1e-06, %v2068_v15 }
 0x2eb   : > { %3267 = vrot.lane.b32.xlu1 %v3234_v11, %s6518_s12  ;;  %v3108_v19 = vpop.xlane.xlu0 %3107  ;;  %v3651_v11 = vmul.f32 %v6008_v5, %v7230_v42  ;;  %v2764_v42 = vmul.f32 %v7692_v13, %v7296_v7 }
 0x2ec   : > { %6017 = vrsqrt.f32 %v3621_v60  ;;  %v3136_v60 = vmul.f32 0.0078125, %v3108_v19 }
 0x2ed   : > { %v7686_v29 = vpop.xlane.xlu1 %3581  ;;  %3377 = vrot.lane.b32.xlu0 %v3345_v57, %s6518_s12  ;;  %v3652_v57 = vmul.f32 %v6010_v38, %v7238_v9  ;;  %v7712_v5 = vmul.f32 %v7698_v23, %v3651_v11  ;;  %6019 = vrsqrt.f32 %v2084_v63 }
 0x2ee   : > { %v3152_v63 = vadd.f32 1e-06, %v3136_v60 }
 0x2ef   : > { %3379 = vrot.lane.b32.xlu1 %v3346_v20, %s6518_s12  ;;  %v2638_v16 = vpop.xlane.xlu0 %2637  ;;  %v2876_v20 = vmul.f32 %v7661_v21, %v7692_v13  ;;  %v7720_v38 = vmul.f32 %v7698_v23, %v3652_v57  ;;  %v3703_v15 = vmul.f32 %v7712_v5, %v7324_v51 }
 0x2f1   : > { %v7701_v36 = vpop.xlane.xlu1 %2046  ;;  %2795 = vrot.lane.b32.xlu0 %v2763_v27, %s6518_s12  ;;  %v6014_v27 = vpop.eup %6013  ;;  %v3704_v57 = vmul.f32 %v7720_v38, %v7296_v7 }
 0x2f3   : > { %2797 = vrot.lane.b32.xlu1 %v2764_v42, %s6518_s12  ;;  %v7707_v45 = vpop.xlane.xlu0 %3577  ;;  %v2115_v42 = vmul.f32 %v6012_v25, %v7248_v53  ;;  %v6016_v43 = vpop.eup %6015 }
 0x2f5   : > { %v7714_v9 = vpop.xlane.xlu1 %3115  ;;  %2907 = vrot.lane.b32.xlu0 %v2875_v1, %s6518_s12  ;;  %v3183_v1 = vmul.f32 %v6014_v27, %v7250_v4  ;;  %v7736_v19 = vmul.f32 %v7627_v26, %v2115_v42  ;;  %v2713_v4 = vmul.f32 %v6016_v43, %v7254_v61  ;;  %v2666_v43 = vmul.f32 0.0078125, %v2638_v16 }
 0x2f7   : > { %2909 = vrot.lane.b32.xlu1 %v2876_v20, %s6518_s12  ;;  %v2041_v11 = vpop.xlane.xlu0 %2040  ;;  %v3815_v20 = vmul.f32 %v7650_v48, %v7712_v5  ;;  %v2231_v61 = vmul.f32 %v7322_v0, %v7736_v19 }
 0x2f8   : > { %v2069_v32 = vmul.f32 0.0078125, %v2041_v11  ;;  %v3816_v11 = vmul.f32 %v7661_v21, %v7720_v38 }
 0x2f9   : > { %v7727_v22 = vpop.xlane.xlu1 %2645  ;;  %3735 = vrot.lane.b32.xlu0 %v3703_v15, %s6518_s12  ;;  %v6018_v15 = vpop.eup %6017 }
 0x2fa   : > { %v2085_v53 = vadd.f32 1e-06, %v2069_v32  ;;  %v7745_v32 = vmul.f32 %v7640_v24, %v3183_v1  ;;  %v3653_v60 = vmul.f32 %v6018_v15, %v7256_v47  ;;  %v7757_v1 = vmul.f32 %v7672_v18, %v2713_v4 }
 0x2fb   : > { %3737 = vrot.lane.b32.xlu1 %v3704_v57, %s6518_s12  ;;  %v3110_v25 = vpop.xlane.xlu0 %3109 }
 0x2fc   : > { %10301 = vst [vmem:[#allocation128_spill] sm:$0xff] %v7745_v32  ;;  %6021 = vrsqrt.f32 %v2085_v53  ;;  %v3137_v48 = vmul.f32 0.0078125, %v3110_v25  ;;  %v3235_v21 = vmul.f32 %v7745_v32, %v7322_v0  ;;  %10302 = vst [vmem:[#allocation129_spill] sm:$0xff] %v7757_v1  ;;  %v6020_v53 = vpop.eup %6019  ;;  %v7769_v4 = vmul.f32 %v7698_v23, %v3653_v60 }
 0x2fd   : > { %v7739_v27 = vpop.xlane.xlu1 %3585  ;;  %3847 = vrot.lane.b32.xlu0 %v3815_v20, %s6518_s12  ;;  %6023 = vrsqrt.f32 %v3152_v63  ;;  %v2682_v63 = vadd.f32 1e-06, %v2666_v43  ;;  %v2116_v47 = vmul.f32 %v6020_v53, %v7258_v46  ;;  %v3606_v46 = vmul.f32 0.0078125, %v7707_v45 }
 0x2fe   : > { %v3153_v25 = vadd.f32 1e-06, %v3137_v48  ;;  %10303 = vst [vmem:[#allocation130_spill] sm:$0xff] %v7769_v4 }
 0x2ff   : > { %3849 = vrot.lane.b32.xlu1 %v3816_v11, %s6518_s12  ;;  %v2640_v42 = vpop.xlane.xlu0 %2639  ;;  %v6189_v11 = vld [vmem:[%s6844_s18 + $0x10] sm:$0xff]  ;;  %v7780_v60 = vmul.f32 %v7627_v26, %v2116_v47  ;;  %v3622_v45 = vadd.f32 1e-06, %v3606_v46 }
 0x300   : > { %v2407_v16 = vmul.f32 %v6189_v11, %v7736_v19  ;;  %6025 = vrsqrt.f32 %v3153_v25  ;;  %v2667_v48 = vmul.f32 0.0078125, %v2640_v42  ;;  %v3347_v7 = vmul.f32 %v6189_v11, %v7745_v32 }
 0x301   : > { %v7751_v57 = vpop.xlane.xlu1 %2050  ;;  %2265 = vrot.lane.b32.xlu0 %v2231_v61, %s6518_s12  ;;  %v2765_v61 = vmul.f32 %v7757_v1, %v7322_v0  ;;  %6027 = vrsqrt.f32 %v2682_v63  ;;  %10304 = vst [vmem:[#allocation131_spill] sm:$0xff] %v7780_v60  ;;  %v2877_v63 = vmul.f32 %v6189_v11, %v7757_v1  ;;  %v2232_v47 = vmul.f32 %v7350_v44, %v7780_v60 }
 0x302   : > { %v2683_v25 = vadd.f32 1e-06, %v2667_v48 }
 0x303   : > { %3269 = vrot.lane.b32.xlu1 %v3235_v21, %s6518_s12  ;;  %v3580_v20 = vpop.xlane.xlu0 %3579 }
 0x304   : > { %6029 = vrsqrt.f32 %v2683_v25  ;;  %v3607_v48 = vmul.f32 0.0078125, %v3580_v20 }
 0x305   : > { %v7763_v15 = vpop.xlane.xlu1 %3119  ;;  %2441 = vrot.lane.b32.xlu0 %v2407_v16, %s6518_s12  ;;  %v3705_v16 = vmul.f32 %v7769_v4, %v7322_v0  ;;  %6031 = vrsqrt.f32 %v3622_v45  ;;  %v10307_v45 = vld [vmem:[#allocation48_spill] sm:$0xff] }
 0x306   : > { %v6022_v43 = vpop.eup %6021 }
 0x307   : > { %2799 = vrot.lane.b32.xlu1 %v2765_v61, %s6518_s12  ;;  %v2045_v21 = vpop.xlane.xlu0 %2044  ;;  %v6024_v42 = vpop.eup %6023  ;;  %v2117_v61 = vmul.f32 %v6022_v43, %v7274_v3  ;;  %v3817_v43 = vmul.f32 %v6189_v11, %v7769_v4  ;;  %v10308_v4 = vld [vmem:[#allocation27_spill] sm:$0xff] }
 0x308   : > { %v3184_v32 = vmul.f32 %v6024_v42, %v7260_v50  ;;  %v2070_v50 = vmul.f32 0.0078125, %v7643_v58 }
 0x309   : > { %v7774_v53 = vpop.xlane.xlu1 %2649  ;;  %3381 = vrot.lane.b32.xlu0 %v3347_v7, %s6518_s12  ;;  %v7796_v46 = vmul.f32 %v7627_v26, %v2117_v61  ;;  %v3623_v61 = vadd.f32 1e-06, %v3607_v48  ;;  %v2071_v48 = vmul.f32 0.0078125, %v2045_v21 }
 0x30a   : > { %v7808_v25 = vmul.f32 %v7640_v24, %v3184_v32  ;;  %v2086_v0 = vadd.f32 1e-06, %v2070_v50 }
 0x30b   : > { %3739 = vrot.lane.b32.xlu1 %v3705_v16, %s6518_s12  ;;  %v3114_v51 = vpop.xlane.xlu0 %3113  ;;  %10305 = vst [vmem:[#allocation132_spill] sm:$0xff] %v7796_v46  ;;  %v6026_v16 = vpop.eup %6025  ;;  %6033 = vrsqrt.f32 %v3623_v61 }
 0x30c   : > { %10306 = vst [vmem:[#allocation133_spill] sm:$0xff] %v7808_v25  ;;  %v6028_v11 = vpop.eup %6027  ;;  %v3236_v32 = vmul.f32 %v7808_v25, %v7350_v44  ;;  %6035 = vrsqrt.f32 %v2086_v0 }
 0x30d   : > { %v7786_v7 = vpop.xlane.xlu1 %3589  ;;  %2911 = vrot.lane.b32.xlu0 %v2877_v63, %s6518_s12  ;;  %v7803_v63 = vld [vmem:[%s6844_s18 + $0x18] sm:$0xff]  ;;  %v2714_v1 = vmul.f32 %v6028_v11, %v10308_v4  ;;  %v3138_v11 = vmul.f32 0.0078125, %v7657_v33 }
 0x30e   : > { %v2408_v20 = vmul.f32 %v7803_v63, %v7780_v60  ;;  %v3348_v21 = vmul.f32 %v7803_v63, %v7808_v25  ;;  %v10311_v60 = vld [vmem:[#allocation29_spill] sm:$0xff] }
 0x30f   : > { %2267 = vrot.lane.b32.xlu1 %v2232_v47, %s6518_s12  ;;  %v7792_v3 = vpop.xlane.xlu0 %2643  ;;  %v3185_v47 = vmul.f32 %v6026_v16, %v7276_v6  ;;  %v7826_v16 = vld [vmem:[%s6844_s18 + $0x20] sm:$0xff]  ;;  %v7838_v61 = vmul.f32 %v7672_v18, %v2714_v1  ;;  %v3154_v33 = vadd.f32 1e-06, %v3138_v11 }
 0x310   : > { %v2409_v50 = vmul.f32 %v7826_v16, %v7796_v46 }
 0x311   : > { %v7799_v42 = vpop.xlane.xlu1 %2054  ;;  %3851 = vrot.lane.b32.xlu0 %v3817_v43, %s6518_s12  ;;  %v2233_v43 = vmul.f32 %v10307_v45, %v7796_v46  ;;  %v7831_v4 = vmul.f32 %v7640_v24, %v3185_v47  ;;  %10310 = vst [vmem:[#allocation134_spill] sm:$0xff] %v7838_v61  ;;  %v2766_v1 = vmul.f32 %v7838_v61, %v7350_v44 }
 0x313   : > { %2443 = vrot.lane.b32.xlu1 %v2408_v20, %s6518_s12  ;;  %v7812_v58 = vpop.xlane.xlu0 %3583  ;;  %10309 = vst [vmem:[#allocation27_spill] sm:$0xff] %v7831_v4  ;;  %v6030_v20 = vpop.eup %6029  ;;  %v3237_v0 = vmul.f32 %v7831_v4, %v10307_v45 }
 0x314   : > { %v2715_v14 = vmul.f32 %v6030_v20, %v10311_v60  ;;  %v3349_v20 = vmul.f32 %v7826_v16, %v7831_v4  ;;  %v10316_v4 = vld [vmem:[#allocation30_spill] sm:$0xff] }
 0x315   : > { %v7817_v10 = vpop.xlane.xlu1 %3123  ;;  %2269 = vrot.lane.b32.xlu0 %v2233_v43, %s6518_s12  ;;  %v6032_v43 = vpop.eup %6031 }
 0x316   : > { %v6034_v11 = vpop.eup %6033 }
 0x317   : > { %3271 = vrot.lane.b32.xlu1 %v3236_v32, %s6518_s12  ;;  %v7823_v6 = vpop.xlane.xlu0 %2048  ;;  %v2087_v32 = vadd.f32 1e-06, %v2071_v48  ;;  %v3139_v48 = vmul.f32 0.0078125, %v3114_v51  ;;  %v2878_v51 = vmul.f32 %v7803_v63, %v7838_v61  ;;  %v3655_v25 = vmul.f32 %v6034_v11, %v10316_v4 }
 0x319   : > { %2445 = vrot.lane.b32.xlu0 %v2409_v50, %s6518_s12  ;;  %v7841_v46 = vpop.xlane.xlu1 %2653  ;;  %v10312_v50 = vld [vmem:[#allocation28_spill] sm:$0xff]  ;;  %6037 = vrsqrt.f32 %v2087_v32 }
 0x31a   : > { %v3654_v41 = vmul.f32 %v6032_v43, %v10312_v50  ;;  %6039 = vrsqrt.f32 %v3154_v33  ;;  %v2668_v43 = vmul.f32 0.0078125, %v7675_v34  ;;  %v6036_v50 = vpop.eup %6035 }
 0x31b   : > { %3383 = vrot.lane.b32.xlu1 %v3348_v21, %s6518_s12  ;;  %v7844_v47 = vpop.xlane.xlu0 %3117  ;;  %v7858_v21 = vmul.f32 %v7672_v18, %v2715_v14 }
 0x31c   : > { %v7867_v32 = vmul.f32 %v7698_v23, %v3654_v41  ;;  %v2684_v33 = vadd.f32 1e-06, %v2668_v43  ;;  %v7888_v43 = vmul.f32 %v7698_v23, %v3655_v25 }
 0x31d   : > { %3273 = vrot.lane.b32.xlu0 %v3237_v0, %s6518_s12  ;;  %10313 = vst [vmem:[#allocation29_spill] sm:$0xff] %v7858_v21  ;;  %v7861_v0 = vpop.xlane.xlu1 %3593  ;;  %v2767_v34 = vmul.f32 %v7858_v21, %v10307_v45  ;;  %v2879_v11 = vmul.f32 %v7826_v16, %v7858_v21 }
 0x31e   : > { %10314 = vst [vmem:[#allocation28_spill] sm:$0xff] %v7861_v0  ;;  %10315 = vst [vmem:[#allocation135_spill] sm:$0xff] %v7867_v32  ;;  %v10317_v0 = vld [vmem:[#allocation31_spill] sm:$0xff]  ;;  %v3706_v41 = vmul.f32 %v7867_v32, %v7350_v44 }
 0x31f   : > { %2801 = vrot.lane.b32.xlu1 %v2766_v1, %s6518_s12  ;;  %v7853_v60 = vpop.xlane.xlu0 %2647  ;;  %v3155_v1 = vadd.f32 1e-06, %v3139_v48  ;;  %v2669_v48 = vmul.f32 0.0078125, %v7792_v3  ;;  %10319 = vst [vmem:[#allocation31_spill] sm:$0xff] %v7888_v43  ;;  %v3818_v3 = vmul.f32 %v7803_v63, %v7867_v32  ;;  %v10324_v63 = vld [vmem:[#allocation53_spill] sm:$0xff] }
 0x320   : > { %v10330_v32 = vld [vmem:[#allocation33_spill] sm:$0xff] }
 0x321   : > { %3385 = vrot.lane.b32.xlu0 %v3349_v20, %s6518_s12  ;;  %v2118_v20 = vmul.f32 %v6036_v50, %v10317_v0  ;;  %6041 = vrsqrt.f32 %v3155_v1  ;;  %v7880_v61 = vpop.xlane.xlu1 %2058 }
 0x322   : > { %10318 = vst [vmem:[#allocation30_spill] sm:$0xff] %v7880_v61  ;;  %6043 = vrsqrt.f32 %v2684_v33  ;;  %v3707_v33 = vmul.f32 %v7888_v43, %v10307_v45 }
 0x323   : > { %2913 = vrot.lane.b32.xlu1 %v2878_v51, %s6518_s12  ;;  %v7871_v14 = vpop.xlane.xlu0 %3587  ;;  %v6038_v0 = vpop.eup %6037  ;;  %v3608_v51 = vmul.f32 0.0078125, %v7686_v29  ;;  %v7895_v50 = vmul.f32 %v7627_v26, %v2118_v20 }
 0x324   : > { %v6040_v1 = vpop.eup %6039 }
 0x325   : > { %2803 = vrot.lane.b32.xlu0 %v2767_v34, %s6518_s12  ;;  %10320 = vst [vmem:[#allocation136_spill] sm:$0xff] %v7895_v50  ;;  %v2685_v34 = vadd.f32 1e-06, %v2669_v48  ;;  %v3624_v29 = vadd.f32 1e-06, %v3608_v51  ;;  %v7904_v61 = vpop.xlane.xlu1 %3127  ;;  %v2234_v20 = vmul.f32 %v10324_v63, %v7895_v50  ;;  %v3609_v48 = vmul.f32 0.0078125, %v7812_v58 }
 0x327   : > { %3741 = vrot.lane.b32.xlu1 %v3706_v41, %s6518_s12  ;;  %v7883_v4 = vpop.xlane.xlu0 %2052  ;;  %v10321_v41 = vld [vmem:[#allocation36_spill] sm:$0xff]  ;;  %6045 = vrsqrt.f32 %v2685_v34 }
 0x328   : > { %v2119_v44 = vmul.f32 %v6038_v0, %v10321_v41  ;;  %10323 = vst [vmem:[#allocation36_spill] sm:$0xff] %v7904_v61  ;;  %6047 = vrsqrt.f32 %v3624_v29  ;;  %v2072_v41 = vmul.f32 0.0078125, %v7701_v36  ;;  %v10329_v29 = vld [vmem:[#allocation54_spill] sm:$0xff]  ;;  %v10354_v61 = vld [vmem:[#allocation41_spill] sm:$0xff] }
 0x329   : > { %2915 = vrot.lane.b32.xlu0 %v2879_v11, %s6518_s12  ;;  %v10322_v11 = vld [vmem:[#allocation32_spill] sm:$0xff]  ;;  %v7929_v45 = vpop.xlane.xlu1 %2657 }
 0x32a   : > { %v3186_v21 = vmul.f32 %v6040_v1, %v10322_v11  ;;  %v7916_v51 = vmul.f32 %v7627_v26, %v2119_v44 }
 0x32b   : > { %3853 = vrot.lane.b32.xlu1 %v3818_v3, %s6518_s12  ;;  %v7899_v25 = vpop.xlane.xlu0 %3121  ;;  %v3819_v3 = vmul.f32 %v7826_v16, %v7888_v43  ;;  %v6042_v1 = vpop.eup %6041  ;;  %v3625_v16 = vadd.f32 1e-06, %v3609_v48  ;;  %v2088_v43 = vadd.f32 1e-06, %v2072_v41  ;;  %v2073_v48 = vmul.f32 0.0078125, %v7823_v6 }
 0x32c   : > { %10325 = vst [vmem:[#allocation32_spill] sm:$0xff] %v7916_v51  ;;  %v7926_v34 = vmul.f32 %v7640_v24, %v3186_v21  ;;  %v6044_v11 = vpop.eup %6043 }
 0x32d   : > { %3743 = vrot.lane.b32.xlu0 %v3707_v33, %s6518_s12  ;;  %v7921_v33 = vld [vmem:[%s6844_s18 + $0x28] sm:$0xff]  ;;  %6049 = vrsqrt.f32 %v3625_v16 }
 0x32e   : > { %v2410_v58 = vmul.f32 %v7921_v33, %v7895_v50  ;;  %10326 = vst [vmem:[#allocation137_spill] sm:$0xff] %v7926_v34  ;;  %v2716_v50 = vmul.f32 %v6044_v11, %v10330_v32  ;;  %v3238_v21 = vmul.f32 %v7926_v34, %v10324_v63  ;;  %6051 = vrsqrt.f32 %v2088_v43 }
 0x32f   : > { %2271 = vrot.lane.b32.xlu1 %v2234_v20, %s6518_s12  ;;  %v7911_v0 = vpop.xlane.xlu0 %2651  ;;  %v10327_v20 = vld [vmem:[#allocation37_spill] sm:$0xff]  ;;  %v3140_v11 = vmul.f32 0.0078125, %v7714_v9  ;;  %v3350_v6 = vmul.f32 %v7921_v33, %v7926_v34 }
 0x330   : > { %v3187_v44 = vmul.f32 %v6042_v1, %v10327_v20  ;;  %10328 = vst [vmem:[#allocation37_spill] sm:$0xff] %v7929_v45  ;;  %v7959_v16 = vmul.f32 %v7672_v18, %v2716_v50  ;;  %v2089_v45 = vadd.f32 1e-06, %v2073_v48  ;;  %v3141_v48 = vmul.f32 0.0078125, %v7844_v47 }
 0x331   : > { %3855 = vrot.lane.b32.xlu0 %v3819_v3, %s6518_s12  ;;  %v2235_v3 = vmul.f32 %v10329_v29, %v7916_v51  ;;  %v6046_v32 = vpop.eup %6045  ;;  %v3156_v43 = vadd.f32 1e-06, %v3140_v11 }
 0x332   : > { %v7950_v41 = vmul.f32 %v7640_v24, %v3187_v44  ;;  %10333 = vst [vmem:[#allocation139_spill] sm:$0xff] %v7959_v16  ;;  %v2768_v50 = vmul.f32 %v7959_v16, %v10324_v63  ;;  %6053 = vrsqrt.f32 %v2089_v45  ;;  %v2880_v45 = vmul.f32 %v7921_v33, %v7959_v16 }
 0x333   : > { %2447 = vrot.lane.b32.xlu1 %v2410_v58, %s6518_s12  ;;  %v7932_v36 = vpop.xlane.xlu0 %3591  ;;  %v7945_v58 = vld [vmem:[%s6844_s18 + $0x30] sm:$0xff]  ;;  %6055 = vrsqrt.f32 %v3156_v43 }
 0x334   : > { %v2411_v20 = vmul.f32 %v7945_v58, %v7916_v51  ;;  %10331 = vst [vmem:[#allocation33_spill] sm:$0xff] %v7950_v41  ;;  %v2717_v51 = vmul.f32 %v6046_v32, %v7306_v52  ;;  %v3239_v9 = vmul.f32 %v7950_v41, %v10329_v29  ;;  %v3351_v32 = vmul.f32 %v7945_v58, %v7950_v41  ;;  %v10338_v41 = vld [vmem:[#allocation38_spill] sm:$0xff] }
 0x335   : > { %2273 = vrot.lane.b32.xlu0 %v2235_v3, %s6518_s12  ;;  %v7953_v3 = vpop.xlane.xlu1 %3597 }
 0x336   : > { %10332 = vst [vmem:[#allocation138_spill] sm:$0xff] %v7953_v3  ;;  %v10334_v3 = vld [vmem:[#allocation34_spill] sm:$0xff]  ;;  %v7980_v11 = vmul.f32 %v7672_v18, %v2717_v51 }
 0x337   : > { %3275 = vrot.lane.b32.xlu1 %v3238_v21, %s6518_s12  ;;  %v7942_v1 = vpop.xlane.xlu0 %2056  ;;  %v6048_v21 = vpop.eup %6047 }
 0x338   : > { %10336 = vst [vmem:[#allocation140_spill] sm:$0xff] %v7980_v11  ;;  %v2769_v43 = vmul.f32 %v7980_v11, %v10329_v29 }
 0x339   : > { %2449 = vrot.lane.b32.xlu0 %v2411_v20, %s6518_s12  ;;  %v3656_v20 = vmul.f32 %v6048_v21, %v10334_v3  ;;  %v7972_v34 = vpop.xlane.xlu1 %2062  ;;  %v6050_v3 = vpop.eup %6049 }
 0x33a   : > { %10335 = vst [vmem:[#allocation34_spill] sm:$0xff] %v7972_v34  ;;  %v6052_v21 = vpop.eup %6051 }
 0x33b   : > { %3387 = vrot.lane.b32.xlu1 %v3350_v6, %s6518_s12  ;;  %v7963_v44 = vpop.xlane.xlu0 %3125  ;;  %v2670_v6 = vmul.f32 0.0078125, %v7727_v22  ;;  %v7987_v47 = vmul.f32 %v7698_v23, %v3656_v20 }
 0x33d   : > { %3277 = vrot.lane.b32.xlu0 %v3239_v9, %s6518_s12  ;;  %10337 = vst [vmem:[#allocation141_spill] sm:$0xff] %v7987_v47  ;;  %v3157_v9 = vadd.f32 1e-06, %v3141_v48  ;;  %v2686_v22 = vadd.f32 1e-06, %v2670_v6  ;;  %v7996_v34 = vpop.xlane.xlu1 %3131  ;;  %v3708_v20 = vmul.f32 %v7987_v47, %v10324_v63 }
 0x33e   : > { %10339 = vst [vmem:[#allocation38_spill] sm:$0xff] %v7996_v34 }
 0x33f   : > { %2805 = vrot.lane.b32.xlu1 %v2768_v50, %s6518_s12  ;;  %v7975_v52 = vpop.xlane.xlu0 %2655  ;;  %v3657_v50 = vmul.f32 %v6050_v3, %v7308_v54  ;;  %6057 = vrsqrt.f32 %v3157_v9  ;;  %v2671_v54 = vmul.f32 0.0078125, %v7853_v60  ;;  %v2881_v3 = vmul.f32 %v7945_v58, %v7980_v11 }
 0x340   : > { %6059 = vrsqrt.f32 %v2686_v22 }
 0x341   : > { %3389 = vrot.lane.b32.xlu0 %v3351_v32, %s6518_s12  ;;  %v2120_v32 = vmul.f32 %v6052_v21, %v10338_v41  ;;  %v8008_v6 = vmul.f32 %v7698_v23, %v3657_v50  ;;  %v6054_v41 = vpop.eup %6053  ;;  %v3820_v21 = vmul.f32 %v7921_v33, %v7987_v47  ;;  %v8018_v63 = vpop.xlane.xlu1 %2661 }
 0x342   : > { %v6056_v9 = vpop.eup %6055  ;;  %10343 = vst [vmem:[#allocation145_spill] sm:$0xff] %v8018_v63 }
 0x343   : > { %2917 = vrot.lane.b32.xlu1 %v2880_v45, %s6518_s12  ;;  %v7991_v51 = vpop.xlane.xlu0 %3595  ;;  %10341 = vst [vmem:[#allocation143_spill] sm:$0xff] %v8008_v6  ;;  %v3610_v45 = vmul.f32 0.0078125, %v7739_v27  ;;  %v8015_v60 = vmul.f32 %v7627_v26, %v2120_v32  ;;  %v3709_v27 = vmul.f32 %v8008_v6, %v10329_v29  ;;  %v10346_v32 = vld [vmem:[#allocation63_spill] sm:$0xff] }
 0x345   : > { %2807 = vrot.lane.b32.xlu0 %v2769_v43, %s6518_s12  ;;  %10342 = vst [vmem:[#allocation144_spill] sm:$0xff] %v8015_v60  ;;  %v2687_v43 = vadd.f32 1e-06, %v2671_v54  ;;  %v3626_v22 = vadd.f32 1e-06, %v3610_v45  ;;  %v2236_v54 = vmul.f32 %v10346_v32, %v8015_v60 }
 0x347   : > { %3745 = vrot.lane.b32.xlu1 %v3708_v20, %s6518_s12  ;;  %v8003_v48 = vpop.xlane.xlu0 %2060  ;;  %v2121_v20 = vmul.f32 %v6054_v41, %v7326_v28  ;;  %6061 = vrsqrt.f32 %v2687_v43  ;;  %v3611_v28 = vmul.f32 0.0078125, %v7871_v14  ;;  %v8043_v43 = vld [vmem:[%s6844_s18 + $0x38] sm:$0xff] }
 0x348   : > { %10340 = vst [vmem:[#allocation142_spill] sm:$0xff] %v8003_v48  ;;  %6063 = vrsqrt.f32 %v3626_v22  ;;  %v2412_v14 = vmul.f32 %v8043_v43, %v8015_v60 }
 0x349   : > { %2919 = vrot.lane.b32.xlu0 %v2881_v3, %s6518_s12  ;;  %v10345_v3 = vld [vmem:[#allocation39_spill] sm:$0xff]  ;;  %v8036_v29 = vmul.f32 %v7627_v26, %v2121_v20  ;;  %v6058_v45 = vpop.eup %6057  ;;  %v2075_v20 = vmul.f32 0.0078125, %v7883_v4 }
 0x34a   : > { %v3188_v33 = vmul.f32 %v6056_v9, %v10345_v3  ;;  %v2074_v9 = vmul.f32 0.0078125, %v7751_v57  ;;  %v3189_v22 = vmul.f32 %v6058_v45, %v7328_v8  ;;  %v8063_v45 = vld [vmem:[%s6844_s18 + $0x40] sm:$0xff] }
 0x34b   : > { %3857 = vrot.lane.b32.xlu1 %v3820_v21, %s6518_s12  ;;  %v8021_v50 = vpop.xlane.xlu0 %3129  ;;  %v3821_v21 = vmul.f32 %v7945_v58, %v8008_v6  ;;  %10348 = vst [vmem:[#allocation147_spill] sm:$0xff] %v8036_v29  ;;  %v6060_v58 = vpop.eup %6059  ;;  %v2091_v8 = vadd.f32 1e-06, %v2075_v20  ;;  %v2390_v20 = vmul.f32 %v7524_v31, %v7638_v49 }
 0x34c   : > { %10344 = vst [vmem:[#allocation146_spill] sm:$0xff] %v8021_v50  ;;  %v8048_v3 = vmul.f32 %v7640_v24, %v3188_v33  ;;  %v2090_v11 = vadd.f32 1e-06, %v2074_v9  ;;  %v2413_v9 = vmul.f32 %v8063_v45, %v8036_v29 }
 0x34d   : > { %3747 = vrot.lane.b32.xlu0 %v3709_v27, %s6518_s12  ;;  %v8039_v27 = vpop.xlane.xlu1 %3601 }
 0x34e   : > { %10349 = vst [vmem:[#allocation148_spill] sm:$0xff] %v8039_v27  ;;  %10350 = vst [vmem:[#allocation149_spill] sm:$0xff] %v8048_v3  ;;  %v10353_v27 = vld [vmem:[#allocation40_spill] sm:$0xff]  ;;  %v3240_v4 = vmul.f32 %v8048_v3, %v10346_v32 }
 0x34f   : > { %2275 = vrot.lane.b32.xlu1 %v2236_v54, %s6518_s12  ;;  %v8031_v41 = vpop.xlane.xlu0 %2659  ;;  %v3627_v54 = vadd.f32 1e-06, %v3611_v28  ;;  %v2718_v60 = vmul.f32 %v6060_v58, %v10353_v27  ;;  %v8068_v27 = vmul.f32 %v7640_v24, %v3189_v22  ;;  %v8072_v58 = vld [vmem:[%s6837_s23 + $0x8] sm:$0xff] }
 0x350   : > { %10347 = vst [vmem:[#allocation39_spill] sm:$0xff] %v8031_v41 }
 0x351   : > { %3859 = vrot.lane.b32.xlu0 %v3821_v21, %s6518_s12  ;;  %v10352_v21 = vld [vmem:[#allocation64_spill] sm:$0xff]  ;;  %6065 = vrsqrt.f32 %v3627_v54  ;;  %v2150_v54 = vmul.f32 %v8072_v58, %v7638_v49  ;;  %v8089_v22 = vmul.f32 %v7672_v18, %v2718_v60  ;;  %v3143_v49 = vmul.f32 0.0078125, %v7899_v25 }
 0x352   : > { %v2237_v6 = vmul.f32 %v10352_v21, %v8036_v29  ;;  %6067 = vrsqrt.f32 %v2090_v11  ;;  %v3352_v11 = vmul.f32 %v8043_v43, %v8048_v3  ;;  %v3241_v3 = vmul.f32 %v8068_v27, %v10352_v21 }
 0x353   : > { %2451 = vrot.lane.b32.xlu1 %v2412_v14, %s6518_s12  ;;  %v8053_v57 = vpop.xlane.xlu0 %3599  ;;  %v6062_v14 = vpop.eup %6061  ;;  %6069 = vrsqrt.f32 %v2091_v8  ;;  %v3159_v25 = vadd.f32 1e-06, %v3143_v49 }
 0x354   : > { %10351 = vst [vmem:[#allocation150_spill] sm:$0xff] %v8053_v57  ;;  %v6064_v63 = vpop.eup %6063  ;;  %v2719_v57 = vmul.f32 %v6062_v14, %v7334_v37  ;;  %v2770_v37 = vmul.f32 %v8089_v22, %v10346_v32 }
 0x355   : > { %v2264_v33 = vpop.permute.xlu1 %2263  ;;  %2277 = vrot.lane.b32.xlu0 %v2237_v6, %s6518_s12  ;;  %v3142_v6 = vmul.f32 0.0078125, %v7763_v15  ;;  %v2389_v15 = vmul.f32 %v7505_v30, %v7632_v2  ;;  %v3658_v48 = vmul.f32 %v6064_v63, %v10354_v61  ;;  %v3353_v61 = vmul.f32 %v8063_v45, %v8068_v27 }
 0x356   : > { %v2310_v16 = vsub.f32 %v2150_v54, %v2264_v33  ;;  %v3218_v33 = vmul.f32 %v8072_v58, %v7666_v59  ;;  %v8109_v63 = vmul.f32 %v7672_v18, %v2719_v57  ;;  %v3329_v57 = vmul.f32 %v7655_v62, %v7505_v30 }
 0x357   : > { %3279 = vrot.lane.b32.xlu1 %v3240_v4, %s6518_s12  ;;  %v2262_v28 = vpop.permute.xlu0 %2261  ;;  %v8079_v4 = vld [vmem:[%s6837_s23] sm:$0xff]  ;;  %v3158_v41 = vadd.f32 1e-06, %v3142_v6 }
 0x358   : > { %v2149_v29 = vmul.f32 %v8079_v4, %v7632_v2 }
 0x359   : > { %v2440_v47 = vpop.permute.xlu1 %2439  ;;  %2453 = vrot.lane.b32.xlu0 %v2413_v9, %s6518_s12  ;;  %6071 = vrsqrt.f32 %v3158_v41  ;;  %v8122_v41 = vmul.f32 %v7698_v23, %v3658_v48 }
 0x35a   : > { %v2486_v34 = vadd.f32 %v2440_v47, %v2390_v20  ;;  %v2309_v2 = vsub.f32 %v2149_v29, %v2262_v28  ;;  %v3217_v28 = vmul.f32 %v8079_v4, %v7655_v62  ;;  %v2882_v20 = vmul.f32 %v8043_v43, %v8089_v22 }
 0x35b   : > { %3391 = vrot.lane.b32.xlu1 %v3352_v11, %s6518_s12  ;;  %v2438_v9 = vpop.permute.xlu0 %2437  ;;  %6073 = vrsqrt.f32 %v3159_v25  ;;  %v2673_v11 = vmul.f32 0.0078125, %v7911_v0  ;;  %v2771_v62 = vmul.f32 %v8109_v63, %v10352_v21 }
 0x35c   : > { %v2503_v50 = vsel %vm2501_vm0, %v2310_v16, %v2486_v34  ;;  %v2485_v60 = vadd.f32 %v2438_v9, %v2389_v15  ;;  %v6066_v16 = vpop.eup %6065 }
 0x35d   : > { %v3268_v8 = vpop.permute.xlu1 %3267  ;;  %3281 = vrot.lane.b32.xlu0 %v3241_v3, %s6518_s12  ;;  %v2519_v14 = vmul.f32 0.088388346, %v2503_v50  ;;  %v2672_v3 = vmul.f32 0.0078125, %v7774_v53  ;;  %v3330_v50 = vmul.f32 %v7666_v59, %v7524_v31  ;;  %v6068_v53 = vpop.eup %6067  ;;  %v3659_v59 = vmul.f32 %v6066_v16, %v7336_v17 }
 0x35e   : > { %v2502_v47 = vsel %vm2501_vm0, %v2309_v2, %v2485_v60  ;;  %v3314_v15 = vsub.f32 %v3218_v33, %v3268_v8  ;;  %v6070_v48 = vpop.eup %6069  ;;  %v10355_v8 = vld [vmem:[#allocation44_spill] sm:$0xff]  ;;  %v3710_v17 = vmul.f32 %v8122_v41, %v10346_v32  ;;  %v3612_v33 = vmul.f32 0.0078125, %v7786_v7 }
 0x35f   : > { %v2518_v29 = vmul.f32 0.088388346, %v2502_v47  ;;  %2809 = vrot.lane.b32.xlu1 %v2770_v37, %s6518_s12  ;;  %v3266_v34 = vpop.permute.xlu0 %3265  ;;  %v2688_v2 = vadd.f32 1e-06, %v2672_v3  ;;  %v2122_v25 = vmul.f32 %v6068_v53, %v10355_v8  ;;  %v2748_v7 = vmul.f32 %v8072_v58, %v7692_v13  ;;  %v10401_v32 = vld [vmem:[#allocation60_spill] sm:$0xff] }
 0x360   : > { %v3313_v60 = vsub.f32 %v3217_v28, %v3266_v34  ;;  %v2123_v34 = vmul.f32 %v6070_v48, %v7354_v40  ;;  %v2859_v53 = vmul.f32 %v7684_v55, %v7505_v30 }
 0x361   : > { %v5668_v6 = vpack.c.bf16 %v2519_v14, %v2518_v29  ;;  %v3380_v54 = vpop.permute.xlu1 %3379  ;;  %3393 = vrot.lane.b32.xlu0 %v3353_v61, %s6518_s12  ;;  %v2689_v14 = vadd.f32 1e-06, %v2673_v11  ;;  %v2883_v61 = vmul.f32 %v8063_v45, %v8109_v63  ;;  %6075 = vrsqrt.f32 %v2688_v2 }
 0x362   : > { %v3426_v49 = vadd.f32 %v3380_v54, %v3330_v50  ;;  %v8144_v50 = vmul.f32 %v7698_v23, %v3659_v59  ;;  %v2860_v54 = vmul.f32 %v7692_v13, %v7524_v31  ;;  %v8158_v11 = vmul.f32 %v7627_v26, %v2122_v25 }
 0x363   : > { %5669 = vst [vmem:[%s8126_s11] sm:$0xff] %v5668_v6   ;;  %2921 = vrot.lane.b32.xlu1 %v2882_v20, %s6518_s12  ;;  %v3378_v9 = vpop.permute.xlu0 %3377  ;;  %v2747_v6 = vmul.f32 %v8079_v4, %v7684_v55  ;;  %6077 = vrsqrt.f32 %v2689_v14  ;;  %v3628_v13 = vadd.f32 1e-06, %v3612_v33  ;;  %v8166_v48 = vmul.f32 %v7627_v26, %v2123_v34 }
 0x364   : > { %v3442_v37 = vsel %vm2501_vm0, %v3314_v15, %v3426_v49  ;;  %v3425_v0 = vadd.f32 %v3378_v9, %v3329_v57  ;;  %v3822_v57 = vmul.f32 %v8043_v43, %v8122_v41  ;;  %v6072_v15 = vpop.eup %6071  ;;  %v3613_v49 = vmul.f32 0.0078125, %v7932_v36 }
 0x365   : > { %v2798_v47 = vpop.permute.xlu1 %2797  ;;  %2811 = vrot.lane.b32.xlu0 %v2771_v62, %s6518_s12  ;;  %v3458_v16 = vmul.f32 0.088388346, %v3442_v37  ;;  %v3711_v43 = vmul.f32 %v8144_v50, %v10352_v21  ;;  %v6074_v55 = vpop.eup %6073  ;;  %v2076_v2 = vmul.f32 0.0078125, %v7799_v42  ;;  %v3688_v25 = vmul.f32 %v8072_v58, %v7720_v38 }
 0x366   : > { %v3441_v29 = vsel %vm2501_vm0, %v3313_v60, %v3425_v0  ;;  %v2844_v59 = vsub.f32 %v2748_v7, %v2798_v47  ;;  %v10356_v0 = vld [vmem:[#allocation45_spill] sm:$0xff]  ;;  %v3629_v26 = vadd.f32 1e-06, %v3613_v49  ;;  %v2077_v14 = vmul.f32 0.0078125, %v7942_v1  ;;  %v8201_v49 = vld [vmem:[%s6844_s18 + $0x50] sm:$0xff] }
 0x367   : > { %v3457_v3 = vmul.f32 0.088388346, %v3441_v29  ;;  %3749 = vrot.lane.b32.xlu1 %v3710_v17, %s6518_s12  ;;  %v2796_v28 = vpop.permute.xlu0 %2795  ;;  %v3190_v8 = vmul.f32 %v6072_v15, %v10356_v0  ;;  %v10357_v17 = vld [vmem:[#allocation73_spill] sm:$0xff]  ;;  %v3687_v29 = vmul.f32 %v8079_v4, %v7712_v5  ;;  %6079 = vrsqrt.f32 %v3628_v13 }
 0x368   : > { %v2843_v60 = vsub.f32 %v2747_v6, %v2796_v28  ;;  %v2238_v33 = vmul.f32 %v10357_v17, %v8158_v11  ;;  %v2092_v7 = vadd.f32 1e-06, %v2076_v2  ;;  %v3800_v1 = vmul.f32 %v7720_v38, %v7524_v31  ;;  %v10359_v2 = vld [vmem:[#allocation46_spill] sm:$0xff] }
 0x369   : > { %v5748_v40 = vpack.c.bf16 %v3458_v16, %v3457_v3  ;;  %v2910_v20 = vpop.permute.xlu1 %2909  ;;  %2923 = vrot.lane.b32.xlu0 %v2883_v61, %s6518_s12  ;;  %v3191_v61 = vmul.f32 %v6074_v55, %v7356_v35  ;;  %v10358_v3 = vld [vmem:[#allocation74_spill] sm:$0xff]  ;;  %v3799_v6 = vmul.f32 %v7712_v5, %v7505_v30  ;;  %v3144_v35 = vmul.f32 0.0078125, %v7817_v10 }
 0x36a   : > { %v2956_v9 = vadd.f32 %v2910_v20, %v2860_v54  ;;  %v2239_v28 = vmul.f32 %v10358_v3, %v8166_v48  ;;  %6081 = vrsqrt.f32 %v3629_v26  ;;  %v2093_v38 = vadd.f32 1e-06, %v2077_v14 }
 0x36b   : > { %5840 = vst [vmem:[%s8126_s11 + $0x80] sm:$0xff] %v5748_v40   ;;  %3861 = vrot.lane.b32.xlu1 %v3822_v57, %s6518_s12  ;;  %v2908_v62 = vpop.permute.xlu0 %2907  ;;  %v8191_v40 = vld [vmem:[%s6844_s18 + $0x48] sm:$0xff]  ;;  %v8196_v57 = vmul.f32 %v7640_v24, %v3190_v8  ;;  %6083 = vrsqrt.f32 %v2092_v7  ;;  %v3160_v0 = vadd.f32 1e-06, %v3144_v35 }
 0x36c   : > { %v2972_v37 = vsel %vm2501_vm0, %v2844_v59, %v2956_v9  ;;  %v2955_v36 = vadd.f32 %v2908_v62, %v2859_v53  ;;  %v2414_v20 = vmul.f32 %v8191_v40, %v8158_v11  ;;  %v6076_v53 = vpop.eup %6075  ;;  %v2415_v59 = vmul.f32 %v8201_v49, %v8166_v48 }
 0x36d   : > { %v3738_v47 = vpop.permute.xlu1 %3737  ;;  %3751 = vrot.lane.b32.xlu0 %v3711_v43, %s6518_s12  ;;  %v2988_v34 = vmul.f32 0.088388346, %v2972_v37  ;;  %v8206_v9 = vmul.f32 %v7640_v24, %v3191_v61  ;;  %v6078_v13 = vpop.eup %6077  ;;  %6085 = vrsqrt.f32 %v2093_v38  ;;  %v3145_v24 = vmul.f32 0.0078125, %v7963_v44 }
 0x36e   : > { %v2971_v42 = vsel %vm2501_vm0, %v2843_v60, %v2955_v36  ;;  %v3784_v15 = vsub.f32 %v3688_v25, %v3738_v47  ;;  %v2720_v60 = vmul.f32 %v6076_v53, %v10359_v2  ;;  %v3242_v36 = vmul.f32 %v8196_v57, %v10357_v17 }
 0x36f   : > { %v2987_v16 = vmul.f32 0.088388346, %v2971_v42  ;;  %2279 = vrot.lane.b32.xlu1 %v2238_v33, %s6518_s12  ;;  %v3736_v58 = vpop.permute.xlu0 %3735  ;;  %v2721_v25 = vmul.f32 %v6078_v13, %v7362_v56  ;;  %v3243_v14 = vmul.f32 %v8206_v9, %v10358_v3  ;;  %v3354_v44 = vmul.f32 %v8191_v40, %v8196_v57 }
 0x370   : > { %v3783_v62 = vsub.f32 %v3687_v29, %v3736_v58  ;;  %v8227_v61 = vmul.f32 %v7672_v18, %v2720_v60  ;;  %6087 = vrsqrt.f32 %v3160_v0  ;;  %v3355_v58 = vmul.f32 %v8201_v49, %v8206_v9  ;;  %v10362_v60 = vld [vmem:[#allocation55_spill] sm:$0xff]  ;;  %v8264_v0 = vld [vmem:[%s6837_s23 + $0x18] sm:$0xff] }
 0x371   : > { %v5708_v4 = vpack.c.bf16 %v2988_v34, %v2987_v16  ;;  %v3850_v54 = vpop.permute.xlu1 %3849  ;;  %2281 = vrot.lane.b32.xlu0 %v2239_v28, %s6518_s12  ;;  %v6080_v56 = vpop.eup %6079  ;;  %v3161_v34 = vadd.f32 1e-06, %v3145_v24  ;;  %v8234_v28 = vmul.f32 %v7672_v18, %v2721_v25  ;;  %v10363_v24 = vld [vmem:[#allocation131_spill] sm:$0xff] }
 0x372   : > { %v3896_v5 = vadd.f32 %v3850_v54, %v3800_v1  ;;  %v2674_v1 = vmul.f32 0.0078125, %v7841_v46 }
 0x373   : > { %5832 = vst [vmem:[%s8126_s11 + $0x40] sm:$0xff] %v5708_v4   ;;  %2455 = vrot.lane.b32.xlu1 %v2414_v20, %s6518_s12  ;;  %v3848_v10 = vpop.permute.xlu0 %3847  ;;  %v2772_v4 = vmul.f32 %v8227_v61, %v10357_v17  ;;  %6089 = vrsqrt.f32 %v3161_v34  ;;  %v2675_v20 = vmul.f32 0.0078125, %v7975_v52 }
 0x374   : > { %v3912_v43 = vsel %vm2501_vm0, %v3784_v15, %v3896_v5  ;;  %v3895_v55 = vadd.f32 %v3848_v10, %v3799_v6  ;;  %v6082_v7 = vpop.eup %6081  ;;  %v3660_v6 = vmul.f32 %v6080_v56, %v7344_v39  ;;  %v2773_v39 = vmul.f32 %v8234_v28, %v10358_v3  ;;  %v10360_v15 = vld [vmem:[#allocation98_spill] sm:$0xff]  ;;  %v10361_v10 = vld [vmem:[#allocation49_spill] sm:$0xff] }
 0x375   : > { %v8210_v37 = vpop.permute.xlu1 %3269  ;;  %2457 = vrot.lane.b32.xlu0 %v2415_v59, %s6518_s12  ;;  %v3928_v47 = vmul.f32 0.088388346, %v3912_v43  ;;  %v6084_v54 = vpop.eup %6083  ;;  %v3661_v18 = vmul.f32 %v6082_v7, %v7364_v12  ;;  %v2690_v38 = vadd.f32 1e-06, %v2674_v1  ;;  %v2391_v5 = vmul.f32 %v10360_v15, %v7736_v19  ;;  %v8258_v43 = vld [vmem:[%s6837_s23 + $0x10] sm:$0xff] }
 0x376   : > { %v3911_v8 = vsel %vm2501_vm0, %v3783_v62, %v3895_v55  ;;  %v2124_v59 = vmul.f32 %v6084_v54, %v10361_v10  ;;  %v2884_v12 = vmul.f32 %v8191_v40, %v8227_v61  ;;  %v8255_v52 = vmul.f32 %v7698_v23, %v3660_v6  ;;  %v8283_v1 = vld [vmem:[#allocation8] ss:$0 sm:$0xff]  ;;  %v10366_v54 = vld [vmem:[#allocation128_spill] sm:$0xff] }
 0x377   : > { %v3927_v33 = vmul.f32 0.088388346, %v3911_v8  ;;  %3283 = vrot.lane.b32.xlu1 %v3242_v36, %s6518_s12  ;;  %v2266_v26 = vpop.permute.xlu0 %2265  ;;  %v6086_v53 = vpop.eup %6085  ;;  %v2691_v62 = vadd.f32 1e-06, %v2675_v20  ;;  %v2151_v55 = vmul.f32 %v8258_v43, %v7736_v19  ;;  %v2152_v8 = vmul.f32 %v8264_v0, %v10363_v24  ;;  %v10364_v19 = vld [vmem:[#allocation28_spill] sm:$0xff] }
 0x378   : > { %v2125_v36 = vmul.f32 %v6086_v53, %v10362_v60  ;;  %6091 = vrsqrt.f32 %v2690_v38  ;;  %v3712_v7 = vmul.f32 %v8255_v52, %v10357_v17  ;;  %v3331_v20 = vmul.f32 %v10366_v54, %v10360_v15  ;;  %v10368_v38 = vld [vmem:[#allocation50_spill] sm:$0xff] }
 0x379   : > { %v5788_v42 = vpack.c.bf16 %v3928_v47, %v3927_v33  ;;  %v8221_v29 = vpop.permute.xlu1 %2799  ;;  %3285 = vrot.lane.b32.xlu0 %v3243_v14, %s6518_s12  ;;  %v2885_v47 = vmul.f32 %v8201_v49, %v8234_v28  ;;  %v8274_v33 = vmul.f32 %v7698_v23, %v3661_v18  ;;  %v3614_v14 = vmul.f32 0.0078125, %v10364_v19 }
 0x37a   : > { %v6088_v34 = vpop.eup %6087  ;;  %v8286_v23 = vmul.f32 %v8283_v1, %v2124_v59  ;;  %6093 = vrsqrt.f32 %v2691_v62  ;;  %v10369_v59 = vld [vmem:[#allocation30_spill] sm:$0xff]  ;;  %v3219_v19 = vmul.f32 %v8258_v43, %v10366_v54 }
 0x37b   : > { %5848 = vst [vmem:[%s8126_s11 + $0xc0] sm:$0xff] %v5788_v42   ;;  %3395 = vrot.lane.b32.xlu1 %v3354_v44, %s6518_s12  ;;  %v2442_v16 = vpop.permute.xlu0 %2441  ;;  %v2311_v42 = vsub.f32 %v2151_v55, %v2266_v26  ;;  %v10365_v44 = vld [vmem:[#allocation103_spill] sm:$0xff]  ;;  %v3713_v18 = vmul.f32 %v8274_v33, %v10358_v3  ;;  %v3630_v10 = vadd.f32 1e-06, %v3614_v14 }
 0x37c   : > { %v2487_v2 = vadd.f32 %v2442_v16, %v2391_v5  ;;  %v2392_v56 = vmul.f32 %v10365_v44, %v10363_v24  ;;  %v3615_v16 = vmul.f32 0.0078125, %v7991_v51  ;;  %v3192_v5 = vmul.f32 %v6088_v34, %v10368_v38  ;;  %v10370_v24 = vld [vmem:[#allocation79_spill] sm:$0xff]  ;;  %v8326_v38 = vld [vmem:[#allocation8 + $0x2] ss:$0 sm:$0xff] }
 0x37d   : > { %v8238_v35 = vpop.permute.xlu1 %3739  ;;  %3397 = vrot.lane.b32.xlu0 %v3355_v58, %s6518_s12  ;;  %v6090_v53 = vpop.eup %6089  ;;  %6095 = vrsqrt.f32 %v3630_v10 }
 0x37e   : > { %v2504_v26 = vsel %vm2501_vm0, %v2311_v42, %v2487_v2  ;;  %v3631_v62 = vadd.f32 1e-06, %v3615_v16  ;;  %v10372_v42 = vld [vmem:[#allocation56_spill] sm:$0xff]  ;;  %v10373_v16 = vld [vmem:[#allocation133_spill] sm:$0xff]  ;;  %v8329_v10 = vmul.f32 %v8326_v38, %v3192_v5 }
 0x37f   : > { %2813 = vrot.lane.b32.xlu1 %v2772_v4, %s6518_s12  ;;  %v3382_v46 = vpop.permute.xlu0 %3381  ;;  %v2520_v55 = vmul.f32 0.088388346, %v2504_v26  ;;  %v10374_v26 = vld [vmem:[#allocation80_spill] sm:$0xff] }
 0x380   : > { %v3427_v14 = vadd.f32 %v3382_v46, %v3331_v20  ;;  %v3332_v46 = vmul.f32 %v10373_v16, %v10365_v44  ;;  %6097 = vrsqrt.f32 %v3631_v62  ;;  %v8322_v20 = vld [vmem:[%s6844_s18 + $0x58] sm:$0xff] }
 0x381   : > { %v2268_v13 = vpop.permute.xlu1 %2267  ;;  %2815 = vrot.lane.b32.xlu0 %v2773_v39, %s6518_s12  ;;  %v8297_v39 = vmul.f32 %v8283_v1, %v2125_v36  ;;  %v10371_v36 = vld [vmem:[#allocation142_spill] sm:$0xff] }
 0x382   : > { %v2312_v6 = vsub.f32 %v2152_v8, %v2268_v13  ;;  %v2078_v13 = vmul.f32 0.0078125, %v10369_v59  ;;  %v2240_v8 = vmul.f32 %v10370_v24, %v8286_v23 }
 0x383   : > { %2925 = vrot.lane.b32.xlu1 %v2884_v12, %s6518_s12  ;;  %v8269_v25 = vpop.permute.xlu0 %2911  ;;  %10367 = vst [vmem:[#allocation40_spill] sm:$0xff] %v8297_v39 }
 0x385   : > { %v2444_v58 = vpop.permute.xlu1 %2443  ;;  %2927 = vrot.lane.b32.xlu0 %v2885_v47, %s6518_s12  ;;  %v2079_v47 = vmul.f32 0.0078125, %v10371_v36 }
 0x386   : > { %v2488_v4 = vadd.f32 %v2444_v58, %v2392_v56  ;;  %v3193_v56 = vmul.f32 %v6090_v53, %v10372_v42  ;;  %v3220_v58 = vmul.f32 %v8264_v0, %v10373_v16  ;;  %v2416_v53 = vmul.f32 %v8322_v20, %v8286_v23 }
 0x387   : > { %3753 = vrot.lane.b32.xlu1 %v3712_v7, %s6518_s12  ;;  %v8292_v51 = vpop.permute.xlu0 %3851  ;;  %v2095_v59 = vadd.f32 1e-06, %v2079_v47 }
 0x388   : > { %v2505_v12 = vsel %vm2501_vm0, %v2312_v6, %v2488_v4  ;;  %v2241_v6 = vmul.f32 %v10374_v26, %v8297_v39  ;;  %v2094_v4 = vadd.f32 1e-06, %v2078_v13  ;;  %v8341_v36 = vmul.f32 %v8326_v38, %v3193_v56 }
 0x389   : > { %v2521_v2 = vmul.f32 0.088388346, %v2505_v12  ;;  %v3272_v60 = vpop.permute.xlu1 %3271  ;;  %3755 = vrot.lane.b32.xlu0 %v3713_v18, %s6518_s12  ;;  %v3315_v18 = vsub.f32 %v3219_v19, %v8210_v37  ;;  %v6092_v37 = vpop.eup %6091  ;;  %v10376_v19 = vld [vmem:[#allocation36_spill] sm:$0xff]  ;;  %v3244_v56 = vmul.f32 %v8329_v10, %v10370_v24 }
 0x38a   : > { %v3316_v12 = vsub.f32 %v3220_v58, %v3272_v60  ;;  %10375 = vst [vmem:[#allocation41_spill] sm:$0xff] %v8341_v36  ;;  %v6094_v5 = vpop.eup %6093  ;;  %6099 = vrsqrt.f32 %v2094_v4  ;;  %v3146_v47 = vmul.f32 0.0078125, %v10376_v19  ;;  %v10379_v4 = vld [vmem:[#allocation146_spill] sm:$0xff] }
 0x38b   : > { %v5673_v34 = vpack.c.bf16 %v2521_v2, %v2520_v55  ;;  %2283 = vrot.lane.b32.xlu1 %v2240_v8, %s6518_s12  ;;  %v8312_v7 = vpop.permute.xlu0 %2269  ;;  %v3443_v13 = vsel %vm2501_vm0, %v3315_v18, %v3427_v14  ;;  %v8336_v2 = vld [vmem:[%s6844_s18 + $0x60] sm:$0xff]  ;;  %v10377_v14 = vld [vmem:[#allocation129_spill] sm:$0xff]  ;;  %6101 = vrsqrt.f32 %v2095_v59 }
 0x38c   : > { %v2417_v8 = vmul.f32 %v8336_v2, %v8297_v39  ;;  %v2861_v60 = vmul.f32 %v10377_v14, %v10360_v15  ;;  %v3459_v58 = vmul.f32 0.088388346, %v3443_v13  ;;  %v3162_v19 = vadd.f32 1e-06, %v3146_v47  ;;  %v6096_v47 = vpop.eup %6095  ;;  %v10411_v39 = vld [vmem:[#allocation67_spill] sm:$0xff] }
 0x38d   : > { %5825 = vst [vmem:[%s8126_s11 + $0x8] sm:$0xff] %v5673_v34   ;;  %v3384_v54 = vpop.permute.xlu1 %3383  ;;  %2285 = vrot.lane.b32.xlu0 %v2241_v6, %s6518_s12  ;;  %v10378_v34 = vld [vmem:[#allocation51_spill] sm:$0xff] }
 0x38e   : > { %v3428_v62 = vadd.f32 %v3384_v54, %v3332_v46  ;;  %v2722_v16 = vmul.f32 %v6092_v37, %v10378_v34  ;;  %v3147_v46 = vmul.f32 0.0078125, %v10379_v4  ;;  %v2749_v54 = vmul.f32 %v8258_v43, %v10377_v14 }
 0x38f   : > { %2459 = vrot.lane.b32.xlu1 %v2416_v53, %s6518_s12  ;;  %v8333_v55 = vpop.permute.xlu0 %2445  ;;  %v2957_v53 = vadd.f32 %v8269_v25, %v2861_v60  ;;  %v8370_v60 = vld [vmem:[#allocation8 + $0x1] ss:$0 sm:$0xff]  ;;  %6103 = vrsqrt.f32 %v3162_v19  ;;  %v10387_v19 = vld [vmem:[#allocation39_spill] sm:$0xff] }
 0x390   : > { %v3444_v42 = vsel %vm2501_vm0, %v3316_v12, %v3428_v62  ;;  %v10380_v12 = vld [vmem:[#allocation57_spill] sm:$0xff]  ;;  %v2845_v59 = vsub.f32 %v2749_v54, %v8221_v29  ;;  %v3163_v29 = vadd.f32 1e-06, %v3147_v46  ;;  %v6098_v54 = vpop.eup %6097  ;;  %v10385_v46 = vld [vmem:[#allocation130_spill] sm:$0xff] }
 0x391   : > { %v3460_v6 = vmul.f32 0.088388346, %v3444_v42  ;;  %v2802_v18 = vpop.permute.xlu1 %2801  ;;  %2461 = vrot.lane.b32.xlu0 %v2417_v8, %s6518_s12  ;;  %v2723_v62 = vmul.f32 %v6094_v5, %v10380_v12  ;;  %v3245_v8 = vmul.f32 %v8341_v36, %v10374_v26  ;;  %v10381_v42 = vld [vmem:[#allocation134_spill] sm:$0xff]  ;;  %v3356_v5 = vmul.f32 %v8322_v20, %v8329_v10 }
 0x392   : > { %v2750_v34 = vmul.f32 %v8264_v0, %v10381_v42  ;;  %v2862_v14 = vmul.f32 %v10381_v42, %v10365_v44  ;;  %v3801_v31 = vmul.f32 %v10385_v46, %v10360_v15  ;;  %6105 = vrsqrt.f32 %v3163_v29 }
 0x393   : > { %v5753_v37 = vpack.c.bf16 %v3460_v6, %v3459_v58  ;;  %3287 = vrot.lane.b32.xlu1 %v3244_v56, %s6518_s12  ;;  %v8357_v13 = vpop.permute.xlu0 %3273  ;;  %v8373_v58 = vmul.f32 %v8370_v60, %v2722_v16  ;;  %v2973_v6 = vsel %vm2501_vm0, %v2845_v59, %v2957_v53  ;;  %v10384_v16 = vld [vmem:[#allocation37_spill] sm:$0xff]  ;;  %v10386_v53 = vld [vmem:[#allocation52_spill] sm:$0xff]  ;;  %v3689_v30 = vmul.f32 %v8258_v43, %v10385_v46  ;;  %v10390_v43 = vld [vmem:[#allocation59_spill] sm:$0xff] }
 0x394   : > { %v2846_v56 = vsub.f32 %v2750_v34, %v2802_v18  ;;  %v2676_v42 = vmul.f32 0.0078125, %v10384_v16  ;;  %v3662_v59 = vmul.f32 %v6096_v47, %v10386_v53  ;;  %v2989_v34 = vmul.f32 0.088388346, %v2973_v6 }
 0x395   : > { %5841 = vst [vmem:[%s8126_s11 + $0x88] sm:$0xff] %v5753_v37   ;;  %v2914_v25 = vpop.permute.xlu1 %2913  ;;  %3289 = vrot.lane.b32.xlu0 %v3245_v8, %s6518_s12  ;;  %10382 = vst [vmem:[#allocation44_spill] sm:$0xff] %v8373_v58  ;;  %v3357_v37 = vmul.f32 %v8336_v2, %v8341_v36  ;;  %v8382_v8 = vmul.f32 %v8370_v60, %v2723_v62  ;;  %v6100_v62 = vpop.eup %6099  ;;  %v2677_v16 = vmul.f32 0.0078125, %v10387_v19  ;;  %v10389_v19 = vld [vmem:[#allocation135_spill] sm:$0xff]  ;;  %v10403_v36 = vld [vmem:[#allocation66_spill] sm:$0xff] }
 0x396   : > { %v2958_v4 = vadd.f32 %v2914_v25, %v2862_v14  ;;  %v6102_v53 = vpop.eup %6101  ;;  %v2692_v15 = vadd.f32 1e-06, %v2676_v42  ;;  %v3785_v29 = vsub.f32 %v3689_v30, %v8238_v35  ;;  %v3690_v17 = vmul.f32 %v8264_v0, %v10389_v19 }
 0x397   : > { %3399 = vrot.lane.b32.xlu1 %v3356_v5, %s6518_s12  ;;  %v8377_v12 = vpop.permute.xlu0 %3385  ;;  %10383 = vst [vmem:[#allocation45_spill] sm:$0xff] %v8382_v8  ;;  %v2774_v5 = vmul.f32 %v8373_v58, %v10370_v24  ;;  %v2886_v46 = vmul.f32 %v8322_v20, %v8373_v58  ;;  %v2693_v30 = vadd.f32 1e-06, %v2677_v16 }
 0x398   : > { %v2974_v18 = vsel %vm2501_vm0, %v2846_v56, %v2958_v4  ;;  %v3897_v56 = vadd.f32 %v8292_v51, %v3801_v31  ;;  %v10388_v4 = vld [vmem:[#allocation58_spill] sm:$0xff]  ;;  %v3802_v31 = vmul.f32 %v10389_v19, %v10365_v44  ;;  %v2126_v51 = vmul.f32 %v6100_v62, %v10390_v43  ;;  %v10393_v19 = vld [vmem:[#allocation132_spill] sm:$0xff] }
 0x399   : > { %v2990_v14 = vmul.f32 0.088388346, %v2974_v18  ;;  %v3742_v25 = vpop.permute.xlu1 %3741  ;;  %3401 = vrot.lane.b32.xlu0 %v3357_v37, %s6518_s12  ;;  %v3663_v47 = vmul.f32 %v6098_v54, %v10388_v4  ;;  %v2775_v37 = vmul.f32 %v8382_v8, %v10374_v26  ;;  %6107 = vrsqrt.f32 %v2692_v15  ;;  %v6104_v15 = vpop.eup %6103 }
 0x39a   : > { %v3913_v35 = vsel %vm2501_vm0, %v3785_v29, %v3897_v56  ;;  %v3786_v0 = vsub.f32 %v3690_v17, %v3742_v25  ;;  %v10394_v56 = vld [vmem:[#allocation104_spill] sm:$0xff]  ;;  %6109 = vrsqrt.f32 %v2693_v30  ;;  %v3194_v3 = vmul.f32 %v6104_v15, %v10401_v32  ;;  %v10404_v32 = vld [vmem:[#allocation86_spill] sm:$0xff] }
 0x39b   : > { %v5713_v6 = vpack.c.bf16 %v2990_v14, %v2989_v34  ;;  %2817 = vrot.lane.b32.xlu1 %v2774_v5, %s6518_s12  ;;  %v8398_v18 = vpop.permute.xlu0 %2803  ;;  %v8412_v34 = vld [vmem:[#allocation8 + $0x3] ss:$0 sm:$0xff]  ;;  %v10391_v5 = vld [vmem:[#allocation65_spill] sm:$0xff]  ;;  %v2393_v17 = vmul.f32 %v10394_v56, %v10393_v19 }
 0x39c   : > { %v8415_v42 = vmul.f32 %v8412_v34, %v3662_v59  ;;  %v2127_v4 = vmul.f32 %v6102_v53, %v10391_v5  ;;  %v10392_v59 = vld [vmem:[#allocation138_spill] sm:$0xff]  ;;  %v3929_v53 = vmul.f32 0.088388346, %v3913_v35  ;;  %v6106_v44 = vpop.eup %6105 }
 0x39d   : > { %5833 = vst [vmem:[%s8126_s11 + $0x48] sm:$0xff] %v5713_v6   ;;  %v3854_v54 = vpop.permute.xlu1 %3853  ;;  %2819 = vrot.lane.b32.xlu0 %v2775_v37, %s6518_s12  ;;  %v2887_v6 = vmul.f32 %v8336_v2, %v8382_v8  ;;  %v8425_v37 = vmul.f32 %v8412_v34, %v3663_v47  ;;  %v3616_v16 = vmul.f32 0.0078125, %v10392_v59  ;;  %v8435_v47 = vmul.f32 %v8283_v1, %v2126_v51  ;;  %v8439_v5 = vld [vmem:[%s6837_s23 + $0x20] sm:$0xff]  ;;  %v10397_v59 = vld [vmem:[#allocation136_spill] sm:$0xff] }
 0x39e   : > { %v3898_v14 = vadd.f32 %v3854_v54, %v3802_v31  ;;  %v3714_v43 = vmul.f32 %v8415_v42, %v10370_v24  ;;  %v10396_v54 = vld [vmem:[#allocation150_spill] sm:$0xff]  ;;  %v2153_v35 = vmul.f32 %v8439_v5, %v10393_v19 }
 0x39f   : > { %2929 = vrot.lane.b32.xlu1 %v2886_v46, %s6518_s12  ;;  %v8420_v62 = vpop.permute.xlu0 %2915  ;;  %10395 = vst [vmem:[#allocation46_spill] sm:$0xff] %v8435_v47  ;;  %v3617_v46 = vmul.f32 0.0078125, %v10396_v54  ;;  %v3715_v30 = vmul.f32 %v8425_v37, %v10374_v26  ;;  %v8455_v54 = vmul.f32 %v8283_v1, %v2127_v4  ;;  %v3632_v19 = vadd.f32 1e-06, %v3616_v16  ;;  %v10399_v24 = vld [vmem:[#allocation34_spill] sm:$0xff]  ;;  %v10402_v26 = vld [vmem:[#allocation85_spill] sm:$0xff] }
 0x3a0   : > { %v3914_v25 = vsel %vm2501_vm0, %v3786_v0, %v3898_v14  ;;  %v2489_v0 = vadd.f32 %v8333_v55, %v2393_v17  ;;  %v2080_v55 = vmul.f32 0.0078125, %v10399_v24  ;;  %v2313_v17 = vsub.f32 %v2153_v35, %v8312_v7 }
 0x3a1   : > { %v3930_v29 = vmul.f32 0.088388346, %v3914_v25  ;;  %v2272_v31 = vpop.permute.xlu1 %2271  ;;  %2931 = vrot.lane.b32.xlu0 %v2887_v6, %s6518_s12  ;;  %v8445_v6 = vld [vmem:[%s6837_s23 + $0x28] sm:$0xff]  ;;  %10398 = vst [vmem:[#allocation49_spill] sm:$0xff] %v8455_v54  ;;  %v2242_v21 = vmul.f32 %v10402_v26, %v8435_v47  ;;  %v3633_v4 = vadd.f32 1e-06, %v3617_v46  ;;  %v3195_v7 = vmul.f32 %v6106_v44, %v10403_v36 }
 0x3a2   : > { %v2154_v25 = vmul.f32 %v8445_v6, %v10397_v59  ;;  %v2506_v16 = vsel %vm2501_vm0, %v2313_v17, %v2489_v0  ;;  %v2243_v15 = vmul.f32 %v10404_v32, %v8455_v54  ;;  %6111 = vrsqrt.f32 %v3632_v19  ;;  %v8478_v44 = vld [vmem:[%s6844_s18 + $0x68] sm:$0xff] }
 0x3a3   : > { %v5793_v14 = vpack.c.bf16 %v3930_v29, %v3929_v53  ;;  %3757 = vrot.lane.b32.xlu1 %v3714_v43, %s6518_s12  ;;  %v8450_v51 = vpop.permute.xlu0 %3743  ;;  %v10400_v53 = vld [vmem:[#allocation109_spill] sm:$0xff]  ;;  %v2522_v0 = vmul.f32 0.088388346, %v2506_v16  ;;  %v8483_v36 = vmul.f32 %v8326_v38, %v3194_v3  ;;  %v6108_v19 = vpop.eup %6107  ;;  %6113 = vrsqrt.f32 %v3633_v4 }
 0x3a4   : > { %v2394_v29 = vmul.f32 %v10400_v53, %v10397_v59  ;;  %v2314_v8 = vsub.f32 %v2154_v25, %v2272_v31  ;;  %v10405_v59 = vld [vmem:[#allocation27_spill] sm:$0xff]  ;;  %v8499_v4 = vmul.f32 %v8326_v38, %v3195_v7 }
 0x3a5   : > { %5849 = vst [vmem:[%s8126_s11 + $0xc8] sm:$0xff] %v5793_v14   ;;  %v2448_v43 = vpop.permute.xlu1 %2447  ;;  %3759 = vrot.lane.b32.xlu0 %v3715_v30, %s6518_s12  ;;  %v2096_v14 = vadd.f32 1e-06, %v2080_v55  ;;  %v3333_v30 = vmul.f32 %v10405_v59, %v10394_v56  ;;  %10406 = vst [vmem:[#allocation55_spill] sm:$0xff] %v8483_v36 }
 0x3a6   : > { %v2490_v24 = vadd.f32 %v2448_v43, %v2394_v29  ;;  %v10407_v29 = vld [vmem:[#allocation137_spill] sm:$0xff]  ;;  %10408 = vst [vmem:[#allocation131_spill] sm:$0xff] %v8499_v4 }
 0x3a7   : > { %2287 = vrot.lane.b32.xlu1 %v2242_v21, %s6518_s12  ;;  %v8469_v35 = vpop.permute.xlu0 %3855  ;;  %v2418_v21 = vmul.f32 %v8478_v44, %v8435_v47  ;;  %v3429_v55 = vadd.f32 %v8377_v12, %v3333_v30  ;;  %v3222_v43 = vmul.f32 %v8445_v6, %v10407_v29  ;;  %6115 = vrsqrt.f32 %v2096_v14 }
 0x3a8   : > { %v2507_v46 = vsel %vm2501_vm0, %v2314_v8, %v2490_v24  ;;  %v3221_v8 = vmul.f32 %v8439_v5, %v10405_v59  ;;  %v8494_v24 = vld [vmem:[%s6844_s18 + $0x70] sm:$0xff]  ;;  %v10409_v59 = vld [vmem:[#allocation38_spill] sm:$0xff] }
 0x3a9   : > { %v2523_v31 = vmul.f32 0.088388346, %v2507_v46  ;;  %v3276_v25 = vpop.permute.xlu1 %3275  ;;  %2289 = vrot.lane.b32.xlu0 %v2243_v15, %s6518_s12  ;;  %v2419_v3 = vmul.f32 %v8494_v24, %v8455_v54  ;;  %v6110_v15 = vpop.eup %6109  ;;  %v3148_v12 = vmul.f32 0.0078125, %v10409_v59  ;;  %v3334_v46 = vmul.f32 %v10407_v29, %v10400_v53 }
 0x3aa   : > { %v3317_v30 = vsub.f32 %v3221_v8, %v8357_v13  ;;  %v3246_v54 = vmul.f32 %v8483_v36, %v10402_v26  ;;  %v3318_v47 = vsub.f32 %v3222_v43, %v3276_v25  ;;  %v2725_v59 = vmul.f32 %v6110_v15, %v10411_v39 }
 0x3ab   : > { %v5678_v17 = vpack.c.bf16 %v2523_v31, %v2522_v0  ;;  %2463 = vrot.lane.b32.xlu1 %v2418_v21, %s6518_s12  ;;  %v8491_v16 = vpop.permute.xlu0 %2273  ;;  %v10410_v0 = vld [vmem:[#allocation61_spill] sm:$0xff]  ;;  %v3164_v8 = vadd.f32 1e-06, %v3148_v12  ;;  %v3358_v39 = vmul.f32 %v8478_v44, %v8483_v36 }
 0x3ac   : > { %v2724_v31 = vmul.f32 %v6108_v19, %v10410_v0  ;;  %v3445_v7 = vsel %vm2501_vm0, %v3317_v30, %v3429_v55  ;;  %v3247_v19 = vmul.f32 %v8499_v4, %v10404_v32  ;;  %v6112_v25 = vpop.eup %6111 }
 0x3ad   : > { %5826 = vst [vmem:[%s8126_s11 + $0x10] sm:$0xff] %v5678_v17   ;;  %v3388_v21 = vpop.permute.xlu1 %3387  ;;  %2465 = vrot.lane.b32.xlu0 %v2419_v3, %s6518_s12  ;;  %v10412_v17 = vld [vmem:[#allocation29_spill] sm:$0xff]  ;;  %v3461_v0 = vmul.f32 0.088388346, %v3445_v7  ;;  %v6114_v7 = vpop.eup %6113  ;;  %6117 = vrsqrt.f32 %v3164_v8 }
 0x3ae   : > { %v3430_v14 = vadd.f32 %v3388_v21, %v3334_v46  ;;  %v2863_v29 = vmul.f32 %v10412_v17, %v10394_v56  ;;  %v2751_v43 = vmul.f32 %v8439_v5, %v10412_v17  ;;  %v3359_v21 = vmul.f32 %v8494_v24, %v8499_v4  ;;  %v10415_v17 = vld [vmem:[#allocation62_spill] sm:$0xff] }
 0x3af   : > { %3291 = vrot.lane.b32.xlu1 %v3246_v54, %s6518_s12  ;;  %v8513_v13 = vpop.permute.xlu0 %2449  ;;  %v8524_v54 = vmul.f32 %v8370_v60, %v2724_v31  ;;  %v8537_v31 = vmul.f32 %v8370_v60, %v2725_v59 }
 0x3b0   : > { %v3446_v3 = vsel %vm2501_vm0, %v3318_v47, %v3430_v14  ;;  %v2959_v15 = vadd.f32 %v8420_v62, %v2863_v29  ;;  %v10413_v47 = vld [vmem:[#allocation139_spill] sm:$0xff]  ;;  %v10414_v14 = vld [vmem:[#allocation145_spill] sm:$0xff]  ;;  %v2847_v62 = vsub.f32 %v2751_v43, %v8398_v18  ;;  %v3664_v29 = vmul.f32 %v6112_v25, %v10415_v17 }
 0x3b1   : > { %v3462_v58 = vmul.f32 0.088388346, %v3446_v3  ;;  %v2806_v55 = vpop.permute.xlu1 %2805  ;;  %3293 = vrot.lane.b32.xlu0 %v3247_v19, %s6518_s12  ;;  %v2752_v30 = vmul.f32 %v8445_v6, %v10413_v47  ;;  %v2678_v19 = vmul.f32 0.0078125, %v10414_v14  ;;  %v6116_v59 = vpop.eup %6115  ;;  %v10416_v14 = vld [vmem:[#allocation68_spill] sm:$0xff]  ;;  %v2777_v25 = vmul.f32 %v8537_v31, %v10404_v32 }
 0x3b2   : > { %v3665_v36 = vmul.f32 %v6114_v7, %v10416_v14  ;;  %v8563_v17 = vmul.f32 %v8412_v34, %v3664_v29  ;;  %v10420_v29 = vld [vmem:[#allocation148_spill] sm:$0xff] }
 0x3b3   : > { %v5758_v12 = vpack.c.bf16 %v3462_v58, %v3461_v0  ;;  %3403 = vrot.lane.b32.xlu1 %v3358_v39, %s6518_s12  ;;  %v8532_v46 = vpop.permute.xlu0 %3277  ;;  %v2864_v58 = vmul.f32 %v10413_v47, %v10400_v53  ;;  %v2776_v0 = vmul.f32 %v8524_v54, %v10402_v26  ;;  %v2975_v39 = vsel %vm2501_vm0, %v2847_v62, %v2959_v15 }
 0x3b4   : > { %v2848_v8 = vsub.f32 %v2752_v30, %v2806_v55  ;;  %v2694_v43 = vadd.f32 1e-06, %v2678_v19  ;;  %v2888_v15 = vmul.f32 %v8478_v44, %v8524_v54  ;;  %v10418_v55 = vld [vmem:[#allocation69_spill] sm:$0xff]  ;;  %v2991_v62 = vmul.f32 0.088388346, %v2975_v39 }
 0x3b5   : > { %5842 = vst [vmem:[%s8126_s11 + $0x90] sm:$0xff] %v5758_v12   ;;  %v2918_v3 = vpop.permute.xlu1 %2917  ;;  %3405 = vrot.lane.b32.xlu0 %v3359_v21, %s6518_s12  ;;  %v10417_v12 = vld [vmem:[#allocation31_spill] sm:$0xff]  ;;  %v2128_v30 = vmul.f32 %v6116_v59, %v10418_v55  ;;  %v2889_v39 = vmul.f32 %v8494_v24, %v8537_v31  ;;  %v8576_v14 = vmul.f32 %v8412_v34, %v3665_v36 }
 0x3b6   : > { %v2960_v4 = vadd.f32 %v2918_v3, %v2864_v58  ;;  %v3803_v47 = vmul.f32 %v10417_v12, %v10394_v56  ;;  %v3691_v19 = vmul.f32 %v8439_v5, %v10417_v12  ;;  %6119 = vrsqrt.f32 %v2694_v43 }
 0x3b7   : > { %2821 = vrot.lane.b32.xlu1 %v2776_v0, %s6518_s12  ;;  %v8551_v18 = vpop.permute.xlu0 %3389  ;;  %v10419_v0 = vld [vmem:[#allocation141_spill] sm:$0xff]  ;;  %v3716_v12 = vmul.f32 %v8563_v17, %v10402_v26  ;;  %v6118_v36 = vpop.eup %6117  ;;  %v3717_v55 = vmul.f32 %v8576_v14, %v10404_v32 }
 0x3b8   : > { %v2976_v21 = vsel %vm2501_vm0, %v2848_v8, %v2960_v4  ;;  %v3899_v3 = vadd.f32 %v8469_v35, %v3803_v47  ;;  %v3692_v8 = vmul.f32 %v8445_v6, %v10419_v0  ;;  %v3787_v5 = vsub.f32 %v3691_v19, %v8450_v51  ;;  %v10422_v19 = vld [vmem:[#allocation110_spill] sm:$0xff]  ;;  %v10458_v26 = vld [vmem:[#allocation113_spill] sm:$0xff] }
 0x3b9   : > { %v2992_v7 = vmul.f32 0.088388346, %v2976_v21  ;;  %v3746_v58 = vpop.permute.xlu1 %3745  ;;  %2823 = vrot.lane.b32.xlu0 %v2777_v25, %s6518_s12  ;;  %v3618_v25 = vmul.f32 0.0078125, %v10420_v29  ;;  %v3804_v35 = vmul.f32 %v10419_v0, %v10400_v53  ;;  %v8587_v47 = vmul.f32 %v8283_v1, %v2128_v30  ;;  %v10423_v30 = vld [vmem:[#allocation70_spill] sm:$0xff]  ;;  %v10428_v53 = vld [vmem:[#allocation71_spill] sm:$0xff] }
 0x3ba   : > { %v3915_v43 = vsel %vm2501_vm0, %v3787_v5, %v3899_v3  ;;  %v3788_v21 = vsub.f32 %v3692_v8, %v3746_v58  ;;  %v3196_v0 = vmul.f32 %v6118_v36, %v10423_v30  ;;  %v10424_v8 = vld [vmem:[#allocation91_spill] sm:$0xff]  ;;  %v8603_v5 = vld [vmem:[%s6837_s23 + $0x30] sm:$0xff]  ;;  %v3823_v36 = vmul.f32 %v8063_v45, %v8144_v50 }
 0x3bb   : > { %v5718_v4 = vpack.c.bf16 %v2992_v7, %v2991_v62  ;;  %2933 = vrot.lane.b32.xlu1 %v2888_v15, %s6518_s12  ;;  %v8571_v59 = vpop.permute.xlu0 %2807  ;;  %v3634_v62 = vadd.f32 1e-06, %v3618_v25  ;;  %v10421_v7 = vld [vmem:[#allocation32_spill] sm:$0xff]  ;;  %v2244_v29 = vmul.f32 %v10424_v8, %v8587_v47 }
 0x3bc   : > { %v2155_v25 = vmul.f32 %v8603_v5, %v10421_v7 }
 0x3bd   : > { %5834 = vst [vmem:[%s8126_s11 + $0x50] sm:$0xff] %v5718_v4   ;;  %v3858_v6 = vpop.permute.xlu1 %3857  ;;  %2935 = vrot.lane.b32.xlu0 %v2889_v39, %s6518_s12  ;;  %v2395_v4 = vmul.f32 %v10422_v19, %v10421_v7  ;;  %v3931_v39 = vmul.f32 0.088388346, %v3915_v43  ;;  %6121 = vrsqrt.f32 %v3634_v62  ;;  %v10426_v7 = vld [vmem:[#allocation115_spill] sm:$0xff]  ;;  %v8629_v62 = vmul.f32 %v8326_v38, %v3196_v0 }
 0x3be   : > { %v3900_v15 = vadd.f32 %v3858_v6, %v3804_v35  ;;  %v2315_v43 = vsub.f32 %v2155_v25, %v8491_v16  ;;  %v3825_v25 = vmul.f32 %v8201_v49, %v8274_v33 }
 0x3bf   : > { %3761 = vrot.lane.b32.xlu1 %v3716_v12, %s6518_s12  ;;  %v8591_v51 = vpop.permute.xlu0 %2919  ;;  %v2491_v35 = vadd.f32 %v8513_v13, %v2395_v4  ;;  %v8624_v4 = vld [vmem:[%s6844_s18 + $0x78] sm:$0xff] }
 0x3c0   : > { %v3916_v1 = vsel %vm2501_vm0, %v3788_v21, %v3900_v15  ;;  %v8615_v21 = vld [vmem:[%s6837_s23 + $0x38] sm:$0xff]  ;;  %v10425_v15 = vld [vmem:[#allocation144_spill] sm:$0xff]  ;;  %v2420_v45 = vmul.f32 %v8624_v4, %v8587_v47  ;;  %v6120_v16 = vpop.eup %6119 }
 0x3c1   : > { %v3932_v3 = vmul.f32 0.088388346, %v3916_v1  ;;  %v2276_v58 = vpop.permute.xlu1 %2275  ;;  %3763 = vrot.lane.b32.xlu0 %v3717_v55, %s6518_s12  ;;  %v2156_v55 = vmul.f32 %v8615_v21, %v10425_v15  ;;  %v2396_v1 = vmul.f32 %v10426_v7, %v10425_v15  ;;  %v2508_v30 = vsel %vm2501_vm0, %v2315_v43, %v2491_v35 }
 0x3c2   : > { %v2726_v38 = vmul.f32 %v6120_v16, %v10428_v53  ;;  %v2524_v0 = vmul.f32 0.088388346, %v2508_v30  ;;  %v3827_v53 = vmul.f32 %v8336_v2, %v8425_v37 }
 0x3c3   : > { %v5798_v6 = vpack.c.bf16 %v3932_v3, %v3931_v39  ;;  %2291 = vrot.lane.b32.xlu1 %v2244_v29, %s6518_s12  ;;  %v8609_v12 = vpop.permute.xlu0 %3747  ;;  %v2316_v39 = vsub.f32 %v2156_v55, %v2276_v58  ;;  %v3248_v58 = vmul.f32 %v8629_v62, %v10424_v8 }
 0x3c5   : > { %5850 = vst [vmem:[%s8126_s11 + $0xd0] sm:$0xff] %v5798_v6   ;;  %v2452_v13 = vpop.permute.xlu1 %2451  ;;  %3863 = vrot.lane.b32.xlu0 %v3823_v36, %s6518_s12  ;;  %v10427_v6 = vld [vmem:[#allocation33_spill] sm:$0xff] }
 0x3c6   : > { %v2492_v3 = vadd.f32 %v2452_v13, %v2396_v1  ;;  %v3335_v36 = vmul.f32 %v10427_v6, %v10422_v19  ;;  %v3223_v43 = vmul.f32 %v8603_v5, %v10427_v6 }
 0x3c7   : > { %2467 = vrot.lane.b32.xlu1 %v2420_v45, %s6518_s12  ;;  %v8633_v29 = vpop.permute.xlu0 %3859  ;;  %v10429_v45 = vld [vmem:[#allocation149_spill] sm:$0xff] }
 0x3c8   : > { %v2509_v15 = vsel %vm2501_vm0, %v2316_v39, %v2492_v3  ;;  %v3431_v49 = vadd.f32 %v8551_v18, %v3335_v36  ;;  %v3319_v13 = vsub.f32 %v3223_v43, %v8532_v46  ;;  %v3224_v16 = vmul.f32 %v8615_v21, %v10429_v45  ;;  %v6122_v3 = vpop.eup %6121  ;;  %v10431_v43 = vld [vmem:[#allocation72_spill] sm:$0xff] }
 0x3c9   : > { %v2525_v56 = vmul.f32 0.088388346, %v2509_v15  ;;  %v3280_v35 = vpop.permute.xlu1 %3279  ;;  %3867 = vrot.lane.b32.xlu0 %v3825_v25, %s6518_s12  ;;  %v3336_v30 = vmul.f32 %v10429_v45, %v10426_v7  ;;  %v8662_v18 = vmul.f32 %v8370_v60, %v2726_v38  ;;  %v3829_v36 = vmul.f32 %v8494_v24, %v8576_v14  ;;  %v10430_v15 = vld [vmem:[#allocation140_spill] sm:$0xff] }
 0x3ca   : > { %v3447_v2 = vsel %vm2501_vm0, %v3319_v13, %v3431_v49  ;;  %v3320_v46 = vsub.f32 %v3224_v16, %v3280_v35  ;;  %v3666_v60 = vmul.f32 %v6122_v3, %v10431_v43  ;;  %v2753_v49 = vmul.f32 %v8603_v5, %v10430_v15 }
 0x3cb   : > { %v5683_v55 = vpack.c.bf16 %v2525_v56, %v2524_v0  ;;  %3295 = vrot.lane.b32.xlu1 %v3248_v58, %s6518_s12  ;;  %v8648_v1 = vpop.permute.xlu0 %2277  ;;  %v3360_v56 = vmul.f32 %v8624_v4, %v8629_v62  ;;  %v2865_v0 = vmul.f32 %v10430_v15, %v10422_v19  ;;  %v3463_v38 = vmul.f32 0.088388346, %v3447_v2 }
 0x3cc   : > { %v2778_v35 = vmul.f32 %v8662_v18, %v10424_v8  ;;  %v2849_v16 = vsub.f32 %v2753_v49, %v8571_v59  ;;  %v2890_v3 = vmul.f32 %v8624_v4, %v8662_v18  ;;  %v3694_v49 = vmul.f32 %v8615_v21, %v8122_v41 }
 0x3cd   : > { %5827 = vst [vmem:[%s8126_s11 + $0x18] sm:$0xff] %v5683_v55   ;;  %v3392_v39 = vpop.permute.xlu1 %3391  ;;  %3871 = vrot.lane.b32.xlu0 %v3827_v53, %s6518_s12  ;;  %v2961_v24 = vadd.f32 %v8591_v51, %v2865_v0  ;;  %v8690_v51 = vmul.f32 %v8412_v34, %v3666_v60 }
 0x3ce   : > { %v3432_v25 = vadd.f32 %v3392_v39, %v3336_v30  ;;  %v2754_v30 = vmul.f32 %v8615_v21, %v8089_v22  ;;  %v2866_v39 = vmul.f32 %v8089_v22, %v10426_v7 }
 0x3cf   : > { %3407 = vrot.lane.b32.xlu1 %v3360_v56, %s6518_s12  ;;  %v2454_v6 = vpop.permute.xlu0 %2453  ;;  %v2977_v2 = vsel %vm2501_vm0, %v2849_v16, %v2961_v24  ;;  %v3718_v34 = vmul.f32 %v8690_v51, %v10424_v8  ;;  %v3806_v24 = vmul.f32 %v8122_v41, %v10426_v7  ;;  %v10456_v7 = vld [vmem:[#allocation107_spill] sm:$0xff] }
 0x3d0   : > { %v3448_v58 = vsel %vm2501_vm0, %v3320_v46, %v3432_v25  ;;  %v2993_v0 = vmul.f32 0.088388346, %v2977_v2 }
 0x3d1   : > { %v3464_v55 = vmul.f32 0.088388346, %v3448_v58  ;;  %v2810_v53 = vpop.permute.xlu1 %2809  ;;  %3875 = vrot.lane.b32.xlu0 %v3829_v36, %s6518_s12  ;;  %v10432_v36 = vld [vmem:[#allocation143_spill] sm:$0xff] }
 0x3d2   : > { %v2850_v46 = vsub.f32 %v2754_v30, %v2810_v53  ;;  %v3805_v15 = vmul.f32 %v10432_v36, %v10422_v19  ;;  %v3693_v60 = vmul.f32 %v8603_v5, %v10432_v36  ;;  %v3824_v5 = vmul.f32 %v8191_v40, %v8255_v52 }
 0x3d3   : > { %v5763_v13 = vpack.c.bf16 %v3464_v55, %v3463_v38  ;;  %2825 = vrot.lane.b32.xlu1 %v2778_v35, %s6518_s12  ;;  %v8679_v45 = vpop.permute.xlu0 %3281  ;;  %v3826_v40 = vmul.f32 %v8322_v20, %v8415_v42  ;;  %v10435_v20 = vld [vmem:[#allocation121_spill] sm:$0xff]  ;;  %v4036_v19 = vmul.f32 %v10456_v7, %v10456_v7 }
 0x3d4   : > { %v3901_v38 = vadd.f32 %v8633_v29, %v3805_v15  ;;  %v3789_v35 = vsub.f32 %v3693_v60, %v8609_v12  ;;  %v2398_v60 = vmul.f32 %v10435_v20, %v8158_v11 }
 0x3d5   : > { %5843 = vst [vmem:[%s8126_s11 + $0x98] sm:$0xff] %v5763_v13   ;;  %v2922_v56 = vpop.permute.xlu1 %2921 }
 0x3d6   : > { %v2962_v25 = vadd.f32 %v2922_v56, %v2866_v39  ;;  %v3917_v29 = vsel %vm2501_vm0, %v3789_v35, %v3901_v38  ;;  %v10433_v39 = vld [vmem:[#allocation147_spill] sm:$0xff]  ;;  %v10434_v56 = vld [vmem:[#allocation116_spill] sm:$0xff] }
 0x3d7   : > { %2937 = vrot.lane.b32.xlu1 %v2890_v3, %s6518_s12  ;;  %v3394_v59 = vpop.permute.xlu0 %3393  ;;  %v2397_v21 = vmul.f32 %v10434_v56, %v10433_v39  ;;  %v3933_v41 = vmul.f32 0.088388346, %v3917_v29 }
 0x3d8   : > { %v2978_v22 = vsel %vm2501_vm0, %v2850_v46, %v2962_v25  ;;  %v8721_v25 = vld [vmem:[%s6837_s23 + $0x40] sm:$0xff] }
 0x3d9   : > { %v2994_v58 = vmul.f32 0.088388346, %v2978_v22  ;;  %v3750_v43 = vpop.permute.xlu1 %3749  ;;  %v2157_v36 = vmul.f32 %v8721_v25, %v10433_v39  ;;  %v2493_v15 = vadd.f32 %v2454_v6, %v2397_v21  ;;  %v3828_v6 = vmul.f32 %v8478_v44, %v8563_v17 }
 0x3da   : > { %v3790_v16 = vsub.f32 %v3694_v49, %v3750_v43  ;;  %v8730_v43 = vld [vmem:[%s6837_s23 + $0x48] sm:$0xff]  ;;  %v3830_v44 = vmul.f32 %v8624_v4, %v8690_v51 }
 0x3db   : > { %v5723_v55 = vpack.c.bf16 %v2994_v58, %v2993_v0  ;;  %3765 = vrot.lane.b32.xlu1 %v3718_v34, %s6518_s12  ;;  %v8703_v53 = vpop.permute.xlu0 %2811  ;;  %v2317_v58 = vsub.f32 %v2157_v36, %v8648_v1  ;;  %v2158_v34 = vmul.f32 %v8730_v43, %v8158_v11 }
 0x3dd   : > { %5835 = vst [vmem:[%s8126_s11 + $0x58] sm:$0xff] %v5723_v55   ;;  %v3862_v13 = vpop.permute.xlu1 %3861  ;;  %v2510_v55 = vsel %vm2501_vm0, %v2317_v58, %v2493_v15 }
 0x3de   : > { %v3902_v30 = vadd.f32 %v3862_v13, %v3806_v24  ;;  %v3337_v24 = vmul.f32 %v8068_v27, %v10434_v56  ;;  %v2526_v11 = vmul.f32 0.088388346, %v2510_v55 }
 0x3df   : > { %3865 = vrot.lane.b32.xlu1 %v3824_v5, %s6518_s12  ;;  %v2924_v12 = vpop.permute.xlu0 %2923 }
 0x3e0   : > { %v3918_v3 = vsel %vm2501_vm0, %v3790_v16, %v3902_v30  ;;  %v3225_v16 = vmul.f32 %v8721_v25, %v8068_v27  ;;  %v3433_v30 = vadd.f32 %v3394_v59, %v3337_v24 }
 0x3e1   : > { %v3934_v2 = vmul.f32 0.088388346, %v3918_v3  ;;  %v2280_v46 = vpop.permute.xlu1 %2279 }
 0x3e2   : > { %v2318_v35 = vsub.f32 %v2158_v34, %v2280_v46  ;;  %v3321_v3 = vsub.f32 %v3225_v16, %v8679_v45  ;;  %v2867_v45 = vmul.f32 %v8109_v63, %v10434_v56 }
 0x3e3   : > { %v5803_v22 = vpack.c.bf16 %v3934_v2, %v3933_v41  ;;  %3869 = vrot.lane.b32.xlu1 %v3826_v40, %s6518_s12  ;;  %v8726_v0 = vpop.permute.xlu0 %3751  ;;  %v3226_v41 = vmul.f32 %v8730_v43, %v8196_v57  ;;  %v3338_v2 = vmul.f32 %v8196_v57, %v10435_v20  ;;  %v10436_v40 = vld [vmem:[#allocation75_spill] sm:$0xff] }
 0x3e4   : > { %v4025_v4 = vmul.f32 %v10436_v40, %v10436_v40  ;;  %v3449_v27 = vsel %vm2501_vm0, %v3321_v3, %v3433_v30  ;;  %v2963_v55 = vadd.f32 %v2924_v12, %v2867_v45  ;;  %v10441_v45 = vld [vmem:[#allocation93_spill] sm:$0xff] }
 0x3e5   : > { %5851 = vst [vmem:[%s8126_s11 + $0xd8] sm:$0xff] %v5803_v22   ;;  %v2456_v38 = vpop.permute.xlu1 %2455  ;;  %v3465_v58 = vmul.f32 0.088388346, %v3449_v27  ;;  %v10440_v27 = vld [vmem:[#allocation122_spill] sm:$0xff] }
 0x3e6   : > { %v2494_v49 = vadd.f32 %v2456_v38, %v2398_v60  ;;  %v10437_v60 = vld [vmem:[#allocation81_spill] sm:$0xff] }
 0x3e7   : > { %3873 = vrot.lane.b32.xlu1 %v3828_v6, %s6518_s12  ;;  %v8741_v1 = vpop.permute.xlu0 %2281  ;;  %v4027_v38 = vmul.f32 %v10437_v60, %v10437_v60  ;;  %v2755_v6 = vmul.f32 %v8721_v25, %v8109_v63 }
 0x3e8   : > { %v2511_v13 = vsel %vm2501_vm0, %v2318_v35, %v2494_v49 }
 0x3e9   : > { %v2527_v5 = vmul.f32 0.088388346, %v2511_v13  ;;  %v3284_v29 = vpop.permute.xlu1 %3283  ;;  %v2851_v24 = vsub.f32 %v2755_v6, %v8703_v53  ;;  %v2756_v13 = vmul.f32 %v8730_v43, %v8227_v61 }
 0x3ea   : > { %v3322_v59 = vsub.f32 %v3226_v41, %v3284_v29  ;;  %v10438_v29 = vld [vmem:[#allocation83_spill] sm:$0xff] }
 0x3eb   : > { %v5688_v39 = vpack.c.bf16 %v2527_v5, %v2526_v11  ;;  %3877 = vrot.lane.b32.xlu1 %v3830_v44, %s6518_s12  ;;  %v2458_v21 = vpop.permute.xlu0 %2457  ;;  %v2868_v11 = vmul.f32 %v8227_v61, %v10435_v20  ;;  %v4028_v44 = vmul.f32 %v10438_v29, %v10438_v29  ;;  %v2979_v63 = vsel %vm2501_vm0, %v2851_v24, %v2963_v55  ;;  %v10439_v41 = vld [vmem:[#allocation87_spill] sm:$0xff]  ;;  %v8799_v55 = vld [vmem:[%s6837_s23 + $0x58] sm:$0xff] }
 0x3ec   : > { %v10442_v24 = vld [vmem:[#allocation123_spill] sm:$0xff] }
 0x3ed   : > { %5828 = vst [vmem:[%s8126_s11 + $0x20] sm:$0xff] %v5688_v39   ;;  %v3396_v46 = vpop.permute.xlu1 %3395  ;;  %v2995_v39 = vmul.f32 0.088388346, %v2979_v63 }
 0x3ee   : > { %v3434_v36 = vadd.f32 %v3396_v46, %v3338_v2  ;;  %v4029_v2 = vmul.f32 %v10439_v41, %v10439_v41 }
 0x3ef   : > { %v8760_v15 = vpop.permute.xlu0 %3285 }
 0x3f0   : > { %v3450_v22 = vsel %vm2501_vm0, %v3322_v59, %v3434_v36  ;;  %4041 = vadd.xlane.f32.xlu0 %v4025_v4  ;;  %v2399_v59 = vmul.f32 %v10440_v27, %v8166_v48 }
 0x3f1   : > { %v3466_v57 = vmul.f32 0.088388346, %v3450_v22  ;;  %v2814_v34 = vpop.permute.xlu1 %2813  ;;  %v4031_v22 = vmul.f32 %v10441_v45, %v10441_v45 }
 0x3f2   : > { %v2852_v12 = vsub.f32 %v2756_v13, %v2814_v34  ;;  %v2495_v34 = vadd.f32 %v2458_v21, %v2399_v59  ;;  %v2400_v13 = vmul.f32 %v10442_v24, %v8286_v23 }
 0x3f3   : > { %v5768_v35 = vpack.c.bf16 %v3466_v57, %v3465_v58  ;;  %v3398_v49 = vpop.permute.xlu0 %3397  ;;  %v8791_v58 = vld [vmem:[%s6837_s23 + $0x50] sm:$0xff] }
 0x3f4   : > { %4045 = vadd.xlane.f32.xlu0 %v4027_v38  ;;  %v2159_v57 = vmul.f32 %v8791_v58, %v8166_v48 }
 0x3f5   : > { %5844 = vst [vmem:[%s8126_s11 + $0xa0] sm:$0xff] %v5768_v35   ;;  %v2926_v5 = vpop.permute.xlu1 %2925  ;;  %v2160_v35 = vmul.f32 %v8799_v55, %v8286_v23 }
 0x3f6   : > { %v2964_v16 = vadd.f32 %v2926_v5, %v2868_v11  ;;  %v2319_v6 = vsub.f32 %v2159_v57, %v8741_v1  ;;  %v10443_v5 = vld [vmem:[#allocation99_spill] sm:$0xff]  ;;  %v3339_v1 = vmul.f32 %v8206_v9, %v10440_v27 }
 0x3f7   : > { %v8778_v30 = vpop.permute.xlu0 %2815 }
 0x3f8   : > { %v2980_v53 = vsel %vm2501_vm0, %v2852_v12, %v2964_v16  ;;  %4047 = vadd.xlane.f32.xlu0 %v4028_v44  ;;  %v4033_v44 = vmul.f32 %v10443_v5, %v10443_v5  ;;  %v2512_v48 = vsel %vm2501_vm0, %v2319_v6, %v2495_v34  ;;  %v3435_v59 = vadd.f32 %v3398_v49, %v3339_v1 }
 0x3f9   : > { %v2996_v3 = vmul.f32 0.088388346, %v2980_v53  ;;  %v8781_v61 = vpop.permute.xlu1 %3753  ;;  %v2528_v53 = vmul.f32 0.088388346, %v2512_v48  ;;  %v3228_v34 = vmul.f32 %v8799_v55, %v8329_v10  ;;  %v3340_v6 = vmul.f32 %v8329_v10, %v10442_v24 }
 0x3fb   : > { %v5728_v46 = vpack.c.bf16 %v2996_v3, %v2995_v39  ;;  %v2928_v4 = vpop.permute.xlu0 %2927  ;;  %v10444_v3 = vld [vmem:[#allocation105_spill] sm:$0xff] }
 0x3fc   : > { %4049 = vadd.xlane.f32.xlu0 %v4029_v2  ;;  %v4035_v2 = vmul.f32 %v10444_v3, %v10444_v3 }
 0x3fd   : > { %5836 = vst [vmem:[%s8126_s11 + $0x60] sm:$0xff] %v5728_v46   ;;  %v2284_v36 = vpop.permute.xlu1 %2283  ;;  %v3227_v46 = vmul.f32 %v8791_v58, %v8206_v9 }
 0x3fe   : > { %v2320_v21 = vsub.f32 %v2160_v35, %v2284_v36 }
 0x3ff   : > { %v8795_v38 = vpop.permute.xlu0 %3755  ;;  %v3323_v57 = vsub.f32 %v3227_v46, %v8760_v15  ;;  %v2869_v15 = vmul.f32 %v8234_v28, %v10440_v27 }
 0x400   : > { %4053 = vadd.xlane.f32.xlu0 %v4031_v22 }
 0x401   : > { %v2460_v11 = vpop.permute.xlu1 %2459  ;;  %v2965_v46 = vadd.f32 %v2928_v4, %v2869_v15 }
 0x402   : > { %v2496_v63 = vadd.f32 %v2460_v11, %v2400_v13  ;;  %v10445_v13 = vld [vmem:[#allocation111_spill] sm:$0xff] }
 0x403   : > { %v8808_v12 = vpop.permute.xlu0 %2285  ;;  %v4037_v11 = vmul.f32 %v10445_v13, %v10445_v13 }
 0x404   : > { %v2513_v16 = vsel %vm2501_vm0, %v2320_v21, %v2496_v63  ;;  %4057 = vadd.xlane.f32.xlu0 %v4033_v44  ;;  %v3451_v44 = vsel %vm2501_vm0, %v3323_v57, %v3435_v59  ;;  %v10446_v63 = vld [vmem:[#allocation77_spill] sm:$0xff] }
 0x405   : > { %v2529_v39 = vmul.f32 0.088388346, %v2513_v16  ;;  %v3288_v23 = vpop.permute.xlu1 %3287  ;;  %v4026_v10 = vmul.f32 %v10446_v63, %v10446_v63  ;;  %v3467_v1 = vmul.f32 0.088388346, %v3451_v44 }
 0x406   : > { %v3324_v9 = vsub.f32 %v3228_v34, %v3288_v23  ;;  %v2757_v23 = vmul.f32 %v8791_v58, %v8234_v28  ;;  %v10448_v34 = vld [vmem:[#allocation44_spill] sm:$0xff] }
 0x407   : > { %v5693_v36 = vpack.c.bf16 %v2529_v39, %v2528_v53  ;;  %v2462_v22 = vpop.permute.xlu0 %2461  ;;  %v10447_v39 = vld [vmem:[#allocation117_spill] sm:$0xff] }
 0x408   : > { %4061 = vadd.xlane.f32.xlu0 %v4035_v2  ;;  %v4039_v2 = vmul.f32 %v10447_v39, %v10447_v39  ;;  %v2853_v57 = vsub.f32 %v2757_v23, %v8778_v30 }
 0x409   : > { %5829 = vst [vmem:[%s8126_s11 + $0x28] sm:$0xff] %v5693_v36   ;;  %v3400_v35 = vpop.permute.xlu1 %3399 }
 0x40a   : > { %v3436_v49 = vadd.f32 %v3400_v35, %v3340_v6  ;;  %v2758_v6 = vmul.f32 %v8799_v55, %v10448_v34  ;;  %v2870_v35 = vmul.f32 %v10448_v34, %v10442_v24  ;;  %v2981_v28 = vsel %vm2501_vm0, %v2853_v57, %v2965_v46  ;;  %v10451_v46 = vld [vmem:[#allocation40_spill] sm:$0xff]  ;;  %v10453_v34 = vld [vmem:[#allocation101_spill] sm:$0xff] }
 0x40b   : > { %v8826_v48 = vpop.permute.xlu0 %3289 }
 0x40c   : > { %v3452_v21 = vsel %vm2501_vm0, %v3324_v9, %v3436_v49  ;;  %4065 = vadd.xlane.f32.xlu0 %v4037_v11  ;;  %v10449_v11 = vld [vmem:[#allocation89_spill] sm:$0xff] }
 0x40d   : > { %v3468_v16 = vmul.f32 0.088388346, %v3452_v21  ;;  %v2818_v53 = vpop.permute.xlu1 %2817  ;;  %v4030_v44 = vmul.f32 %v10449_v11, %v10449_v11  ;;  %v10450_v21 = vld [vmem:[#allocation95_spill] sm:$0xff] }
 0x40e   : > { %v2854_v4 = vsub.f32 %v2758_v6, %v2818_v53  ;;  %v10452_v53 = vld [vmem:[#allocation124_spill] sm:$0xff]  ;;  %v4034_v6 = vmul.f32 %v10453_v34, %v10453_v34  ;;  %v4038_v34 = vmul.f32 %v10458_v26, %v10458_v26 }
 0x40f   : > { %v5773_v59 = vpack.c.bf16 %v3468_v16, %v3467_v1  ;;  %4043 = vadd.xlane.f32.xlu1 %v4026_v10  ;;  %v3402_v36 = vpop.permute.xlu0 %3401  ;;  %v4032_v10 = vmul.f32 %v10450_v21, %v10450_v21  ;;  %v2997_v1 = vmul.f32 0.088388346, %v2981_v28  ;;  %v2401_v57 = vmul.f32 %v10452_v53, %v10451_v46 }
 0x410   : > { %4069 = vadd.xlane.f32.xlu0 %v4039_v2 }
 0x411   : > { %5845 = vst [vmem:[%s8126_s11 + $0xa8] sm:$0xff] %v5773_v59   ;;  %v2930_v9 = vpop.permute.xlu1 %2929  ;;  %v2497_v28 = vadd.f32 %v2462_v22, %v2401_v57 }
 0x412   : > { %v2966_v49 = vadd.f32 %v2930_v9, %v2870_v35 }
 0x413   : > { %4051 = vadd.xlane.f32.xlu1 %v4030_v44  ;;  %v8846_v30 = vpop.permute.xlu0 %2819  ;;  %v8859_v44 = vld [vmem:[%s6837_s23 + $0x60] sm:$0xff] }
 0x414   : > { %v2982_v15 = vsel %vm2501_vm0, %v2854_v4, %v2966_v49  ;;  %v2161_v9 = vmul.f32 %v8859_v44, %v10451_v46 }
 0x415   : > { %v2998_v16 = vmul.f32 0.088388346, %v2982_v15  ;;  %v8851_v2 = vpop.permute.xlu1 %3757  ;;  %v8867_v15 = vld [vmem:[%s6837_s23 + $0x68] sm:$0xff] }
 0x416   : > { %v2321_v49 = vsub.f32 %v2161_v9, %v8808_v12  ;;  %v10457_v12 = vld [vmem:[#allocation41_spill] sm:$0xff] }
 0x417   : > { %v5733_v23 = vpack.c.bf16 %v2998_v16, %v2997_v1  ;;  %4055 = vadd.xlane.f32.xlu1 %v4032_v10  ;;  %v2932_v59 = vpop.permute.xlu0 %2931  ;;  %v10454_v10 = vld [vmem:[#allocation46_spill] sm:$0xff]  ;;  %v10455_v16 = vld [vmem:[#allocation125_spill] sm:$0xff]  ;;  %v3341_v9 = vmul.f32 %v10457_v12, %v10452_v53  ;;  %v3229_v7 = vmul.f32 %v8859_v44, %v10457_v12 }
 0x418   : > { %v2162_v1 = vmul.f32 %v8867_v15, %v10454_v10  ;;  %v2514_v46 = vsel %vm2501_vm0, %v2321_v49, %v2497_v28  ;;  %v10459_v49 = vld [vmem:[#allocation55_spill] sm:$0xff] }
 0x419   : > { %5837 = vst [vmem:[%s8126_s11 + $0x68] sm:$0xff] %v5733_v23   ;;  %v2288_v35 = vpop.permute.xlu1 %2287  ;;  %v2402_v23 = vmul.f32 %v10455_v16, %v10454_v10  ;;  %v2530_v10 = vmul.f32 0.088388346, %v2514_v46  ;;  %v3437_v28 = vadd.f32 %v3402_v36, %v3341_v9 }
 0x41a   : > { %v2322_v22 = vsub.f32 %v2162_v1, %v2288_v35  ;;  %v3230_v1 = vmul.f32 %v8867_v15, %v10459_v49 }
 0x41b   : > { %4059 = vadd.xlane.f32.xlu1 %v4034_v6  ;;  %v8863_v4 = vpop.permute.xlu0 %3759 }
 0x41d   : > { %v2464_v8 = vpop.permute.xlu1 %2463 }
 0x41e   : > { %v2498_v57 = vadd.f32 %v2464_v8, %v2402_v23  ;;  %v3325_v8 = vsub.f32 %v3229_v7, %v8826_v48  ;;  %v3342_v23 = vmul.f32 %v10459_v49, %v10455_v16  ;;  %v10461_v7 = vld [vmem:[#allocation45_spill] sm:$0xff] }
 0x41f   : > { %4063 = vadd.xlane.f32.xlu1 %v4036_v19  ;;  %v2290_v6 = vpop.permute.xlu0 %2289  ;;  %v2871_v48 = vmul.f32 %v10461_v7, %v10452_v53 }
 0x420   : > { %v2515_v32 = vsel %vm2501_vm0, %v2322_v22, %v2498_v57  ;;  %v10460_v22 = vld [vmem:[#allocation119_spill] sm:$0xff]  ;;  %v3453_v57 = vsel %vm2501_vm0, %v3325_v8, %v3437_v28  ;;  %v2872_v8 = vmul.f32 %v8524_v54, %v10455_v16 }
 0x421   : > { %v2531_v21 = vmul.f32 0.088388346, %v2515_v32  ;;  %v3292_v11 = vpop.permute.xlu1 %3291  ;;  %v4040_v46 = vmul.f32 %v10460_v22, %v10460_v22  ;;  %v3469_v9 = vmul.f32 0.088388346, %v3453_v57  ;;  %v2759_v22 = vmul.f32 %v8859_v44, %v10461_v7 }
 0x422   : > { %v3326_v36 = vsub.f32 %v3230_v1, %v3292_v11  ;;  %v2760_v11 = vmul.f32 %v8867_v15, %v8524_v54 }
 0x423   : > { %v5698_v35 = vpack.c.bf16 %v2531_v21, %v2530_v10  ;;  %4067 = vadd.xlane.f32.xlu1 %v4038_v34  ;;  %v2466_v19 = vpop.permute.xlu0 %2465  ;;  %v2855_v28 = vsub.f32 %v2759_v22, %v8846_v30 }
 0x425   : > { %5830 = vst [vmem:[%s8126_s11 + $0x30] sm:$0xff] %v5698_v35   ;;  %v3404_v32 = vpop.permute.xlu1 %3403  ;;  %v2967_v35 = vadd.f32 %v2932_v59, %v2871_v48  ;;  %v10462_v48 = vld [vmem:[#allocation49_spill] sm:$0xff] }
 0x426   : > { %v3438_v21 = vadd.f32 %v3404_v32, %v3342_v23 }
 0x427   : > { %4071 = vadd.xlane.f32.xlu1 %v4040_v46  ;;  %v3294_v34 = vpop.permute.xlu0 %3293  ;;  %v2983_v46 = vsel %vm2501_vm0, %v2855_v28, %v2967_v35  ;;  %v8916_v28 = vld [vmem:[%s6837_s23 + $0x78] sm:$0xff] }
 0x428   : > { %v3454_v12 = vsel %vm2501_vm0, %v3326_v36, %v3438_v21  ;;  %v2999_v36 = vmul.f32 0.088388346, %v2983_v46 }
 0x429   : > { %v3470_v10 = vmul.f32 0.088388346, %v3454_v12  ;;  %v2822_v49 = vpop.permute.xlu1 %2821  ;;  %v10463_v12 = vld [vmem:[#allocation126_spill] sm:$0xff] }
 0x42a   : > { %v2856_v32 = vsub.f32 %v2760_v11, %v2822_v49  ;;  %v2403_v54 = vmul.f32 %v10463_v12, %v10462_v48  ;;  %v2164_v11 = vmul.f32 %v8916_v28, %v8587_v47 }
 0x42b   : > { %v5778_v26 = vpack.c.bf16 %v3470_v10, %v3469_v9  ;;  %v3406_v1 = vpop.permute.xlu0 %3405  ;;  %v8911_v9 = vld [vmem:[%s6837_s23 + $0x70] sm:$0xff] }
 0x42c   : > { %v2163_v10 = vmul.f32 %v8911_v9, %v10462_v48  ;;  %v2499_v49 = vadd.f32 %v2466_v19, %v2403_v54 }
 0x42d   : > { %5846 = vst [vmem:[%s8126_s11 + $0xb0] sm:$0xff] %v5778_v26   ;;  %v2934_v23 = vpop.permute.xlu1 %2933 }
 0x42e   : > { %v2968_v57 = vadd.f32 %v2934_v23, %v2872_v8  ;;  %v2323_v35 = vsub.f32 %v2163_v10, %v2290_v6  ;;  %v10464_v8 = vld [vmem:[#allocation127_spill] sm:$0xff] }
 0x42f   : > { %v2824_v7 = vpop.permute.xlu0 %2823  ;;  %v2404_v23 = vmul.f32 %v10464_v8, %v8587_v47 }
 0x430   : > { %v2984_v59 = vsel %vm2501_vm0, %v2856_v32, %v2968_v57  ;;  %v2516_v57 = vsel %vm2501_vm0, %v2323_v35, %v2499_v49  ;;  %v3344_v49 = vmul.f32 %v8629_v62, %v10464_v8 }
 0x431   : > { %v3000_v30 = vmul.f32 0.088388346, %v2984_v59  ;;  %v8905_v22 = vpop.permute.xlu1 %3761  ;;  %v2532_v19 = vmul.f32 0.088388346, %v2516_v57 }
 0x433   : > { %v5738_v21 = vpack.c.bf16 %v3000_v30, %v2999_v36  ;;  %v2936_v46 = vpop.permute.xlu0 %2935  ;;  %v10465_v30 = vld [vmem:[#allocation131_spill] sm:$0xff] }
 0x434   : > { %v3231_v10 = vmul.f32 %v8911_v9, %v10465_v30 }
 0x435   : > { %5838 = vst [vmem:[%s8126_s11 + $0x70] sm:$0xff] %v5738_v21   ;;  %v2292_v26 = vpop.permute.xlu1 %2291  ;;  %v3343_v21 = vmul.f32 %v10465_v30, %v10463_v12 }
 0x436   : > { %v2324_v59 = vsub.f32 %v2164_v11, %v2292_v26  ;;  %v3327_v63 = vsub.f32 %v3231_v10, %v3294_v34  ;;  %v3232_v26 = vmul.f32 %v8916_v28, %v8629_v62 }
 0x437   : > { %v3439_v29 = vadd.f32 %v3406_v1, %v3343_v21  ;;  %v8928_v47 = vpop.permute.xlu0 %3763  ;;  %v2873_v1 = vmul.f32 %v8537_v31, %v10463_v12  ;;  %v2761_v21 = vmul.f32 %v8911_v9, %v8537_v31  ;;  %v3807_v31 = vmul.f32 %v8144_v50, %v10434_v56 }
 0x439   : > { %v2468_v32 = vpop.permute.xlu1 %2467  ;;  %v3455_v11 = vsel %vm2501_vm0, %v3327_v63, %v3439_v29  ;;  %v2969_v62 = vadd.f32 %v2936_v46, %v2873_v1  ;;  %v2762_v29 = vmul.f32 %v8916_v28, %v8662_v18  ;;  %v2874_v63 = vmul.f32 %v8662_v18, %v10464_v8 }
 0x43a   : > { %v2500_v36 = vadd.f32 %v2468_v32, %v2404_v23  ;;  %v3696_v1 = vmul.f32 %v8730_v43, %v8255_v52  ;;  %v3698_v43 = vmul.f32 %v8799_v55, %v8415_v42 }
 0x43b   : > { %v3864_v34 = vpop.permute.xlu0 %3863 }
 0x43c   : > { %v2517_v6 = vsel %vm2501_vm0, %v2324_v59, %v2500_v36  ;;  %v3471_v59 = vmul.f32 0.088388346, %v3455_v11  ;;  %v3695_v11 = vmul.f32 %v8721_v25, %v8144_v50  ;;  %v3903_v18 = vadd.f32 %v3864_v34, %v3807_v31 }
 0x43d   : > { %v2533_v48 = vmul.f32 0.088388346, %v2517_v6  ;;  %v3296_v54 = vpop.permute.xlu1 %3295  ;;  %v2857_v6 = vsub.f32 %v2761_v21, %v2824_v7  ;;  %v3792_v50 = vsub.f32 %v3696_v1, %v8781_v61  ;;  %v3699_v61 = vmul.f32 %v8859_v44, %v8425_v37 }
 0x43e   : > { %v3328_v23 = vsub.f32 %v3232_v26, %v3296_v54 }
 0x43f   : > { %v5703_v39 = vpack.c.bf16 %v2533_v48, %v2532_v19  ;;  %v2985_v48 = vsel %vm2501_vm0, %v2857_v6, %v2969_v62  ;;  %v3868_v26 = vpop.permute.xlu0 %3867 }
 0x440   : > { %v3001_v7 = vmul.f32 0.088388346, %v2985_v48 }
 0x441   : > { %5831 = vst [vmem:[%s8126_s11 + $0x38] sm:$0xff] %v5703_v39   ;;  %v3408_v35 = vpop.permute.xlu1 %3407 }
 0x442   : > { %v3440_v32 = vadd.f32 %v3408_v35, %v3344_v49 }
 0x444   : > { %v3456_v57 = vsel %vm2501_vm0, %v3328_v23, %v3440_v32  ;;  %v3791_v32 = vsub.f32 %v3695_v11, %v8726_v0 }
 0x445   : > { %v3472_v36 = vmul.f32 0.088388346, %v3456_v57  ;;  %v2826_v30 = vpop.permute.xlu1 %2825  ;;  %v3809_v57 = vmul.f32 %v8274_v33, %v10440_v27 }
 0x446   : > { %v2858_v54 = vsub.f32 %v2762_v29, %v2826_v30  ;;  %v3872_v30 = vpop.permute.xlu0 %3871  ;;  %v3919_v25 = vsel %vm2501_vm0, %v3791_v32, %v3903_v18 }
 0x447   : > { %v5783_v39 = vpack.c.bf16 %v3472_v36, %v3471_v59  ;;  %v3808_v59 = vmul.f32 %v8255_v52, %v10435_v20  ;;  %v3697_v36 = vmul.f32 %v8791_v58, %v8274_v33  ;;  %v3905_v0 = vadd.f32 %v3868_v26, %v3809_v57 }
 0x448   : > { %v3811_v52 = vmul.f32 %v8425_v37, %v10452_v53  ;;  %v3810_v33 = vmul.f32 %v8415_v42, %v10442_v24  ;;  %v3935_v6 = vmul.f32 0.088388346, %v3919_v25  ;;  %v3795_v42 = vsub.f32 %v3699_v61, %v8863_v4 }
 0x449   : > { %5847 = vst [vmem:[%s8126_s11 + $0xb8] sm:$0xff] %v5783_v39   ;;  %v2938_v19 = vpop.permute.xlu1 %2937  ;;  %v3793_v62 = vsub.f32 %v3697_v36, %v8795_v38  ;;  %v3813_v37 = vmul.f32 %v8576_v14, %v10463_v12 }
 0x44a   : > { %v2970_v10 = vadd.f32 %v2938_v19, %v2874_v63  ;;  %v3794_v19 = vsub.f32 %v3698_v43, %v8851_v2  ;;  %v3907_v38 = vadd.f32 %v3872_v30, %v3811_v52  ;;  %v3876_v26 = vpop.permute.xlu0 %3875  ;;  %v3701_v2 = vmul.f32 %v8911_v9, %v8576_v14 }
 0x44b   : > { %v3921_v48 = vsel %vm2501_vm0, %v3793_v62, %v3905_v0  ;;  %v3909_v32 = vadd.f32 %v3876_v26, %v3813_v37  ;;  %v3814_v9 = vmul.f32 %v8690_v51, %v10464_v8  ;;  %v9153_v8 = vld [vmem:[%s6844_s18 + $0x10] sm:$0xff] }
 0x44c   : > { %v2986_v46 = vsel %vm2501_vm0, %v2858_v54, %v2970_v10  ;;  %v3700_v10 = vmul.f32 %v8867_v15, %v8563_v17  ;;  %v3923_v4 = vsel %vm2501_vm0, %v3795_v42, %v3907_v38 }
 0x44d   : > { %v3002_v49 = vmul.f32 0.088388346, %v2986_v46  ;;  %v3766_v35 = vpop.permute.xlu1 %3765  ;;  %v3939_v36 = vmul.f32 0.088388346, %v3923_v4 }
 0x44f   : > { %v5743_v23 = vpack.c.bf16 %v3002_v49, %v3001_v7  ;;  %v3812_v7 = vmul.f32 %v8563_v17, %v10455_v16  ;;  %v3937_v49 = vmul.f32 0.088388346, %v3921_v48  ;;  %v3702_v17 = vmul.f32 %v8916_v28, %v8690_v51 }
 0x451   : > { %5839 = vst [vmem:[%s8126_s11 + $0x78] sm:$0xff] %v5743_v23   ;;  %v3866_v21 = vpop.permute.xlu1 %3865  ;;  %v3796_v23 = vsub.f32 %v3700_v10, %v8905_v22 }
 0x452   : > { %v3904_v34 = vadd.f32 %v3866_v21, %v3808_v59  ;;  %v3797_v59 = vsub.f32 %v3701_v2, %v8928_v47 }
 0x454   : > { %v3920_v39 = vsel %vm2501_vm0, %v3792_v50, %v3904_v34  ;;  %v3925_v21 = vsel %vm2501_vm0, %v3797_v59, %v3909_v32  ;;  %v3798_v50 = vsub.f32 %v3702_v17, %v3766_v35 }
 0x455   : > { %v3936_v29 = vmul.f32 0.088388346, %v3920_v39  ;;  %v3870_v63 = vpop.permute.xlu1 %3869  ;;  %v3941_v34 = vmul.f32 0.088388346, %v3925_v21 }
 0x456   : > { %v3906_v54 = vadd.f32 %v3870_v63, %v3810_v33  ;;  %v9000_v63 = vld [vmem:[#allocation8 + $0x4] ss:$0 sm:$0xff] }
 0x457   : > { %v5808_v31 = vpack.c.bf16 %v3936_v29, %v3935_v6 }
 0x458   : > { %v3922_v46 = vsel %vm2501_vm0, %v3794_v19, %v3906_v54 }
 0x459   : > { %5852 = vst [vmem:[%s8126_s11 + $0xe0] sm:$0xff] %v5808_v31   ;;  %v3938_v11 = vmul.f32 0.088388346, %v3922_v46  ;;  %v3874_v18 = vpop.permute.xlu1 %3873  ;;  %v10467_v31 = vld [vmem:[#allocation43_spill] sm:$0xff] }
 0x45a   : > { %v3908_v1 = vadd.f32 %v3874_v18, %v3812_v7 }
 0x45b   : > { %v5813_v57 = vpack.c.bf16 %v3938_v11, %v3937_v49 }
 0x45c   : > { %v3924_v14 = vsel %vm2501_vm0, %v3796_v23, %v3908_v1 }
 0x45d   : > { %5853 = vst [vmem:[%s8126_s11 + $0xe8] sm:$0xff] %v5813_v57   ;;  %v3940_v22 = vmul.f32 0.088388346, %v3924_v14  ;;  %v3878_v30 = vpop.permute.xlu1 %3877 }
 0x45e   : > { %v3910_v25 = vadd.f32 %v3878_v30, %v3814_v9  ;;  %v10468_v30 = vld [vmem:[#allocation48_spill] sm:$0xff] }
 0x45f   : > { %v5818_v0 = vpack.c.bf16 %v3940_v22, %v3939_v36 }
 0x460   : > { %v3926_v47 = vsel %vm2501_vm0, %v3798_v50, %v3910_v25 }
 0x461   : > { %5854 = vst [vmem:[%s8126_s11 + $0xf0] sm:$0xff] %v5818_v0   ;;  %v3942_v28 = vmul.f32 0.088388346, %v3926_v47 }
 0x463   : > { %v5823_v43 = vpack.c.bf16 %v3942_v28, %v3941_v34 }
 0x465   : > { %5855 = vst [vmem:[%s8126_s11 + $0xf8] sm:$0xff] %v5823_v43  }
 0x47d   : > { %v4042_v62 = vpop.xlane.xlu0 %4041 }
 0x47e   : > { %v4073_v52 = vmul.f32 0.0078125, %v4042_v62  ;;  %v10469_v62 = vld [vmem:[#allocation54_spill] sm:$0xff] }
 0x480   : > { %v4089_v39 = vadd.f32 1e-06, %v4073_v52 }
 0x481   : > { %v4046_v51 = vpop.xlane.xlu0 %4045 }
 0x482   : > { %6123 = vrsqrt.f32 %v4089_v39 }
 0x485   : > { %v4048_v33 = vpop.xlane.xlu0 %4047 }
 0x486   : > { %v4076_v1 = vmul.f32 0.0078125, %v4048_v33 }
 0x488   : > { %v4092_v50 = vadd.f32 1e-06, %v4076_v1 }
 0x489   : > { %v4050_v61 = vpop.xlane.xlu0 %4049 }
 0x48a   : > { %v4077_v6 = vmul.f32 0.0078125, %v4050_v61 }
 0x48c   : > { %v6124_v29 = vpop.eup %6123  ;;  %v4093_v35 = vadd.f32 1e-06, %v4077_v6 }
 0x48d   : > { %v4121_v19 = vmul.f32 %v6124_v29, %v10436_v40  ;;  %v4054_v48 = vpop.xlane.xlu0 %4053  ;;  %v4075_v40 = vmul.f32 0.0078125, %v4046_v51 }
 0x48e   : > { %6125 = vrsqrt.f32 %v4093_v35  ;;  %v4079_v38 = vmul.f32 0.0078125, %v4054_v48  ;;  %v10470_v35 = vld [vmem:[#allocation64_spill] sm:$0xff] }
 0x48f   : > { %v9004_v54 = vmul.f32 %v9000_v63, %v4121_v19  ;;  %v4091_v32 = vadd.f32 1e-06, %v4075_v40 }
 0x490   : > { %v4095_v10 = vadd.f32 1e-06, %v4079_v38 }
 0x491   : > { %10466 = vst [vmem:[#allocation28_spill] sm:$0xff] %v9004_v54  ;;  %v4058_v26 = vpop.xlane.xlu0 %4057  ;;  %v4173_v42 = vmul.f32 %v9004_v54, %v10467_v31 }
 0x492   : > { %6127 = vrsqrt.f32 %v4095_v10  ;;  %v4081_v37 = vmul.f32 0.0078125, %v4058_v26 }
 0x493   : > { %4205 = vrot.lane.b32.xlu0 %v4173_v42, %s6518_s12 }
 0x494   : > { %v4097_v46 = vadd.f32 1e-06, %v4081_v37 }
 0x495   : > { %v4062_v7 = vpop.xlane.xlu0 %4061 }
 0x496   : > { %6129 = vrsqrt.f32 %v4097_v46  ;;  %v4083_v2 = vmul.f32 0.0078125, %v4062_v7  ;;  %v10471_v46 = vld [vmem:[#allocation74_spill] sm:$0xff] }
 0x498   : > { %v6126_v49 = vpop.eup %6125  ;;  %v4099_v11 = vadd.f32 1e-06, %v4083_v2 }
 0x499   : > { %v4125_v18 = vmul.f32 %v6126_v49, %v10439_v41  ;;  %v4066_v23 = vpop.xlane.xlu0 %4065 }
 0x49a   : > { %6131 = vrsqrt.f32 %v4099_v11  ;;  %v4085_v4 = vmul.f32 0.0078125, %v4066_v23 }
 0x49b   : > { %v9011_v57 = vmul.f32 %v9000_v63, %v4125_v18  ;;  %v10472_v18 = vld [vmem:[#allocation77_spill] sm:$0xff] }
 0x49c   : > { %v6128_v59 = vpop.eup %6127  ;;  %v4101_v17 = vadd.f32 1e-06, %v4085_v4  ;;  %v4044_v14 = vpop.xlane.xlu1 %4043 }
 0x49d   : > { %v4127_v9 = vmul.f32 %v6128_v59, %v10441_v45  ;;  %v4074_v36 = vmul.f32 0.0078125, %v4044_v14  ;;  %v4070_v22 = vpop.xlane.xlu0 %4069  ;;  %v4177_v21 = vmul.f32 %v9011_v57, %v10468_v30 }
 0x49e   : > { %6133 = vrsqrt.f32 %v4101_v17  ;;  %v4087_v41 = vmul.f32 0.0078125, %v4070_v22  ;;  %v10474_v17 = vld [vmem:[#allocation80_spill] sm:$0xff] }
 0x49f   : > { %6135 = vrsqrt.f32 %v4091_v32  ;;  %v9017_v25 = vmul.f32 %v9000_v63, %v4127_v9  ;;  %v4090_v0 = vadd.f32 1e-06, %v4074_v36  ;;  %4213 = vrot.lane.b32.xlu0 %v4177_v21, %s6518_s12  ;;  %v10476_v21 = vld [vmem:[#allocation83_spill] sm:$0xff] }
 0x4a0   : > { %v6130_v47 = vpop.eup %6129  ;;  %v4103_v34 = vadd.f32 1e-06, %v4087_v41  ;;  %v4052_v28 = vpop.xlane.xlu1 %4051 }
 0x4a1   : > { %v4129_v45 = vmul.f32 %v6130_v47, %v10443_v5  ;;  %6137 = vrsqrt.f32 %v4090_v0  ;;  %v4078_v43 = vmul.f32 0.0078125, %v4052_v28  ;;  %v4179_v52 = vmul.f32 %v9017_v25, %v10469_v62  ;;  %v10477_v0 = vld [vmem:[#allocation35_spill] sm:$0xff] }
 0x4a2   : > { %6139 = vrsqrt.f32 %v4103_v34 }
 0x4a3   : > { %6141 = vrsqrt.f32 %v4092_v50  ;;  %v9024_v39 = vmul.f32 %v9000_v63, %v4129_v45  ;;  %v4094_v51 = vadd.f32 1e-06, %v4078_v43  ;;  %4217 = vrot.lane.b32.xlu0 %v4179_v52, %s6518_s12  ;;  %v10479_v52 = vld [vmem:[#allocation89_spill] sm:$0xff] }
 0x4a4   : > { %v6132_v33 = vpop.eup %6131  ;;  %v4056_v61 = vpop.xlane.xlu1 %4055 }
 0x4a5   : > { %v4131_v6 = vmul.f32 %v6132_v33, %v10444_v3  ;;  %v4080_v29 = vmul.f32 0.0078125, %v4056_v61  ;;  %v4181_v5 = vmul.f32 %v9024_v39, %v10470_v35  ;;  %6143 = vrsqrt.f32 %v4094_v51  ;;  %v10480_v61 = vld [vmem:[#allocation42_spill] sm:$0xff] }
 0x4a7   : > { %v9031_v19 = vmul.f32 %v9000_v63, %v4131_v6  ;;  %v4096_v48 = vadd.f32 1e-06, %v4080_v29  ;;  %4221 = vrot.lane.b32.xlu0 %v4181_v5, %s6518_s12 }
 0x4a8   : > { %v6134_v38 = vpop.eup %6133  ;;  %v4060_v10 = vpop.xlane.xlu1 %4059 }
 0x4a9   : > { %v6136_v26 = vpop.eup %6135  ;;  %v4133_v42 = vmul.f32 %v6134_v38, %v10445_v13  ;;  %v4082_v37 = vmul.f32 0.0078125, %v4060_v10  ;;  %v4183_v3 = vmul.f32 %v9031_v19, %v10471_v46  ;;  %6145 = vrsqrt.f32 %v4096_v48  ;;  %v10473_v13 = vld [vmem:[#allocation117_spill] sm:$0xff]  ;;  %v10482_v10 = vld [vmem:[#allocation95_spill] sm:$0xff] }
 0x4aa   : > { %v4123_v11 = vmul.f32 %v6136_v26, %v10437_v60 }
 0x4ab   : > { %v6138_v7 = vpop.eup %6137  ;;  %v9038_v2 = vmul.f32 %v9000_v63, %v4133_v42  ;;  %v4098_v40 = vadd.f32 1e-06, %v4082_v37  ;;  %4225 = vrot.lane.b32.xlu0 %v4183_v3, %s6518_s12  ;;  %v10483_v42 = vld [vmem:[#allocation47_spill] sm:$0xff] }
 0x4ac   : > { %v6140_v49 = vpop.eup %6139  ;;  %v4122_v23 = vmul.f32 %v6138_v7, %v10472_v18  ;;  %v4064_v4 = vpop.xlane.xlu1 %4063  ;;  %v9054_v60 = vmul.f32 %v9000_v63, %v4123_v11  ;;  %v10486_v11 = vld [vmem:[#allocation53_spill] sm:$0xff] }
 0x4ad   : > { %v6142_v32 = vpop.eup %6141  ;;  %v4135_v1 = vmul.f32 %v6140_v49, %v10473_v13  ;;  %v4084_v59 = vmul.f32 0.0078125, %v4064_v4  ;;  %v4185_v14 = vmul.f32 %v9038_v2, %v10474_v17  ;;  %6147 = vrsqrt.f32 %v4098_v40  ;;  %v10485_v40 = vld [vmem:[#allocation101_spill] sm:$0xff] }
 0x4ae   : > { %v9047_v9 = vmul.f32 %v9000_v63, %v4122_v23  ;;  %v4124_v41 = vmul.f32 %v6142_v32, %v10476_v21  ;;  %v4175_v6 = vmul.f32 %v9054_v60, %v10480_v61  ;;  %v10488_v32 = vld [vmem:[#allocation107_spill] sm:$0xff]  ;;  %v4287_v16 = vmul.f32 %v9153_v8, %v9054_v60 }
 0x4af   : > { %v9050_v36 = vmul.f32 %v9000_v63, %v4135_v1  ;;  %v4100_v22 = vadd.f32 1e-06, %v4084_v59  ;;  %4229 = vrot.lane.b32.xlu0 %v4185_v14, %s6518_s12  ;;  %v6144_v34 = vpop.eup %6143  ;;  %v10489_v1 = vld [vmem:[#allocation63_spill] sm:$0xff] }
 0x4b0   : > { %10475 = vst [vmem:[#allocation128_spill] sm:$0xff] %v9047_v9  ;;  %v4068_v50 = vpop.xlane.xlu1 %4067  ;;  %v4174_v47 = vmul.f32 %v9047_v9, %v10477_v0  ;;  %v9061_v43 = vmul.f32 %v9000_v63, %v4124_v41  ;;  %v4126_v51 = vmul.f32 %v6144_v34, %v10479_v52  ;;  %v10491_v41 = vld [vmem:[#allocation113_spill] sm:$0xff] }
 0x4b1   : > { %v4086_v28 = vmul.f32 0.0078125, %v4068_v50  ;;  %6149 = vrsqrt.f32 %v4100_v22 }
 0x4b2   : > { %4207 = vrot.lane.b32.xlu1 %v4174_v47, %s6518_s12  ;;  %10478 = vst [vmem:[#allocation50_spill] sm:$0xff] %v9061_v43  ;;  %v9068_v38 = vmul.f32 %v9000_v63, %v4126_v51  ;;  %v4176_v37 = vmul.f32 %v9061_v43, %v10483_v42  ;;  %v10492_v47 = vld [vmem:[#allocation119_spill] sm:$0xff] }
 0x4b3   : > { %v4102_v45 = vadd.f32 1e-06, %v4086_v28  ;;  %v6146_v29 = vpop.eup %6145  ;;  %v10493_v28 = vld [vmem:[#allocation73_spill] sm:$0xff] }
 0x4b4   : > { %v4072_v33 = vpop.xlane.xlu1 %4071  ;;  %10481 = vst [vmem:[#allocation30_spill] sm:$0xff] %v9068_v38  ;;  %v4128_v26 = vmul.f32 %v6146_v29, %v10482_v10  ;;  %v4178_v18 = vmul.f32 %v9068_v38, %v10486_v11  ;;  %v10497_v29 = vld [vmem:[#allocation76_spill] sm:$0xff] }
 0x4b5   : > { %v4088_v5 = vmul.f32 0.0078125, %v4072_v33  ;;  %6151 = vrsqrt.f32 %v4102_v45  ;;  %v10496_v33 = vld [vmem:[#allocation79_spill] sm:$0xff] }
 0x4b6   : > { %4209 = vrot.lane.b32.xlu1 %v4175_v6, %s6518_s12  ;;  %v9075_v7 = vmul.f32 %v9000_v63, %v4128_v26  ;;  %v10499_v26 = vld [vmem:[#allocation82_spill] sm:$0xff] }
 0x4b7   : > { %v4104_v48 = vadd.f32 1e-06, %v4088_v5  ;;  %v6148_v3 = vpop.eup %6147  ;;  %v4478_v5 = vmul.f32 %v10497_v29, %v10497_v29 }
 0x4b8   : > { %10484 = vst [vmem:[#allocation142_spill] sm:$0xff] %v9075_v7  ;;  %v4130_v49 = vmul.f32 %v6148_v3, %v10485_v40  ;;  %v4180_v59 = vmul.f32 %v9075_v7, %v10489_v1  ;;  %v10501_v40 = vld [vmem:[#allocation88_spill] sm:$0xff] }
 0x4b9   : > { %6153 = vrsqrt.f32 %v4104_v48  ;;  %v10498_v48 = vld [vmem:[#allocation85_spill] sm:$0xff] }
 0x4ba   : > { %4211 = vrot.lane.b32.xlu1 %v4176_v37, %s6518_s12  ;;  %v9082_v4 = vmul.f32 %v9000_v63, %v4130_v49  ;;  %v4480_v37 = vmul.f32 %v10499_v26, %v10499_v26  ;;  %v4482_v49 = vmul.f32 %v10501_v40, %v10501_v40 }
 0x4bb   : > { %v6150_v23 = vpop.eup %6149 }
 0x4bc   : > { %10487 = vst [vmem:[#allocation56_spill] sm:$0xff] %v9082_v4  ;;  %v4132_v13 = vmul.f32 %v6150_v23, %v10488_v32  ;;  %v4182_v45 = vmul.f32 %v9082_v4, %v10493_v28  ;;  %v10503_v32 = vld [vmem:[#allocation100_spill] sm:$0xff] }
 0x4be   : > { %4215 = vrot.lane.b32.xlu1 %v4178_v18, %s6518_s12  ;;  %v9089_v21 = vmul.f32 %v9000_v63, %v4132_v13  ;;  %v10502_v18 = vld [vmem:[#allocation94_spill] sm:$0xff]  ;;  %v4486_v13 = vmul.f32 %v10503_v32, %v10503_v32 }
 0x4bf   : > { %v6152_v14 = vpop.eup %6151  ;;  %v4484_v23 = vmul.f32 %v10502_v18, %v10502_v18 }
 0x4c0   : > { %10490 = vst [vmem:[#allocation133_spill] sm:$0xff] %v9089_v21  ;;  %v4134_v50 = vmul.f32 %v6152_v14, %v10491_v41  ;;  %v4184_v6 = vmul.f32 %v9089_v21, %v10496_v33 }
 0x4c2   : > { %4219 = vrot.lane.b32.xlu1 %v4180_v59, %s6518_s12  ;;  %v9100_v51 = vmul.f32 %v9000_v63, %v4134_v50  ;;  %v10504_v59 = vld [vmem:[#allocation106_spill] sm:$0xff] }
 0x4c3   : > { %v6154_v22 = vpop.eup %6153  ;;  %v4488_v14 = vmul.f32 %v10504_v59, %v10504_v59  ;;  %v10506_v50 = vld [vmem:[#allocation118_spill] sm:$0xff] }
 0x4c4   : > { %v4136_v34 = vmul.f32 %v6154_v22, %v10492_v47  ;;  %10495 = vst [vmem:[#allocation129_spill] sm:$0xff] %v9100_v51  ;;  %v4186_v10 = vmul.f32 %v9100_v51, %v10498_v48  ;;  %v10505_v22 = vld [vmem:[#allocation112_spill] sm:$0xff]  ;;  %v4492_v47 = vmul.f32 %v10506_v50, %v10506_v50  ;;  %v9173_v48 = vld [vmem:[%s6837_s23 + $0x20] sm:$0xff] }
 0x4c5   : > { %v4490_v41 = vmul.f32 %v10505_v22, %v10505_v22  ;;  %10519 = vst [vmem:[#allocation37_spill] sm:$0xff] %v9173_v48 }
 0x4c6   : > { %v9096_v52 = vmul.f32 %v9000_v63, %v4136_v34  ;;  %4223 = vrot.lane.b32.xlu1 %v4182_v45, %s6518_s12  ;;  %v10500_v63 = vld [vmem:[#allocation84_spill] sm:$0xff]  ;;  %v10507_v34 = vld [vmem:[#allocation78_spill] sm:$0xff] }
 0x4c7   : > { %v4481_v3 = vmul.f32 %v10500_v63, %v10500_v63  ;;  %v4479_v45 = vmul.f32 %v10507_v34, %v10507_v34 }
 0x4c8   : > { %10494 = vst [vmem:[#allocation36_spill] sm:$0xff] %v9096_v52 }
 0x4ca   : > { %4227 = vrot.lane.b32.xlu1 %v4184_v6, %s6518_s12  ;;  %v10508_v6 = vld [vmem:[#allocation90_spill] sm:$0xff] }
 0x4ce   : > { %4231 = vrot.lane.b32.xlu1 %v4186_v10, %s6518_s12  ;;  %4494 = vadd.xlane.f32.xlu0 %v4478_v5  ;;  %v4483_v5 = vmul.f32 %v10508_v6, %v10508_v6  ;;  %v10509_v10 = vld [vmem:[#allocation96_spill] sm:$0xff] }
 0x4d2   : > { %4498 = vadd.xlane.f32.xlu0 %v4480_v37  ;;  %v4485_v37 = vmul.f32 %v10509_v10, %v10509_v10 }
 0x4d6   : > { %4500 = vadd.xlane.f32.xlu0 %v4481_v3  ;;  %v10510_v3 = vld [vmem:[#allocation102_spill] sm:$0xff] }
 0x4da   : > { %4502 = vadd.xlane.f32.xlu0 %v4482_v49  ;;  %v4487_v49 = vmul.f32 %v10510_v3, %v10510_v3  ;;  %v9272_v3 = vld [vmem:[%s6844_s18 + $0x18] sm:$0xff] }
 0x4db   : > { %10531 = vst [vmem:[#allocation136_spill] sm:$0xff] %v9272_v3 }
 0x4de   : > { %4506 = vadd.xlane.f32.xlu0 %v4484_v23  ;;  %v10511_v23 = vld [vmem:[#allocation108_spill] sm:$0xff] }
 0x4e2   : > { %4510 = vadd.xlane.f32.xlu0 %v4486_v13  ;;  %v4489_v13 = vmul.f32 %v10511_v23, %v10511_v23  ;;  %v9220_v23 = vld [vmem:[%s6844_s18 + $0x60] sm:$0xff] }
 0x4e3   : > { %10525 = vst [vmem:[#allocation135_spill] sm:$0xff] %v9220_v23 }
 0x4e6   : > { %4514 = vadd.xlane.f32.xlu0 %v4488_v14  ;;  %v10512_v14 = vld [vmem:[#allocation86_spill] sm:$0xff] }
 0x4ea   : > { %4518 = vadd.xlane.f32.xlu0 %v4490_v41  ;;  %v4187_v41 = vmul.f32 %v9050_v36, %v10512_v14 }
 0x4ee   : > { %4522 = vadd.xlane.f32.xlu0 %v4492_v47  ;;  %v10513_v47 = vld [vmem:[#allocation114_spill] sm:$0xff] }
 0x4f2   : > { %4496 = vadd.xlane.f32.xlu1 %v4479_v45  ;;  %v4491_v45 = vmul.f32 %v10513_v47, %v10513_v47  ;;  %v9201_v47 = vld [vmem:[%s6844_s18 + $0x50] sm:$0xff] }
 0x4f3   : > { %10522 = vst [vmem:[#allocation39_spill] sm:$0xff] %v9201_v47 }
 0x4f6   : > { %4504 = vadd.xlane.f32.xlu1 %v4483_v5  ;;  %v9142_v5 = vld [vmem:[%s6837_s23] sm:$0xff] }
 0x4f7   : > { %10514 = vst [vmem:[#allocation51_spill] sm:$0xff] %v9142_v5 }
 0x4fa   : > { %4508 = vadd.xlane.f32.xlu1 %v4485_v37  ;;  %v9146_v37 = vmul.f32 %v9142_v5, %v9004_v54  ;;  %v9161_v5 = vld [vmem:[%s6844_s18 + $0x20] sm:$0xff] }
 0x4fb   : > { %v4289_v20 = vmul.f32 %v9161_v5, %v9011_v57 }
 0x4fc   : > { %10515 = vst [vmem:[#allocation146_spill] sm:$0xff] %v9146_v37  ;;  %v10524_v37 = vld [vmem:[#allocation91_spill] sm:$0xff] }
 0x4fd   : > { %v4188_v1 = vmul.f32 %v9096_v52, %v10524_v37  ;;  %v9233_v37 = vld [vmem:[%s6844_s18] sm:$0xff] }
 0x4fe   : > { %4512 = vadd.xlane.f32.xlu1 %v4487_v49  ;;  %v4285_v33 = vmul.f32 %v9233_v37, %v9004_v54  ;;  %v9253_v54 = vld [vmem:[%s6844_s18 + $0x8] sm:$0xff] }
 0x4ff   : > { %10527 = vst [vmem:[#allocation65_spill] sm:$0xff] %v9253_v54 }
 0x502   : > { %4516 = vadd.xlane.f32.xlu1 %v4489_v13 }
 0x504   : > { %4233 = vrot.lane.b32.xlu0 %v4187_v41, %s6518_s12  ;;  %v10517_v41 = vld [vmem:[#allocation120_spill] sm:$0xff] }
 0x505   : > { %v9148_v49 = vpop.permute.xlu0 %4205  ;;  %v4493_v24 = vmul.f32 %v10517_v41, %v10517_v41 }
 0x506   : > { %10516 = vst [vmem:[#allocation57_spill] sm:$0xff] %v9148_v49  ;;  %4520 = vadd.xlane.f32.xlu1 %v4491_v45  ;;  %v9167_v45 = vld [vmem:[%s6844_s18 + $0x30] sm:$0xff]  ;;  %v4295_v49 = vmul.f32 %v9201_v47, %v9031_v19 }
 0x507   : > { %10518 = vst [vmem:[#allocation134_spill] sm:$0xff] %v9167_v45  ;;  %v4291_v13 = vmul.f32 %v9167_v45, %v9017_v25  ;;  %v9240_v45 = vld [vmem:[%s6844_s18 + $0x70] sm:$0xff] }
 0x508   : > { %4321 = vrot.lane.b32.xlu0 %v4287_v16, %s6518_s12  ;;  %10526 = vst [vmem:[#allocation59_spill] sm:$0xff] %v9240_v45 }
 0x50a   : > { %4524 = vadd.xlane.f32.xlu1 %v4493_v24  ;;  %v9177_v24 = vmul.f32 %v9173_v48, %v9011_v57 }
 0x50c   : > { %4325 = vrot.lane.b32.xlu0 %v4289_v20, %s6518_s12  ;;  %v9184_v20 = vld [vmem:[%s6844_s18 + $0x40] sm:$0xff] }
 0x50d   : > { %10520 = vst [vmem:[#allocation130_spill] sm:$0xff] %v9184_v20  ;;  %v4293_v41 = vmul.f32 %v9184_v20, %v9024_v39 }
 0x510   : > { %4329 = vrot.lane.b32.xlu0 %v4291_v13, %s6518_s12  ;;  %v9190_v13 = vld [vmem:[%s6837_s23 + $0x30] sm:$0xff] }
 0x511   : > { %v9179_v16 = vpop.permute.xlu0 %4213  ;;  %10521 = vst [vmem:[#allocation52_spill] sm:$0xff] %v9190_v13  ;;  %v9194_v28 = vmul.f32 %v9190_v13, %v9017_v25 }
 0x514   : > { %4333 = vrot.lane.b32.xlu0 %v4293_v41, %s6518_s12  ;;  %v9207_v41 = vld [vmem:[%s6837_s23 + $0x40] sm:$0xff] }
 0x515   : > { %v9196_v48 = vpop.permute.xlu0 %4217  ;;  %10523 = vst [vmem:[#allocation58_spill] sm:$0xff] %v9207_v41  ;;  %v9211_v13 = vmul.f32 %v9207_v41, %v9024_v39  ;;  %v9228_v41 = vmul.f32 %v8791_v58, %v9031_v19  ;;  %v9248_v58 = vmul.f32 %v8859_v44, %v9038_v2 }
 0x518   : > { %4337 = vrot.lane.b32.xlu0 %v4295_v49, %s6518_s12  ;;  %v4297_v49 = vmul.f32 %v9220_v23, %v9038_v2  ;;  %v4286_v23 = vmul.f32 %v9253_v54, %v9047_v9  ;;  %v9280_v54 = vld [vmem:[%s6844_s18 + $0x28] sm:$0xff] }
 0x519   : > { %v9213_v20 = vpop.permute.xlu0 %4221  ;;  %10532 = vst [vmem:[#allocation34_spill] sm:$0xff] %v9280_v54 }
 0x51b   : > { %4235 = vrot.lane.b32.xlu1 %v4188_v1, %s6518_s12  ;;  %v4299_v1 = vmul.f32 %v9240_v45, %v9050_v36  ;;  %v4288_v45 = vmul.f32 %v9272_v3, %v9061_v43 }
 0x51c   : > { %4341 = vrot.lane.b32.xlu0 %v4297_v49, %s6518_s12 }
 0x51d   : > { %v9230_v47 = vpop.permute.xlu0 %4225 }
 0x51f   : > { %4317 = vrot.lane.b32.xlu1 %v4285_v33, %s6518_s12  ;;  %v9261_v33 = vld [vmem:[%s6837_s23 + $0x8] sm:$0xff] }
 0x520   : > { %4345 = vrot.lane.b32.xlu0 %v4299_v1, %s6518_s12  ;;  %10528 = vst [vmem:[#allocation138_spill] sm:$0xff] %v9261_v33  ;;  %v9265_v44 = vmul.f32 %v9261_v33, %v9047_v9  ;;  %v4290_v33 = vmul.f32 %v9280_v54, %v9068_v38  ;;  %v9286_v9 = vld [vmem:[%s6837_s23 + $0x18] sm:$0xff] }
 0x521   : > { %v9250_v49 = vpop.permute.xlu0 %4229  ;;  %10533 = vst [vmem:[#allocation60_spill] sm:$0xff] %v9286_v9  ;;  %v9290_v11 = vmul.f32 %v9286_v9, %v9061_v43 }
 0x522   : > { %10529 = vst [vmem:[#allocation132_spill] sm:$0xff] %v9265_v44 }
 0x523   : > { %4319 = vrot.lane.b32.xlu1 %v4286_v23, %s6518_s12  ;;  %10534 = vst [vmem:[#allocation66_spill] sm:$0xff] %v9290_v11 }
 0x524   : > { %v9267_v1 = vpop.permute.xlu1 %4207 }
 0x525   : > { %10530 = vst [vmem:[#allocation150_spill] sm:$0xff] %v9267_v1  ;;  %v9297_v1 = vld [vmem:[%s6844_s18 + $0x38] sm:$0xff] }
 0x526   : > { %10536 = vst [vmem:[#allocation137_spill] sm:$0xff] %v9297_v1  ;;  %v4292_v54 = vmul.f32 %v9297_v1, %v9075_v7 }
 0x527   : > { %4323 = vrot.lane.b32.xlu1 %v4288_v45, %s6518_s12  ;;  %v9331_v45 = vld [vmem:[%s6844_s18 + $0x58] sm:$0xff] }
 0x528   : > { %v9277_v23 = vpop.permute.xlu1 %4209  ;;  %10544 = vst [vmem:[#allocation68_spill] sm:$0xff] %v9331_v45 }
 0x52b   : > { %4327 = vrot.lane.b32.xlu1 %v4290_v33, %s6518_s12  ;;  %v9303_v33 = vld [vmem:[%s6837_s23 + $0x28] sm:$0xff] }
 0x52c   : > { %v9292_v3 = vpop.permute.xlu1 %4211  ;;  %10537 = vst [vmem:[#allocation38_spill] sm:$0xff] %v9303_v33  ;;  %v9307_v9 = vmul.f32 %v9303_v33, %v9068_v38 }
 0x52d   : > { %10535 = vst [vmem:[#allocation27_spill] sm:$0xff] %v9292_v3  ;;  %v9314_v3 = vld [vmem:[%s6844_s18 + $0x48] sm:$0xff] }
 0x52e   : > { %10538 = vst [vmem:[#allocation61_spill] sm:$0xff] %v9307_v9  ;;  %10540 = vst [vmem:[#allocation29_spill] sm:$0xff] %v9314_v3  ;;  %v4294_v1 = vmul.f32 %v9314_v3, %v9082_v4  ;;  %v9348_v9 = vld [vmem:[%s6844_s18 + $0x68] sm:$0xff] }
 0x52f   : > { %4331 = vrot.lane.b32.xlu1 %v4292_v54, %s6518_s12  ;;  %v9320_v54 = vld [vmem:[%s6837_s23 + $0x38] sm:$0xff]  ;;  %10548 = vst [vmem:[#allocation148_spill] sm:$0xff] %v9348_v9  ;;  %v4298_v38 = vmul.f32 %v9348_v9, %v9100_v51  ;;  %v9369_v9 = vmul.f32 %v8867_v15, %v9100_v51 }
 0x530   : > { %v9309_v43 = vpop.permute.xlu1 %4215  ;;  %10541 = vst [vmem:[#allocation139_spill] sm:$0xff] %v9320_v54  ;;  %v9324_v11 = vmul.f32 %v9320_v54, %v9075_v7 }
 0x531   : > { %10539 = vst [vmem:[#allocation67_spill] sm:$0xff] %v9309_v43  ;;  %v4296_v43 = vmul.f32 %v9331_v45, %v9089_v21 }
 0x532   : > { %10542 = vst [vmem:[#allocation145_spill] sm:$0xff] %v9324_v11  ;;  %v9375_v11 = vld [vmem:[#allocation8 + $0x5] ss:$0 sm:$0xff] }
 0x533   : > { %4335 = vrot.lane.b32.xlu1 %v4294_v1, %s6518_s12  ;;  %v9337_v1 = vld [vmem:[%s6837_s23 + $0x48] sm:$0xff] }
 0x534   : > { %v9326_v33 = vpop.permute.xlu1 %4219  ;;  %10545 = vst [vmem:[#allocation31_spill] sm:$0xff] %v9337_v1  ;;  %v9341_v3 = vmul.f32 %v9337_v1, %v9082_v4  ;;  %v9362_v4 = vld [vmem:[%s6844_s18 + $0x78] sm:$0xff] }
 0x535   : > { %10543 = vst [vmem:[#allocation62_spill] sm:$0xff] %v9326_v33  ;;  %10551 = vst [vmem:[#allocation144_spill] sm:$0xff] %v9362_v4  ;;  %v4300_v7 = vmul.f32 %v9362_v4, %v9096_v52 }
 0x536   : > { %10546 = vst [vmem:[#allocation69_spill] sm:$0xff] %v9341_v3 }
 0x537   : > { %4339 = vrot.lane.b32.xlu1 %v4296_v43, %s6518_s12  ;;  %v9355_v43 = vmul.f32 %v8799_v55, %v9089_v21 }
 0x538   : > { %v9343_v54 = vpop.permute.xlu1 %4223 }
 0x539   : > { %10547 = vst [vmem:[#allocation141_spill] sm:$0xff] %v9343_v54  ;;  %10549 = vst [vmem:[#allocation32_spill] sm:$0xff] %v9355_v43 }
 0x53b   : > { %4343 = vrot.lane.b32.xlu1 %v4298_v38, %s6518_s12 }
 0x53c   : > { %v9357_v45 = vpop.permute.xlu1 %4227 }
 0x53d   : > { %10550 = vst [vmem:[#allocation70_spill] sm:$0xff] %v9357_v45 }
 0x53f   : > { %4347 = vrot.lane.b32.xlu1 %v4300_v7, %s6518_s12 }
 0x540   : > { %v9371_v38 = vpop.permute.xlu1 %4231 }
 0x55b   : > { %v4495_v21 = vpop.xlane.xlu0 %4494 }
 0x55c   : > { %v4526_v54 = vmul.f32 0.0078125, %v4495_v21 }
 0x55e   : > { %v4542_v3 = vadd.f32 1e-06, %v4526_v54 }
 0x55f   : > { %v4499_v1 = vpop.xlane.xlu0 %4498 }
 0x560   : > { %6155 = vrsqrt.f32 %v4542_v3  ;;  %v4528_v45 = vmul.f32 0.0078125, %v4499_v1 }
 0x562   : > { %v4544_v43 = vadd.f32 1e-06, %v4528_v45 }
 0x563   : > { %v4501_v33 = vpop.xlane.xlu0 %4500 }
 0x564   : > { %6157 = vrsqrt.f32 %v4544_v43 }
 0x567   : > { %v4503_v4 = vpop.xlane.xlu0 %4502 }
 0x568   : > { %v4530_v7 = vmul.f32 0.0078125, %v4503_v4 }
 0x56a   : > { %v6156_v52 = vpop.eup %6155  ;;  %v4546_v15 = vadd.f32 1e-06, %v4530_v7 }
 0x56b   : > { %v4574_v51 = vmul.f32 %v6156_v52, %v10497_v29  ;;  %v4507_v44 = vpop.xlane.xlu0 %4506 }
 0x56c   : > { %6159 = vrsqrt.f32 %v4546_v15  ;;  %v4532_v55 = vmul.f32 0.0078125, %v4507_v44 }
 0x56d   : > { %v9379_v21 = vmul.f32 %v9375_v11, %v4574_v51 }
 0x56e   : > { %v6158_v54 = vpop.eup %6157  ;;  %v4548_v3 = vadd.f32 1e-06, %v4532_v55 }
 0x56f   : > { %v4576_v45 = vmul.f32 %v6158_v54, %v10499_v26  ;;  %v4511_v1 = vpop.xlane.xlu0 %4510  ;;  %v4626_v4 = vmul.f32 %v9379_v21, %v10467_v31 }
 0x570   : > { %6161 = vrsqrt.f32 %v4548_v3  ;;  %v4534_v43 = vmul.f32 0.0078125, %v4511_v1  ;;  %v4529_v1 = vmul.f32 0.0078125, %v4501_v33 }
 0x571   : > { %v9385_v7 = vmul.f32 %v9375_v11, %v4576_v45  ;;  %4658 = vrot.lane.b32.xlu0 %v4626_v4, %s6518_s12 }
 0x572   : > { %v4550_v52 = vadd.f32 1e-06, %v4534_v43 }
 0x573   : > { %v4515_v29 = vpop.xlane.xlu0 %4514  ;;  %v4628_v51 = vmul.f32 %v9385_v7, %v10480_v61 }
 0x574   : > { %6163 = vrsqrt.f32 %v4550_v52  ;;  %v4536_v44 = vmul.f32 0.0078125, %v4515_v29 }
 0x575   : > { %4662 = vrot.lane.b32.xlu0 %v4628_v51, %s6518_s12 }
 0x576   : > { %v6160_v26 = vpop.eup %6159  ;;  %v4552_v55 = vadd.f32 1e-06, %v4536_v44  ;;  %v4545_v44 = vadd.f32 1e-06, %v4529_v1 }
 0x577   : > { %v4578_v31 = vmul.f32 %v6160_v26, %v10501_v40  ;;  %v4519_v15 = vpop.xlane.xlu0 %4518 }
 0x578   : > { %6165 = vrsqrt.f32 %v4552_v55  ;;  %v4538_v54 = vmul.f32 0.0078125, %v4519_v15 }
 0x579   : > { %v9393_v3 = vmul.f32 %v9375_v11, %v4578_v31 }
 0x57a   : > { %v6162_v45 = vpop.eup %6161  ;;  %v4554_v4 = vadd.f32 1e-06, %v4538_v54 }
 0x57b   : > { %v4580_v43 = vmul.f32 %v6162_v45, %v10502_v18  ;;  %v4523_v61 = vpop.xlane.xlu0 %4522  ;;  %v4630_v52 = vmul.f32 %v9393_v3, %v10468_v30  ;;  %v9412_v45 = vld [vmem:[%s6837_s23 + $0x10] sm:$0xff] }
 0x57c   : > { %6167 = vrsqrt.f32 %v4554_v4  ;;  %v4540_v29 = vmul.f32 0.0078125, %v4523_v61  ;;  %v4159_v1 = vmul.f32 %v9412_v45, %v9054_v60  ;;  %v10552_v4 = vld [vmem:[#allocation98_spill] sm:$0xff] }
 0x57d   : > { %v9399_v40 = vmul.f32 %v9375_v11, %v4580_v43  ;;  %4666 = vrot.lane.b32.xlu0 %v4630_v52, %s6518_s12  ;;  %v4271_v43 = vmul.f32 %v9054_v60, %v10552_v4 }
 0x57e   : > { %v6164_v51 = vpop.eup %6163  ;;  %v4556_v26 = vadd.f32 1e-06, %v4540_v29 }
 0x57f   : > { %v4582_v33 = vmul.f32 %v6164_v51, %v10503_v32  ;;  %v4497_v55 = vpop.xlane.xlu1 %4496  ;;  %v9403_v31 = vpop.permute.xlu0 %4233  ;;  %v4632_v18 = vmul.f32 %v9399_v40, %v10469_v62  ;;  %v4255_v51 = vsub.f32 %v4159_v1, %v9277_v23 }
 0x580   : > { %6169 = vrsqrt.f32 %v4556_v26  ;;  %v4527_v30 = vmul.f32 0.0078125, %v4497_v55 }
 0x581   : > { %v9408_v15 = vmul.f32 %v9375_v11, %v4582_v33  ;;  %4670 = vrot.lane.b32.xlu0 %v4632_v18, %s6518_s12  ;;  %6171 = vrsqrt.f32 %v4545_v44  ;;  %v10553_v18 = vld [vmem:[#allocation104_spill] sm:$0xff] }
 0x582   : > { %v6166_v54 = vpop.eup %6165  ;;  %v4543_v32 = vadd.f32 1e-06, %v4527_v30  ;;  %v4273_v30 = vmul.f32 %v9011_v57, %v10553_v18 }
 0x583   : > { %v4584_v62 = vmul.f32 %v6166_v54, %v10504_v59  ;;  %v4505_v61 = vpop.xlane.xlu1 %4504  ;;  %v4322_v52 = vpop.permute.xlu0 %4321  ;;  %v4634_v29 = vmul.f32 %v9408_v15, %v10470_v35 }
 0x584   : > { %6173 = vrsqrt.f32 %v4543_v32  ;;  %v4531_v26 = vmul.f32 0.0078125, %v4505_v61  ;;  %v4367_v33 = vadd.f32 %v4322_v52, %v4271_v43  ;;  %v10554_v52 = vsub.f32 %v9177_v24, %v9179_v16 }
 0x585   : > { %v9423_v55 = vmul.f32 %v9375_v11, %v4584_v62  ;;  %4674 = vrot.lane.b32.xlu0 %v4634_v29, %s6518_s12  ;;  %v10555_v29 = vld [vmem:[#allocation110_spill] sm:$0xff] }
 0x586   : > { %v6168_v44 = vpop.eup %6167  ;;  %v4547_v60 = vadd.f32 1e-06, %v4531_v26  ;;  %v4383_v59 = vsel %vm2501_vm0, %v4255_v51, %v4367_v33  ;;  %v4275_v51 = vmul.f32 %v9017_v25, %v10555_v29 }
 0x587   : > { %v4586_v35 = vmul.f32 %v6168_v44, %v10505_v22  ;;  %v5630_v54 = vpack.c.bf16 %v4383_v59, %v4383_v59  ;;  %v4509_v23 = vpop.xlane.xlu1 %4508  ;;  %v4326_v1 = vpop.permute.xlu0 %4325  ;;  %v4636_v32 = vmul.f32 %v9423_v55, %v10471_v46 }
 0x588   : > { %6175 = vrsqrt.f32 %v4547_v60  ;;  %v4533_v43 = vmul.f32 0.0078125, %v4509_v23  ;;  %v4369_v62 = vadd.f32 %v4326_v1, %v4273_v30 }
 0x589   : > { %v9433_v61 = vmul.f32 %v9375_v11, %v4586_v35  ;;  %4463 = vst [vmem:[%s9436_s19 + $0x10] sm:$0xf] %v5630_v54  ;;  %4678 = vrot.lane.b32.xlu0 %v4636_v32, %s6518_s12 }
 0x58a   : > { %v6170_v57 = vpop.eup %6169  ;;  %v4549_v22 = vadd.f32 1e-06, %v4533_v43  ;;  %v4385_v46 = vsel %vm2501_vm0, %v10554_v52, %v4369_v62 }
 0x58b   : > { %v4588_v26 = vmul.f32 %v6170_v57, %v10506_v50  ;;  %v5632_v33 = vpack.c.bf16 %v4385_v46, %v4385_v46  ;;  %v4513_v44 = vpop.xlane.xlu1 %4512  ;;  %v4330_v60 = vpop.permute.xlu0 %4329  ;;  %v4638_v59 = vmul.f32 %v9433_v61, %v10474_v17  ;;  %v10556_v50 = vsub.f32 %v9194_v28, %v9196_v48 }
 0x58c   : > { %v6172_v30 = vpop.eup %6171  ;;  %6177 = vrsqrt.f32 %v4549_v22  ;;  %v4535_v35 = vmul.f32 0.0078125, %v4513_v44  ;;  %v4371_v54 = vadd.f32 %v4330_v60, %v4275_v51  ;;  %v4277_v17 = vmul.f32 %v9024_v39, %v10434_v56 }
 0x58d   : > { %v9450_v23 = vmul.f32 %v9375_v11, %v4588_v26  ;;  %4465 = vst [vmem:[%s9436_s19 + $0x20] sm:$0xf] %v5632_v33  ;;  %4682 = vrot.lane.b32.xlu0 %v4638_v59, %s6518_s12  ;;  %v4577_v1 = vmul.f32 %v6172_v30, %v10500_v63  ;;  %v10557_v63 = vsub.f32 %v9211_v13, %v9213_v20 }
 0x58e   : > { %v6174_v25 = vpop.eup %6173  ;;  %v4551_v24 = vadd.f32 1e-06, %v4535_v35  ;;  %v4387_v16 = vsel %vm2501_vm0, %v10556_v50, %v4371_v54  ;;  %v4738_v51 = vmul.f32 %v9233_v37, %v9379_v21  ;;  %v4740_v54 = vmul.f32 %v9153_v8, %v9385_v7 }
 0x58f   : > { %v4575_v32 = vmul.f32 %v6174_v25, %v10507_v34  ;;  %v5634_v43 = vpack.c.bf16 %v4387_v16, %v4387_v16  ;;  %v4517_v62 = vpop.xlane.xlu1 %4516  ;;  %v4334_v57 = vpop.permute.xlu0 %4333  ;;  %v4640_v22 = vmul.f32 %v9450_v23, %v10512_v14  ;;  %v4279_v14 = vmul.f32 %v9031_v19, %v10440_v27 }
 0x590   : > { %6179 = vrsqrt.f32 %v4551_v24  ;;  %v4537_v52 = vmul.f32 0.0078125, %v4517_v62  ;;  %v4373_v46 = vadd.f32 %v4334_v57, %v4277_v17  ;;  %v9478_v26 = vmul.f32 %v9375_v11, %v4577_v1 }
 0x591   : > { %v9465_v28 = vmul.f32 %v9375_v11, %v4575_v32  ;;  %4467 = vst [vmem:[%s9436_s19 + $0x30] sm:$0xf] %v5634_v43  ;;  %4686 = vrot.lane.b32.xlu0 %v4640_v22, %s6518_s12  ;;  %v9501_v32 = vld [vmem:[%s6837_s23 + $0x70] sm:$0xff]  ;;  %v10559_v43 = vsub.f32 %v9248_v58, %v9250_v49  ;;  %v4283_v62 = vmul.f32 %v9050_v36, %v10463_v12 }
 0x592   : > { %v6176_v39 = vpop.eup %6175  ;;  %v4553_v48 = vadd.f32 1e-06, %v4537_v52  ;;  %v4389_v34 = vsel %vm2501_vm0, %v10557_v63, %v4373_v46  ;;  %v4629_v1 = vmul.f32 %v9478_v26, %v10483_v42  ;;  %v4742_v57 = vmul.f32 %v9161_v5, %v9393_v3  ;;  %v10560_v52 = vld [vmem:[#allocation102_spill] sm:$0xff] }
 0x593   : > { %v4579_v33 = vmul.f32 %v6176_v39, %v10508_v6  ;;  %v5636_v44 = vpack.c.bf16 %v4389_v34, %v4389_v34  ;;  %v4521_v60 = vpop.xlane.xlu1 %4520  ;;  %v4338_v59 = vpop.permute.xlu0 %4337  ;;  %v4627_v30 = vmul.f32 %v9465_v28, %v10477_v0  ;;  %v10558_v6 = vsub.f32 %v9228_v41, %v9230_v47  ;;  %v10561_v34 = vld [vmem:[#allocation53_spill] sm:$0xff] }
 0x594   : > { %6181 = vrsqrt.f32 %v4553_v48  ;;  %v4539_v20 = vmul.f32 0.0078125, %v4521_v60  ;;  %v4375_v13 = vadd.f32 %v4338_v59, %v4279_v14  ;;  %v4281_v0 = vmul.f32 %v9038_v2, %v10452_v53  ;;  %v10564_v60 = vld [vmem:[#allocation134_spill] sm:$0xff] }
 0x595   : > { %4469 = vst [vmem:[%s9436_s19 + $0x40] sm:$0xf] %v5636_v44  ;;  %4660 = vrot.lane.b32.xlu1 %v4627_v30, %s6518_s12  ;;  %4770 = vrot.lane.b32.xlu0 %v4738_v51, %s6518_s12  ;;  %v9495_v25 = vmul.f32 %v9375_v11, %v4579_v33  ;;  %v4171_v2 = vmul.f32 %v9501_v32, %v9050_v36  ;;  %v10562_v51 = vld [vmem:[#allocation92_spill] sm:$0xff] }
 0x596   : > { %v6178_v19 = vpop.eup %6177  ;;  %v4555_v37 = vadd.f32 1e-06, %v4539_v20  ;;  %v4391_v35 = vsel %vm2501_vm0, %v10558_v6, %v4375_v13  ;;  %v10563_v33 = vld [vmem:[#allocation28_spill] sm:$0xff]  ;;  %v4744_v59 = vmul.f32 %v10564_v60, %v9399_v40 }
 0x597   : > { %v4581_v24 = vmul.f32 %v6178_v19, %v10509_v10  ;;  %v5638_v50 = vpack.c.bf16 %v4391_v35, %v4391_v35  ;;  %v4525_v16 = vpop.xlane.xlu1 %4524  ;;  %v4342_v17 = vpop.permute.xlu0 %4341  ;;  %v4631_v58 = vmul.f32 %v9495_v25, %v10561_v34  ;;  %v4267_v49 = vsub.f32 %v4171_v2, %v9403_v31  ;;  %v10565_v31 = vld [vmem:[#allocation108_spill] sm:$0xff]  ;;  %v10576_v34 = vld [vmem:[#allocation150_spill] sm:$0xff] }
 0x598   : > { %6183 = vrsqrt.f32 %v4555_v37  ;;  %v4541_v47 = vmul.f32 0.0078125, %v4525_v16  ;;  %v4377_v41 = vadd.f32 %v4342_v17, %v4281_v0  ;;  %v4269_v44 = vmul.f32 %v10563_v33, %v10562_v51  ;;  %v10566_v37 = vld [vmem:[#allocation63_spill] sm:$0xff]  ;;  %v10570_v17 = vld [vmem:[#allocation97_spill] sm:$0xff] }
 0x599   : > { %4471 = vst [vmem:[%s9436_s19 + $0x50] sm:$0xf] %v5638_v50  ;;  %4664 = vrot.lane.b32.xlu1 %v4629_v1, %s6518_s12  ;;  %4774 = vrot.lane.b32.xlu0 %v4740_v54, %s6518_s12  ;;  %v9517_v22 = vmul.f32 %v9375_v11, %v4581_v24  ;;  %v10567_v54 = vld [vmem:[#allocation146_spill] sm:$0xff]  ;;  %v10568_v24 = vld [vmem:[#allocation57_spill] sm:$0xff]  ;;  %v10571_v1 = vld [vmem:[#allocation128_spill] sm:$0xff] }
 0x59a   : > { %v6180_v8 = vpop.eup %6179  ;;  %v4557_v10 = vadd.f32 1e-06, %v4541_v47  ;;  %v4393_v42 = vsel %vm2501_vm0, %v10559_v43, %v4377_v41  ;;  %v10569_v50 = vsub.f32 %v10567_v54, %v10568_v24  ;;  %v4270_v47 = vmul.f32 %v10571_v1, %v10570_v17  ;;  %v10572_v41 = vld [vmem:[#allocation130_spill] sm:$0xff]  ;;  %v10580_v33 = vld [vmem:[#allocation39_spill] sm:$0xff] }
 0x59b   : > { %v4583_v46 = vmul.f32 %v6180_v8, %v10560_v52  ;;  %v5640_v39 = vpack.c.bf16 %v4393_v42, %v4393_v42  ;;  %v9520_v48 = vpop.permute.xlu1 %4235  ;;  %v4346_v63 = vpop.permute.xlu0 %4345  ;;  %v4633_v6 = vmul.f32 %v9517_v22, %v10566_v37  ;;  %v4746_v2 = vmul.f32 %v10572_v41, %v9408_v15  ;;  %v10584_v54 = vld [vmem:[#allocation27_spill] sm:$0xff]  ;;  %v10587_v1 = vld [vmem:[#allocation30_spill] sm:$0xff] }
 0x59c   : > { %6185 = vrsqrt.f32 %v4557_v10  ;;  %v4379_v36 = vadd.f32 %v4346_v63, %v4283_v62  ;;  %v10573_v10 = vld [vmem:[#allocation114_spill] sm:$0xff]  ;;  %v10575_v63 = vld [vmem:[#allocation132_spill] sm:$0xff] }
 0x59d   : > { %4473 = vst [vmem:[%s9436_s19 + $0x60] sm:$0xf] %v5640_v39  ;;  %4668 = vrot.lane.b32.xlu1 %v4631_v58, %s6518_s12  ;;  %4778 = vrot.lane.b32.xlu0 %v4742_v57, %s6518_s12  ;;  %v9534_v30 = vmul.f32 %v9375_v11, %v4583_v46  ;;  %v10574_v57 = vld [vmem:[#allocation73_spill] sm:$0xff]  ;;  %v10577_v58 = vsub.f32 %v10575_v63, %v10576_v34  ;;  %v10593_v63 = vld [vmem:[#allocation115_spill] sm:$0xff]  ;;  %v10594_v34 = vld [vmem:[#allocation142_spill] sm:$0xff] }
 0x59e   : > { %v6182_v5 = vpop.eup %6181  ;;  %v4395_v14 = vsel %vm2501_vm0, %v4267_v49, %v4379_v36  ;;  %v10578_v36 = vld [vmem:[#allocation103_spill] sm:$0xff] }
 0x59f   : > { %v4585_v20 = vmul.f32 %v6182_v5, %v10565_v31  ;;  %v5642_v13 = vpack.c.bf16 %v4395_v14, %v4395_v14  ;;  %v4318_v19 = vpop.permute.xlu1 %4317  ;;  %v4635_v52 = vmul.f32 %v9534_v30, %v10574_v57  ;;  %v10579_v5 = vld [vmem:[#allocation50_spill] sm:$0xff]  ;;  %v10590_v57 = vld [vmem:[#allocation61_spill] sm:$0xff] }
 0x5a0   : > { %v4365_v35 = vadd.f32 %v4318_v19, %v4269_v44  ;;  %v4272_v14 = vmul.f32 %v10579_v5, %v10578_v36  ;;  %v4748_v44 = vmul.f32 %v10580_v33, %v9423_v55  ;;  %v10582_v19 = vld [vmem:[#allocation79_spill] sm:$0xff] }
 0x5a1   : > { %4475 = vst [vmem:[%s9436_s19 + $0x70] sm:$0xf] %v5642_v13  ;;  %4672 = vrot.lane.b32.xlu1 %v4633_v6, %s6518_s12  ;;  %4782 = vrot.lane.b32.xlu0 %v4744_v59, %s6518_s12  ;;  %v9551_v8 = vmul.f32 %v9375_v11, %v4585_v20  ;;  %v10581_v59 = vld [vmem:[#allocation120_spill] sm:$0xff] }
 0x5a2   : > { %v6184_v0 = vpop.eup %6183  ;;  %v4381_v16 = vsel %vm2501_vm0, %v10569_v50, %v4365_v35 }
 0x5a3   : > { %v4587_v43 = vmul.f32 %v6184_v0, %v10573_v10  ;;  %v5628_v42 = vpack.c.bf16 %v4381_v16, %v4381_v16  ;;  %v4320_v62 = vpop.permute.xlu1 %4319  ;;  %v4637_v37 = vmul.f32 %v9551_v8, %v10582_v19  ;;  %v10583_v0 = vld [vmem:[#allocation66_spill] sm:$0xff]  ;;  %v10586_v16 = vld [vmem:[#allocation109_spill] sm:$0xff] }
 0x5a4   : > { %v4366_v46 = vadd.f32 %v4320_v62, %v4270_v47  ;;  %v10585_v24 = vsub.f32 %v10583_v0, %v10584_v54  ;;  %v4274_v47 = vmul.f32 %v10587_v1, %v10586_v16  ;;  %v10588_v10 = vld [vmem:[#allocation85_spill] sm:$0xff]  ;;  %v10601_v0 = vld [vmem:[#allocation56_spill] sm:$0xff] }
 0x5a5   : > { %4461 = vst [vmem:[%s9436_s19] sm:$0xf] %v5628_v42  ;;  %4676 = vrot.lane.b32.xlu1 %v4635_v52, %s6518_s12  ;;  %4786 = vrot.lane.b32.xlu0 %v4746_v2, %s6518_s12  ;;  %v9568_v60 = vmul.f32 %v9375_v11, %v4587_v43  ;;  %v10589_v43 = vld [vmem:[#allocation135_spill] sm:$0xff]  ;;  %v10602_v1 = vld [vmem:[#allocation65_spill] sm:$0xff] }
 0x5a6   : > { %v6186_v39 = vpop.eup %6185  ;;  %v4382_v49 = vsel %vm2501_vm0, %v10577_v58, %v4366_v46  ;;  %v4750_v42 = vmul.f32 %v10589_v43, %v9433_v61  ;;  %v10591_v52 = vld [vmem:[#allocation67_spill] sm:$0xff]  ;;  %v4276_v58 = vmul.f32 %v10594_v34, %v10593_v63 }
 0x5a7   : > { %v4589_v31 = vmul.f32 %v6186_v39, %v10581_v59  ;;  %v5629_v20 = vpack.c.bf16 %v4382_v49, %v4382_v49  ;;  %v4324_v13 = vpop.permute.xlu1 %4323  ;;  %v10592_v46 = vsub.f32 %v10590_v57, %v10591_v52 }
 0x5a8   : > { %v4368_v6 = vadd.f32 %v4324_v13, %v4272_v14  ;;  %v10595_v14 = vld [vmem:[#allocation91_spill] sm:$0xff]  ;;  %v10598_v13 = vld [vmem:[#allocation62_spill] sm:$0xff] }
 0x5a9   : > { %v9574_v35 = vmul.f32 %v9375_v11, %v4589_v31  ;;  %4462 = vst [vmem:[%s9436_s19 + $0x8] sm:$0xf] %v5629_v20  ;;  %4680 = vrot.lane.b32.xlu1 %v4637_v37, %s6518_s12  ;;  %4790 = vrot.lane.b32.xlu0 %v4748_v44, %s6518_s12  ;;  %v4639_v11 = vmul.f32 %v9568_v60, %v10588_v10  ;;  %v10596_v44 = vld [vmem:[#allocation59_spill] sm:$0xff]  ;;  %v10597_v20 = vld [vmem:[#allocation145_spill] sm:$0xff] }
 0x5aa   : > { %v4384_v50 = vsel %vm2501_vm0, %v10585_v24, %v4368_v6  ;;  %v4752_v59 = vmul.f32 %v10596_v44, %v9450_v23  ;;  %v10599_v19 = vsub.f32 %v10597_v20, %v10598_v13  ;;  %v10600_v6 = vld [vmem:[#allocation121_spill] sm:$0xff] }
 0x5ab   : > { %v5631_v41 = vpack.c.bf16 %v4384_v50, %v4384_v50  ;;  %v4328_v2 = vpop.permute.xlu1 %4327  ;;  %v4641_v33 = vmul.f32 %v9574_v35, %v10595_v14  ;;  %v4278_v54 = vmul.f32 %v10601_v0, %v10600_v6  ;;  %v10604_v10 = vld [vmem:[#allocation141_spill] sm:$0xff] }
 0x5ac   : > { %v4370_v62 = vadd.f32 %v4328_v2, %v4274_v47  ;;  %v4739_v47 = vmul.f32 %v10602_v1, %v9465_v28  ;;  %v10603_v2 = vld [vmem:[#allocation69_spill] sm:$0xff]  ;;  %v10616_v1 = vsub.f32 %v9369_v9, %v9371_v38 }
 0x5ad   : > { %4464 = vst [vmem:[%s9436_s19 + $0x18] sm:$0xf] %v5631_v41  ;;  %4684 = vrot.lane.b32.xlu1 %v4639_v11, %s6518_s12  ;;  %4794 = vrot.lane.b32.xlu0 %v4750_v42, %s6518_s12  ;;  %v10605_v11 = vsub.f32 %v10603_v2, %v10604_v10  ;;  %v10606_v42 = vld [vmem:[#allocation123_spill] sm:$0xff]  ;;  %v10612_v44 = vld [vmem:[#allocation125_spill] sm:$0xff] }
 0x5ae   : > { %v4386_v39 = vsel %vm2501_vm0, %v10592_v46, %v4370_v62  ;;  %v10607_v62 = vld [vmem:[#allocation133_spill] sm:$0xff] }
 0x5af   : > { %v5633_v49 = vpack.c.bf16 %v4386_v39, %v4386_v39  ;;  %v4332_v5 = vpop.permute.xlu1 %4331  ;;  %v4280_v57 = vmul.f32 %v10607_v62, %v10606_v42  ;;  %v10608_v39 = vld [vmem:[#allocation136_spill] sm:$0xff]  ;;  %v10619_v9 = vld [vmem:[#allocation29_spill] sm:$0xff] }
 0x5b0   : > { %v4372_v31 = vadd.f32 %v4332_v5, %v4276_v58  ;;  %v4741_v34 = vmul.f32 %v10608_v39, %v9478_v26  ;;  %v10610_v5 = vld [vmem:[#allocation70_spill] sm:$0xff]  ;;  %v4747_v38 = vmul.f32 %v10619_v9, %v9534_v30 }
 0x5b1   : > { %4466 = vst [vmem:[%s9436_s19 + $0x28] sm:$0xf] %v5633_v49  ;;  %4688 = vrot.lane.b32.xlu1 %v4641_v33, %s6518_s12  ;;  %4798 = vrot.lane.b32.xlu0 %v4752_v59, %s6518_s12  ;;  %v10609_v49 = vld [vmem:[#allocation32_spill] sm:$0xff]  ;;  %v10613_v59 = vld [vmem:[#allocation129_spill] sm:$0xff] }
 0x5b2   : > { %v4388_v37 = vsel %vm2501_vm0, %v10599_v19, %v4372_v31  ;;  %v10611_v14 = vsub.f32 %v10609_v49, %v10610_v5  ;;  %v4282_v31 = vmul.f32 %v10613_v59, %v10612_v44  ;;  %v10614_v19 = vld [vmem:[#allocation34_spill] sm:$0xff]  ;;  %v10622_v5 = vld [vmem:[#allocation144_spill] sm:$0xff] }
 0x5b3   : > { %v5635_v24 = vpack.c.bf16 %v4388_v37, %v4388_v37  ;;  %v4336_v50 = vpop.permute.xlu1 %4335  ;;  %v4743_v37 = vmul.f32 %v10614_v19, %v9495_v25 }
 0x5b4   : > { %v4374_v41 = vadd.f32 %v4336_v50, %v4278_v54  ;;  %v9636_v54 = vld [vmem:[%s6837_s23 + $0x78] sm:$0xff] }
 0x5b5   : > { %4468 = vst [vmem:[%s9436_s19 + $0x38] sm:$0xf] %v5635_v24  ;;  %4772 = vrot.lane.b32.xlu1 %v4739_v47, %s6518_s12  ;;  %v10615_v24 = vld [vmem:[#allocation36_spill] sm:$0xff] }
 0x5b6   : > { %v4390_v43 = vsel %vm2501_vm0, %v10605_v11, %v4374_v41  ;;  %v4172_v50 = vmul.f32 %v9636_v54, %v10615_v24  ;;  %v10617_v41 = vld [vmem:[#allocation127_spill] sm:$0xff] }
 0x5b7   : > { %v5637_v52 = vpack.c.bf16 %v4390_v43, %v4390_v43  ;;  %v4340_v46 = vpop.permute.xlu1 %4339  ;;  %v4284_v2 = vmul.f32 %v10615_v24, %v10617_v41  ;;  %v10618_v43 = vld [vmem:[#allocation137_spill] sm:$0xff]  ;;  %v10623_v24 = vld [vmem:[#allocation51_spill] sm:$0xff] }
 0x5b8   : > { %v4376_v58 = vadd.f32 %v4340_v46, %v4280_v57  ;;  %v4745_v62 = vmul.f32 %v10618_v43, %v9517_v22  ;;  %v4268_v57 = vsub.f32 %v4172_v50, %v9520_v48  ;;  %v10621_v48 = vld [vmem:[#allocation148_spill] sm:$0xff]  ;;  %v4610_v50 = vmul.f32 %v10623_v24, %v9379_v21 }
 0x5b9   : > { %4470 = vst [vmem:[%s9436_s19 + $0x48] sm:$0xf] %v5637_v52  ;;  %4776 = vrot.lane.b32.xlu1 %v4741_v34, %s6518_s12  ;;  %v10620_v34 = vld [vmem:[#allocation68_spill] sm:$0xff]  ;;  %v4751_v49 = vmul.f32 %v10621_v48, %v9568_v60  ;;  %v4612_v43 = vmul.f32 %v9412_v45, %v9385_v7  ;;  %v4726_v45 = vmul.f32 %v9393_v3, %v10553_v18 }
 0x5ba   : > { %v4392_v33 = vsel %vm2501_vm0, %v10611_v14, %v4376_v58  ;;  %v4749_v58 = vmul.f32 %v10620_v34, %v9551_v8  ;;  %v4753_v14 = vmul.f32 %v10622_v5, %v9574_v35  ;;  %v10625_v5 = vld [vmem:[#allocation52_spill] sm:$0xff] }
 0x5bb   : > { %v5639_v20 = vpack.c.bf16 %v4392_v33, %v4392_v33  ;;  %v4344_v13 = vpop.permute.xlu1 %4343 }
 0x5bc   : > { %v4378_v0 = vadd.f32 %v4344_v13, %v4282_v31 }
 0x5bd   : > { %4472 = vst [vmem:[%s9436_s19 + $0x58] sm:$0xf] %v5639_v20  ;;  %4780 = vrot.lane.b32.xlu1 %v4743_v37, %s6518_s12 }
 0x5be   : > { %v4394_v47 = vsel %vm2501_vm0, %v10616_v1, %v4378_v0  ;;  %v4722_v1 = vmul.f32 %v9379_v21, %v10562_v51  ;;  %v10624_v51 = vld [vmem:[#allocation37_spill] sm:$0xff] }
 0x5bf   : > { %v5641_v10 = vpack.c.bf16 %v4394_v47, %v4394_v47  ;;  %v4348_v11 = vpop.permute.xlu1 %4347 }
 0x5c0   : > { %v4380_v52 = vadd.f32 %v4348_v11, %v4284_v2 }
 0x5c1   : > { %4474 = vst [vmem:[%s9436_s19 + $0x68] sm:$0xf] %v5641_v10  ;;  %4784 = vrot.lane.b32.xlu1 %v4745_v62, %s6518_s12 }
 0x5c2   : > { %v4396_v46 = vsel %vm2501_vm0, %v4268_v57, %v4380_v52  ;;  %v4724_v57 = vmul.f32 %v9385_v7, %v10552_v4 }
 0x5c3   : > { %v5643_v39 = vpack.c.bf16 %v4396_v46, %v4396_v46 }
 0x5c5   : > { %4476 = vst [vmem:[%s9436_s19 + $0x78] sm:$0xf] %v5643_v39  ;;  %4788 = vrot.lane.b32.xlu1 %v4747_v38, %s6518_s12  ;;  %v4614_v38 = vmul.f32 %v10624_v51, %v9393_v3 }
 0x5c9   : > { %4792 = vrot.lane.b32.xlu1 %v4749_v58, %s6518_s12 }
 0x5cd   : > { %4796 = vrot.lane.b32.xlu1 %v4751_v49, %s6518_s12 }
 0x5d1   : > { %4800 = vrot.lane.b32.xlu1 %v4753_v14, %s6518_s12  ;;  %v4616_v14 = vmul.f32 %v10625_v5, %v9399_v40 }
 0x5e3   : > { %v4659_v33 = vpop.permute.xlu0 %4658 }
 0x5e4   : > { %v4706_v10 = vsub.f32 %v4610_v50, %v4659_v33 }
 0x5e7   : > { %v4663_v59 = vpop.permute.xlu0 %4662 }
 0x5e8   : > { %v4708_v9 = vsub.f32 %v4612_v43, %v4663_v59  ;;  %v4728_v59 = vmul.f32 %v9399_v40, %v10555_v29 }
 0x5ef   : > { %v4667_v31 = vpop.permute.xlu0 %4666 }
 0x5f0   : > { %v4710_v4 = vsub.f32 %v4614_v38, %v4667_v31  ;;  %v10626_v31 = vld [vmem:[#allocation58_spill] sm:$0xff] }
 0x5f3   : > { %v4671_v20 = vpop.permute.xlu0 %4670 }
 0x5f4   : > { %v4712_v18 = vsub.f32 %v4616_v14, %v4671_v20  ;;  %v6251_v20 = vld [vmem:[%s6837_s23 + $0x50] sm:$0xff]  ;;  %v4736_v14 = vmul.f32 %v9450_v23, %v10463_v12 }
 0x5f7   : > { %v4675_v13 = vpop.permute.xlu0 %4674 }
 0x5fb   : > { %v4679_v19 = vpop.permute.xlu0 %4678 }
 0x5ff   : > { %v9665_v37 = vpop.permute.xlu0 %4682 }
 0x603   : > { %v9667_v0 = vpop.permute.xlu0 %4686 }
 0x607   : > { %v9673_v47 = vpop.permute.xlu1 %4660  ;;  %v4771_v2 = vpop.permute.xlu0 %4770 }
 0x608   : > { %v4818_v11 = vadd.f32 %v4771_v2, %v4722_v1  ;;  %v4618_v2 = vmul.f32 %v10626_v31, %v9408_v15 }
 0x60a   : > { %v4834_v62 = vsel %vm2501_vm0, %v4706_v10, %v4818_v11  ;;  %v4730_v11 = vmul.f32 %v9408_v15, %v10434_v56 }
 0x60b   : > { %v5644_v52 = vpack.c.bf16 %v4834_v62, %v4834_v62  ;;  %v9680_v46 = vpop.permute.xlu1 %4664  ;;  %v4775_v39 = vpop.permute.xlu0 %4774  ;;  %v4714_v62 = vsub.f32 %v4618_v2, %v4675_v13  ;;  %v10628_v2 = vld [vmem:[#allocation60_spill] sm:$0xff] }
 0x60c   : > { %v4820_v21 = vadd.f32 %v4775_v39, %v4724_v57 }
 0x60d   : > { %4914 = vst [vmem:[%s9436_s19 + $0x4] sm:$0xf] %v5644_v52  ;;  %v4620_v52 = vmul.f32 %v6251_v20, %v9423_v55  ;;  %v4727_v20 = vmul.f32 %v9495_v25, %v10586_v16 }
 0x60e   : > { %v4836_v34 = vsel %vm2501_vm0, %v4708_v9, %v4820_v21  ;;  %v4732_v9 = vmul.f32 %v9423_v55, %v10440_v27 }
 0x60f   : > { %v5646_v58 = vpack.c.bf16 %v4836_v34, %v4836_v34  ;;  %v9688_v48 = vpop.permute.xlu1 %4668  ;;  %v4779_v7 = vpop.permute.xlu0 %4778  ;;  %v4716_v51 = vsub.f32 %v4620_v52, %v4679_v19  ;;  %v6252_v34 = vld [vmem:[%s6837_s23 + $0x60] sm:$0xff]  ;;  %v4624_v19 = vmul.f32 %v9501_v32, %v9450_v23 }
 0x610   : > { %v4822_v49 = vadd.f32 %v4779_v7, %v4726_v45  ;;  %v4622_v13 = vmul.f32 %v6252_v34, %v9433_v61 }
 0x611   : > { %4916 = vst [vmem:[%s9436_s19 + $0x14] sm:$0xf] %v5646_v58  ;;  %v4734_v58 = vmul.f32 %v9433_v61, %v10452_v53  ;;  %v4720_v61 = vsub.f32 %v4624_v19, %v9667_v0  ;;  %v4613_v0 = vmul.f32 %v10628_v2, %v9478_v26 }
 0x612   : > { %v4838_v33 = vsel %vm2501_vm0, %v4710_v4, %v4822_v49  ;;  %v4718_v55 = vsub.f32 %v4622_v13, %v9665_v37  ;;  %v10627_v37 = vld [vmem:[#allocation138_spill] sm:$0xff] }
 0x613   : > { %v5648_v24 = vpack.c.bf16 %v4838_v33, %v4838_v33  ;;  %v9696_v50 = vpop.permute.xlu1 %4672  ;;  %v4783_v3 = vpop.permute.xlu0 %4782 }
 0x614   : > { %v4824_v1 = vadd.f32 %v4783_v3, %v4728_v59  ;;  %v4611_v3 = vmul.f32 %v10627_v37, %v9465_v28 }
 0x615   : > { %4918 = vst [vmem:[%s9436_s19 + $0x24] sm:$0xf] %v5648_v24 }
 0x616   : > { %v4840_v10 = vsel %vm2501_vm0, %v4712_v18, %v4824_v1  ;;  %v4723_v18 = vmul.f32 %v9465_v28, %v10570_v17  ;;  %v4707_v12 = vsub.f32 %v4611_v3, %v9673_v47  ;;  %v10629_v17 = vld [vmem:[#allocation38_spill] sm:$0xff]  ;;  %v4737_v3 = vmul.f32 %v9574_v35, %v10617_v41 }
 0x617   : > { %v5650_v43 = vpack.c.bf16 %v4840_v10, %v4840_v10  ;;  %v9704_v40 = vpop.permute.xlu1 %4676  ;;  %v4787_v29 = vpop.permute.xlu0 %4786  ;;  %v4615_v47 = vmul.f32 %v10629_v17, %v9495_v25 }
 0x618   : > { %v4826_v57 = vadd.f32 %v4787_v29, %v4730_v11  ;;  %v4725_v11 = vmul.f32 %v9478_v26, %v10578_v36  ;;  %v10630_v36 = vld [vmem:[#allocation139_spill] sm:$0xff] }
 0x619   : > { %4920 = vst [vmem:[%s9436_s19 + $0x34] sm:$0xf] %v5650_v43 }
 0x61a   : > { %v4842_v39 = vsel %vm2501_vm0, %v4714_v62, %v4826_v57  ;;  %v4709_v62 = vsub.f32 %v4613_v0, %v9680_v46  ;;  %v4617_v46 = vmul.f32 %v10630_v36, %v9517_v22 }
 0x61b   : > { %v5652_v21 = vpack.c.bf16 %v4842_v39, %v4842_v39  ;;  %v9712_v56 = vpop.permute.xlu1 %4680  ;;  %v4791_v15 = vpop.permute.xlu0 %4790 }
 0x61c   : > { %v4828_v38 = vadd.f32 %v4791_v15, %v4732_v9  ;;  %v4711_v9 = vsub.f32 %v4615_v47, %v9688_v48  ;;  %v4729_v15 = vmul.f32 %v9517_v22, %v10593_v63  ;;  %v4713_v25 = vsub.f32 %v4617_v46, %v9696_v50  ;;  %v10631_v48 = vld [vmem:[#allocation31_spill] sm:$0xff] }
 0x61d   : > { %4922 = vst [vmem:[%s9436_s19 + $0x44] sm:$0xf] %v5652_v21  ;;  %v4619_v34 = vmul.f32 %v10631_v48, %v9534_v30 }
 0x61e   : > { %v4844_v45 = vsel %vm2501_vm0, %v4716_v51, %v4828_v38 }
 0x61f   : > { %v5654_v7 = vpack.c.bf16 %v4844_v45, %v4844_v45  ;;  %v9720_v4 = vpop.permute.xlu1 %4684  ;;  %v4795_v27 = vpop.permute.xlu0 %4794  ;;  %v4731_v45 = vmul.f32 %v9534_v30, %v10600_v6  ;;  %v4715_v22 = vsub.f32 %v4619_v34, %v9704_v40  ;;  %v6254_v6 = vld [vmem:[%s6837_s23 + $0x68] sm:$0xff] }
 0x620   : > { %v4830_v49 = vadd.f32 %v4795_v27, %v4734_v58  ;;  %v6253_v27 = vld [vmem:[%s6837_s23 + $0x58] sm:$0xff]  ;;  %v4623_v40 = vmul.f32 %v6254_v6, %v9568_v60 }
 0x621   : > { %4924 = vst [vmem:[%s9436_s19 + $0x54] sm:$0xf] %v5654_v7  ;;  %v4621_v50 = vmul.f32 %v6253_v27, %v9551_v8 }
 0x622   : > { %v4846_v5 = vsel %vm2501_vm0, %v4718_v55, %v4830_v49  ;;  %v4733_v49 = vmul.f32 %v9551_v8, %v10606_v42  ;;  %v4719_v8 = vsub.f32 %v4623_v40, %v9720_v4 }
 0x623   : > { %v5656_v33 = vpack.c.bf16 %v4846_v5, %v4846_v5  ;;  %v9729_v59 = vpop.permute.xlu1 %4688  ;;  %v4799_v53 = vpop.permute.xlu0 %4798 }
 0x624   : > { %v4832_v24 = vadd.f32 %v4799_v53, %v4736_v14  ;;  %v4717_v14 = vsub.f32 %v4621_v50, %v9712_v56  ;;  %v4735_v53 = vmul.f32 %v9568_v60, %v10612_v44  ;;  %v4625_v56 = vmul.f32 %v9636_v54, %v9574_v35 }
 0x625   : > { %4926 = vst [vmem:[%s9436_s19 + $0x64] sm:$0xf] %v5656_v33 }
 0x626   : > { %v4848_v32 = vsel %vm2501_vm0, %v4720_v61, %v4832_v24  ;;  %v4721_v60 = vsub.f32 %v4625_v56, %v9729_v59 }
 0x627   : > { %v5658_v1 = vpack.c.bf16 %v4848_v32, %v4848_v32  ;;  %v4773_v31 = vpop.permute.xlu1 %4772 }
 0x628   : > { %v4819_v23 = vadd.f32 %v4773_v31, %v4723_v18 }
 0x629   : > { %4928 = vst [vmem:[%s9436_s19 + $0x74] sm:$0xf] %v5658_v1 }
 0x62a   : > { %v4835_v10 = vsel %vm2501_vm0, %v4707_v12, %v4819_v23 }
 0x62b   : > { %v5645_v43 = vpack.c.bf16 %v4835_v10, %v4835_v10  ;;  %v4777_v29 = vpop.permute.xlu1 %4776 }
 0x62c   : > { %v4821_v28 = vadd.f32 %v4777_v29, %v4725_v11 }
 0x62d   : > { %4915 = vst [vmem:[%s9436_s19 + $0xc] sm:$0xf] %v5645_v43 }
 0x62e   : > { %v4837_v57 = vsel %vm2501_vm0, %v4709_v62, %v4821_v28 }
 0x62f   : > { %v5647_v52 = vpack.c.bf16 %v4837_v57, %v4837_v57  ;;  %v4781_v39 = vpop.permute.xlu1 %4780 }
 0x630   : > { %v4823_v26 = vadd.f32 %v4781_v39, %v4727_v20 }
 0x631   : > { %4917 = vst [vmem:[%s9436_s19 + $0x1c] sm:$0xf] %v5647_v52 }
 0x632   : > { %v4839_v21 = vsel %vm2501_vm0, %v4711_v9, %v4823_v26 }
 0x633   : > { %v5649_v51 = vpack.c.bf16 %v4839_v21, %v4839_v21  ;;  %v4785_v38 = vpop.permute.xlu1 %4784 }
 0x634   : > { %v4825_v16 = vadd.f32 %v4785_v38, %v4729_v15 }
 0x635   : > { %4919 = vst [vmem:[%s9436_s19 + $0x2c] sm:$0xf] %v5649_v51 }
 0x636   : > { %v4841_v13 = vsel %vm2501_vm0, %v4713_v25, %v4825_v16 }
 0x637   : > { %v5651_v58 = vpack.c.bf16 %v4841_v13, %v4841_v13  ;;  %v4789_v7 = vpop.permute.xlu1 %4788 }
 0x638   : > { %v4827_v63 = vadd.f32 %v4789_v7, %v4731_v45 }
 0x639   : > { %4921 = vst [vmem:[%s9436_s19 + $0x3c] sm:$0xf] %v5651_v58 }
 0x63a   : > { %v4843_v55 = vsel %vm2501_vm0, %v4715_v22, %v4827_v63 }
 0x63b   : > { %v5653_v19 = vpack.c.bf16 %v4843_v55, %v4843_v55  ;;  %v4793_v5 = vpop.permute.xlu1 %4792 }
 0x63c   : > { %v4829_v30 = vadd.f32 %v4793_v5, %v4733_v49 }
 0x63d   : > { %4923 = vst [vmem:[%s9436_s19 + $0x4c] sm:$0xf] %v5653_v19 }
 0x63e   : > { %v4845_v33 = vsel %vm2501_vm0, %v4717_v14, %v4829_v30 }
 0x63f   : > { %v5655_v61 = vpack.c.bf16 %v4845_v33, %v4845_v33  ;;  %v4797_v24 = vpop.permute.xlu1 %4796 }
 0x640   : > { %v4831_v42 = vadd.f32 %v4797_v24, %v4735_v53 }
 0x641   : > { %4925 = vst [vmem:[%s9436_s19 + $0x5c] sm:$0xf] %v5655_v61 }
 0x642   : > { %v4847_v37 = vsel %vm2501_vm0, %v4719_v8, %v4831_v42 }
 0x643   : > { %v5657_v32 = vpack.c.bf16 %v4847_v37, %v4847_v37  ;;  %v4801_v18 = vpop.permute.xlu1 %4800 }
 0x644   : > { %v4833_v44 = vadd.f32 %v4801_v18, %v4737_v3 }
 0x645   : > { %4927 = vst [vmem:[%s9436_s19 + $0x6c] sm:$0xf] %v5657_v32 }
 0x646   : > { %v4849_v1 = vsel %vm2501_vm0, %v4721_v60, %v4833_v44 }
 0x647   : > { %v5659_v31 = vpack.c.bf16 %v4849_v1, %v4849_v1 }
 0x649   : > { %4929 = vst [vmem:[%s9436_s19 + $0x7c] sm:$0xf] %v5659_v31 }
 0x64a   : > { %s5660_s30 = sshll.u32 %s6591_s28, 10  ;;  %s4970_s22 = sshll.u32 %s8126_s11, 4  ;;  %s4971_s22 = int_to_ptr.vmem [resolvable:$true] %s4970_s22 }
 0x64b   : > { %s4953_s16 = scalar_lea.hbm %s9911_s5, %s5660_s30  ;;  %s6519_s8 = smov 1024  }
 0x64c   : > { %p10632_p3 = scmp.ne.s32.totalorder %s10178_s13, 0  ;;  %s6520_s17 = smov 2048  }
 0x64d   : > { %s6521_s1 = smov 16   ;;  %s6522_s20 = smov 64  }
 0x64e   : > { %5870 = sst [smem:[#allocation16]] (%p10632_p3), %s6519_s8  ;;  %s6523_s27 = smov 4  }
 0x64f   : > { %5871 = sst [smem:[#allocation16 + $0x1]] (%p10632_p3), %s6520_s17  ;;  %s6524_s15 = smov [#allocation15]  }
 0x650   : > { %5872 = sst [smem:[#allocation16 + $0x2]] (%p10632_p3), %s6521_s1  ;;  %s6525_s29 = smov 0  }
 0x651   : > { %5873 = sst [smem:[#allocation16 + $0x3]] (%p10632_p3), %s6522_s20  ;;  %s5662_s23 = sshll.u32 %s6591_s28, 11 }
 0x652   : > { %5874 = sst [smem:[#allocation16 + $0x4]] (%p10632_p3), %s6522_s20  ;;  %s5000_s18 = sshll.u32 %s9436_s19, 4  ;;  %s9824_s18 = int_to_ptr.vmem [resolvable:$true] %s5000_s18 }
 0x653   : > { %5875 = sst [smem:[#allocation16 + $0x5]] (%p10632_p3), %s6523_s27  ;;  %s9822_s11 = scalar_lea.hbm %s9912_s6, %s5662_s23 }
 0x654   : > { %5876 = dma.general (%p10632_p3), %s4971_s22, 4096, %s4953_s16, %s4931_s3, %s6524_s15, [#allocation16], %s6525_s29, 0  }
 0x655   : > { %s6401_s30 = scalar_lea.vmem %s9824_s18, 2048  ;;  %s6526_s3 = smov [#allocation12]  }
 0x656   : > { %p6402_p8 = scmp.ne.s32.totalorder %s9824_s18, %s6401_s30  ;;  %s6405_s22 = sshll.u32 %s6526_s3, 4  ;;  %s6406_s22 = int_to_ptr.vmem [resolvable:$false] %s6405_s22 }
 0x657   : > { %s6407_s19 = scalar_lea.vmem %s6406_s22, 4096  ;;  %p6408_p7 = scmp.lt.s32.totalorder %s9824_s18, %s6406_s22 }
 0x658   : > { %p6403_p1 = pnand %p6402_p8, %p10632_p3  ;;  %p6409_p4 = scmp.lt.s32.totalorder %s6407_s19, %s6401_s30 }
 0x65a   : > { %p6404_p11 = pneg %p6403_p1  ;;  %p6410_p5 = por %p6409_p4, %p6408_p7 }
 0x65c   : > { %p6411_p10 = pnand %p6410_p5, %p6404_p11 }
 0x65e   : > { %6414 = shalt.err (!%p6411_p10)
}
 0x65f   : > { %s6415_s21 = scalar_lea.hbm %s9822_s11, 2048  ;;  %s6419_s8 = scalar_lea.hbm %s9912_s6, 4096 }
 0x660   : > { %p6416_p0 = scmp.ne.s32.totalorder %s9822_s11, %s6415_s21  ;;  %p6420_p2 = scmp.lt.u32.totalorder %s9822_s11, %s9912_s6 }
 0x661   : > { %p6421_p9 = scmp.lt.u32.totalorder %s6419_s8, %s6415_s21  ;;  %p6423_p8 = scmp.lt.u32.totalorder %s6415_s21, %s9822_s11 }
 0x662   : > { %p6417_p6 = pnand %p6416_p0, %p10632_p3 }
 0x663   : > { %p6422_p13 = por %p6421_p9, %p6420_p2 }
 0x664   : > { %p6418_p12 = pneg %p6417_p6 }
 0x665   : > { %p6424_p1 = por %p6423_p8, %p6422_p13 }
 0x667   : > { %p6425_p11 = pnand %p6424_p1, %p6418_p12 }
 0x669   : > { %6428 = shalt.err (!%p6425_p11)
}
 0x66a   : > { %s6527_s20 = smov 128   ;;  %s6528_s27 = smov 8  }
 0x66b   : > { %5877 = dma.vmem_to_hbm [thread:$0]  (%p10632_p3), %s9824_s18, 2048, %s9822_s11, %s9794_s9, %s6527_s20, %s6527_s20, %s6528_s27  }
 0x66c   : > { %s9856_s12 = scalar_lea.hbm %s9913_s7, %s5662_s23  ;;  %s5017_s14 = sshll.u32 %s7453_s24, 4  ;;  %s9859_s14 = int_to_ptr.vmem [resolvable:$true] %s5017_s14 }
 0x66d   : > { %s6429_s30 = scalar_lea.vmem %s9859_s14, 2048  ;;  %s6529_s3 = smov [#allocation14]  }
 0x66e   : > { %p6430_p7 = scmp.ne.s32.totalorder %s9859_s14, %s6429_s30  ;;  %s6433_s22 = sshll.u32 %s6529_s3, 4  ;;  %s6434_s22 = int_to_ptr.vmem [resolvable:$false] %s6433_s22 }
 0x66f   : > { %s6435_s28 = scalar_lea.vmem %s6434_s22, 4096  ;;  %p6436_p10 = scmp.lt.s32.totalorder %s9859_s14, %s6434_s22 }
 0x670   : > { %p6431_p4 = pnand %p6430_p7, %p10632_p3  ;;  %p6437_p0 = scmp.lt.s32.totalorder %s6435_s28, %s6429_s30 }
 0x672   : > { %p6432_p5 = pneg %p6431_p4  ;;  %p6438_p6 = por %p6437_p0, %p6436_p10 }
 0x674   : > { %p6439_p12 = pnand %p6438_p6, %p6432_p5 }
 0x676   : > { %6442 = shalt.err (!%p6439_p12)
}
 0x677   : > { %s6443_s24 = scalar_lea.hbm %s9856_s12, 2048  ;;  %s6447_s11 = scalar_lea.hbm %s9913_s7, 4096 }
 0x678   : > { %p6444_p2 = scmp.ne.s32.totalorder %s9856_s12, %s6443_s24  ;;  %p6448_p8 = scmp.lt.u32.totalorder %s9856_s12, %s9913_s7 }
 0x679   : > { %p6449_p1 = scmp.lt.u32.totalorder %s6447_s11, %s6443_s24  ;;  %p6451_p7 = scmp.lt.u32.totalorder %s6443_s24, %s9856_s12 }
 0x67a   : > { %p6445_p9 = pnand %p6444_p2, %p10632_p3 }
 0x67b   : > { %p6450_p11 = por %p6449_p1, %p6448_p8 }
 0x67c   : > { %p6446_p13 = pneg %p6445_p9 }
 0x67d   : > { %p6452_p4 = por %p6451_p7, %p6450_p11 }
 0x67f   : > { %p6453_p5 = pnand %p6452_p4, %p6446_p13 }
 0x681   : > { %6456 = shalt.err (!%p6453_p5)
}
 0x682   : > { %5878 = dma.vmem_to_hbm [thread:$0]  (%p10632_p3), %s9859_s14, 2048, %s9856_s12, %s9794_s9, %s6527_s20, %s6527_s20, %s6528_s27  }
 0x683 PF: > { %s10633_s10 = sld [smem:[#allocation22_spill]]  ;;  %s10634_s16 = sld [smem:[#allocation26_spill]] }
 0x684   : > { %s10635_s8 = sld [smem:[#allocation23_spill]] }
 0x689   : > { %s5032_s17 = sand.u32 1, %s10633_s10   ;;  %p10636_p10 = scmp.ne.s32.totalorder %s10634_s16, 0 }
 0x68a   : > { %p10637_p0 = scmp.ge.s32.totalorder %s10635_s8, 2  ;;  %s5033_s1 = scalar_lea.sflag [#allocation4], %s5032_s17 }
 0x68c   : > { %p5900_p6 = pnand %p10637_p0, %p10636_p10 }
 0x68e   : > { %6486 = dma.done.wait (!%p5900_p6), %s5033_s1, 4096  }
 0x68f   : > { %6488 = vsyncadd (!%p5900_p6), %s5033_s1, 4294963200  ;;  %s10638_s13 = sadd.s32 4294967294, %s10635_s8  }
 0x690   : > { %s5041_s15 = sand.u32 1, %s10638_s13  }
 0x691   : > { %s5042_s29 = scalar_lea.sflag [#allocation13], %s5041_s15 }
 0x692   : > { %6490 = dma.done.wait (!%p5900_p6), %s5042_s29, 4096  }
 0x693   : > { %6492 = vsyncadd (!%p5900_p6), %s5042_s29, 4294963200  ;;  %s10639_s27 = sld [smem:[#allocation24_spill]]  ;;  %s10640_s9 = sld [smem:[#allocation25_spill]] }
 0x694   : > { %s10641_s24 = smov %s6499_s25  ;;  %s10642_s25 = smov %s6503_s26 }
 0x699   : > { %p28_p3 = scmp.ge.s32.totalorder %s10639_s27, 4   ;;  %s10643_s26 = smov %s10640_s9 }
 0x69b   :  { %30 = sbr.rel (!%p28_p3) target bundleno = 13 (0xd), region = 157 }
 0x6a2   :  { %5056 = vsyncpa [#allocation3], 1 }
 0x6a3   :  { %5058 = vsyncpa [#allocation3 + $0x1], 1 }
 0x6a4   :  { %5059 = vsyncpa [#allocation6], 1 }
 0x6a5   :  { %5061 = vsyncpa [#allocation6 + $0x1], 1 }
 0x6a6   :  { %5062 = vsyncpa [#allocation9], 1 }
 0x6a7   :  { %5063 = vsyncpa [#allocation4], 1 }
 0x6a8   :  { %5065 = vsyncpa [#allocation4 + $0x1], 1 }
 0x6a9   :  { %5066 = vsyncpa [#allocation13], 1 }
 0x6aa   :  { %5068 = vsyncpa [#allocation13 + $0x1], 1 }

</bundles_post_ra>
